<compile_context>
chip_gen: v5e
topology: v5e:2x2
jax: 0.10.0
libtpu: 0.0.40
codegen_flags: <defaults>
</compile_context>

<pallas_src>
import functools

import jax
import jax.numpy as jnp
from jax.experimental import pallas as pl
from jax.experimental.pallas import tpu as pltpu

BN_EPS = 1e-5
CPAD = 128          # lane-dense padded channel slab carried through all stages


def _full_spec(shape):
    # single-block spec: block == full array (allowed even if not (8,128)-aligned)
    return pl.BlockSpec(shape, lambda i: (0,) * len(shape))


# ---------------------------------------------------------------------------
# Fused whole-network kernel
# ---------------------------------------------------------------------------
def _m5_kernel(p1_ref, w1_ref, w2_ref, w3_ref, w4_ref,
               gam_ref, bet_ref, wfc_ref, bfc_ref,
               o_ref, buf_ref, *, batch, t1, cins):
    f32 = jnp.float32
    bf16 = jnp.bfloat16

    def bn_relu(y, idx):
        # Train-mode BatchNorm1d (biased variance, eps=1e-5) + ReLU, two-pass
        # form (subtract mean first, then square) for better numerics.
        n = y.shape[0]
        inv_n = 1.0 / n
        mu = jnp.sum(y, axis=0, keepdims=True) * inv_n
        d = y - mu
        var = jnp.sum(d * d, axis=0, keepdims=True) * inv_n
        scale = jax.lax.rsqrt(var + BN_EPS) * gam_ref[idx:idx + 1, :]
        return jnp.maximum(d * scale + bet_ref[idx:idx + 1, :], 0.0)

    def pool4(y):
        # MaxPool1d(4).  Rows are (batch, time)-major and every per-stage time
        # extent is a multiple of 4, so groups of 4 consecutive rows never cross
        # a batch boundary.  Stage through (small) VMEM scratch, read 4 strided
        # row sets, elementwise max (VPU).
        n = y.shape[0]
        n4 = n // 4
        buf_ref[0:n, :] = y
        a = buf_ref[pl.ds(0, n4, 4), :]
        b = buf_ref[pl.ds(1, n4, 4), :]
        c = buf_ref[pl.ds(2, n4, 4), :]
        d = buf_ref[pl.ds(3, n4, 4), :]
        return jnp.maximum(jnp.maximum(a, b), jnp.maximum(c, d))

    def conv_k3(x, w_ref, t_len, cin):
        # kernel=3, padding='same' conv.  Activations occupy lanes [0, cin) of
        # the 128-lane slab and the padding lanes are exactly zero, so the three
        # taps are packed along K with XLU lane rolls and fed to the MXU in one
        # (3*cin <= 128), two (2*cin <= 128) or three matmuls.
        n = x.shape[0]
        tt = jax.lax.broadcasted_iota(jnp.int32, (n, 1), 0) % t_len
        ml = (tt != 0).astype(f32)            # left  tap invalid at t == 0
        mr = (tt != t_len - 1).astype(f32)    # right tap invalid at t == t_len-1
        xl = ml * pltpu.roll(x, shift=1, axis=0)          # x[t-1]
        xr = mr * pltpu.roll(x, shift=n - 1, axis=0)      # x[t+1]
        nmat = w_ref.shape[0]
        if nmat == 1:
            slab = (xl + pltpu.roll(x, shift=cin, axis=1)
                    + pltpu.roll(xr, shift=2 * cin, axis=1))
            return jnp.dot(slab.astype(bf16), w_ref[0], preferred_element_type=f32)
        if nmat == 2:
            slab = xl + pltpu.roll(x, shift=cin, axis=1)
            acc = jnp.dot(slab.astype(bf16), w_ref[0], preferred_element_type=f32)
            return acc + jnp.dot(xr.astype(bf16), w_ref[1], preferred_element_type=f32)
        acc = jnp.dot(xl.astype(bf16), w_ref[0], preferred_element_type=f32)
        acc = acc + jnp.dot(x.astype(bf16), w_ref[1], preferred_element_type=f32)
        return acc + jnp.dot(xr.astype(bf16), w_ref[2], preferred_element_type=f32)

    # ---- stage 1: conv1 as 4 pool-phase matmuls + bn1 + relu + pool1 --------
    # Conv bias omitted: a per-channel constant is cancelled by train-mode BN.
    inv_n1 = 1.0 / (batch * t1)
    ys = [jnp.dot(p1_ref[k], w1_ref[...], preferred_element_type=f32)
          for k in range(4)]                                     # 4 x (B*T1/4, 128)
    mu1 = (jnp.sum(ys[0], axis=0, keepdims=True)
           + jnp.sum(ys[1], axis=0, keepdims=True)
           + jnp.sum(ys[2], axis=0, keepdims=True)
           + jnp.sum(ys[3], axis=0, keepdims=True)) * inv_n1
    ds = [yk - mu1 for yk in ys]
    var1 = (jnp.sum(ds[0] * ds[0], axis=0, keepdims=True)
            + jnp.sum(ds[1] * ds[1], axis=0, keepdims=True)
            + jnp.sum(ds[2] * ds[2], axis=0, keepdims=True)
            + jnp.sum(ds[3] * ds[3], axis=0, keepdims=True)) * inv_n1
    scale1 = jax.lax.rsqrt(var1 + BN_EPS) * gam_ref[0:1, :]
    beta1 = bet_ref[0:1, :]
    acts = [jnp.maximum(dk * scale1 + beta1, 0.0) for dk in ds]
    y = jnp.maximum(jnp.maximum(acts[0], acts[1]),
                    jnp.maximum(acts[2], acts[3]))               # fused pool1
    t = t1 // 4

    # ---- stages 2..4: tap-packed conv(k=3,'same') + bn + relu + pool --------
    y = pool4(bn_relu(conv_k3(y, w2_ref, t, cins[0]), 1)); t //= 4
    y = pool4(bn_relu(conv_k3(y, w3_ref, t, cins[1]), 2)); t //= 4
    y = pool4(bn_relu(conv_k3(y, w4_ref, t, cins[2]), 3)); t //= 4

    # ---- head: avg over remaining time, fc1, log_softmax --------------------
    if t == 1:
        xm = y                                # (B, 128): skip the buf round-trip
    else:
        n = y.shape[0]
        buf_ref[0:n, :] = y
        xm = buf_ref[pl.ds(0, batch, t), :]
        for k in range(1, t):
            xm = xm + buf_ref[pl.ds(k, batch, t), :]
        xm = xm * (1.0 / t)

    logits = jnp.dot(xm.astype(bf16), wfc_ref[...],
                     preferred_element_type=f32) + bfc_ref[...]
    m = jnp.max(logits, axis=-1, keepdims=True)
    z = logits - m
    lse = jnp.log(jnp.sum(jnp.exp(z), axis=-1, keepdims=True))
    o_ref[...] = z - lse


# ---------------------------------------------------------------------------
# Weight packing (JAX glue): lane-dense 128-padded slabs, bf16 MXU operands,
# k=3 conv taps packed along K.
# ---------------------------------------------------------------------------
def _pack_params(params):
    f32, bf16 = jnp.float32, jnp.bfloat16
    n_out = params["fc1_w"].shape[0]

    w1 = params["conv1_w"][:, 0, :].T                       # (80, 32)
    w1p = (jnp.zeros((CPAD, CPAD), f32)
           .at[: w1.shape[0], : w1.shape[1]].set(w1).astype(bf16))

    def pack_k3(w):                                          # (Cout, Cin, 3)
        cout, cin, _ = w.shape
        wt = jnp.transpose(w, (2, 1, 0))                     # (3, Cin, Cout)
        if 3 * cin <= CPAD:        # all 3 taps in one matmul
            wp = jnp.zeros((1, CPAD, CPAD), f32)
            for tap in range(3):
                wp = wp.at[0, tap * cin:(tap + 1) * cin, :cout].set(wt[tap])
        elif 2 * cin <= CPAD:      # taps {-1,0} packed, tap {+1} separate
            wp = jnp.zeros((2, CPAD, CPAD), f32)
            wp = wp.at[0, 0:cin, :cout].set(wt[0])
            wp = wp.at[0, cin:2 * cin, :cout].set(wt[1])
            wp = wp.at[1, 0:cin, :cout].set(wt[2])
        else:                      # fallback: three separate matmuls
            wp = jnp.zeros((3, CPAD, CPAD), f32)
            for tap in range(3):
                wp = wp.at[tap, :cin, :cout].set(wt[tap])
        return wp.astype(bf16)

    w2p = pack_k3(params["conv2_w"])
    w3p = pack_k3(params["conv3_w"])
    w4p = pack_k3(params["conv4_w"])

    def padc(v):
        return jnp.zeros((CPAD,), f32).at[: v.shape[0]].set(v)

    gam = jnp.stack([padc(params[f"bn{i}_g"]) for i in (1, 2, 3, 4)])   # (4, 128)
    bet = jnp.stack([padc(params[f"bn{i}_b"]) for i in (1, 2, 3, 4)])   # (4, 128)

    wfc = (jnp.zeros((CPAD, n_out), f32)
           .at[: params["fc1_w"].shape[1], :].set(params["fc1_w"].T).astype(bf16))
    bfc = params["fc1_b"].reshape(1, n_out).astype(f32)
    cins = (params["conv2_w"].shape[1], params["conv3_w"].shape[1],
            params["conv4_w"].shape[1])
    return (w1p, w2p, w3p, w4p, gam, bet, wfc, bfc), cins


# ---------------------------------------------------------------------------
# Parameters (deterministic, PyTorch weight shapes)
# ---------------------------------------------------------------------------
def init_params(key, n_input=1, n_output=35, kernel_size=80, n_channel=32):
    ks = jax.random.split(key, 12)
    f32 = jnp.float32

    def rnd(k, shape, scale=0.05):
        return (scale * jax.random.normal(k, shape)).astype(f32)

    c1, c2 = n_channel, 2 * n_channel
    p = {
        # conv*_b kept for structural parity with the PyTorch module; they are
        # not consumed by the kernel because train-mode BN cancels them exactly.
        "conv1_w": rnd(ks[0], (c1, n_input, kernel_size)),
        "conv1_b": rnd(ks[1], (c1,)),
        "conv2_w": rnd(ks[2], (c1, c1, 3)),
        "conv2_b": rnd(ks[3], (c1,)),
        "conv3_w": rnd(ks[4], (c2, c1, 3)),
        "conv3_b": rnd(ks[5], (c2,)),
        "conv4_w": rnd(ks[6], (c2, c2, 3)),
        "conv4_b": rnd(ks[7], (c2,)),
        "fc1_w":   rnd(ks[8], (n_output, c2)),
        "fc1_b":   rnd(ks[9], (n_output,)),
    }
    for i, c in zip((1, 2, 3, 4), (c1, c1, c2, c2)):
        kk = jax.random.fold_in(ks[10], i)
        p[f"bn{i}_g"] = (1.0 + 0.1 * jax.random.normal(kk, (c,))).astype(f32)
        p[f"bn{i}_b"] = (0.1 * jax.random.normal(jax.random.fold_in(ks[11], i), (c,))).astype(f32)
    return p


# ---------------------------------------------------------------------------
# Full forward pass (mirrors M5_ver01.forward)
# ---------------------------------------------------------------------------
def m5_forward(x, params, kernel_size=80, stride=16):
    B, Cin, L = x.shape
    assert Cin == 1
    T1 = (L - kernel_size) // stride + 1
    # Four MaxPool1d(4) stages: require exact divisibility (true for the driver L).
    # TODO(synk): handle MaxPool1d floor truncation for lengths not multiple of 4^4.
    assert T1 % 256 == 0, "conv1 output length must be a multiple of 4^4"

    # im2col for the stride-16 conv1 (tiny JAX glue), laid out PHASE-MAJOR so the
    # kernel fuses pool1 as a max over 4 contiguous phase matmuls:
    # p1[ph, b*T1/4 + j, :] is the patch for conv1 output time t = 4*j + ph.
    # K padded 80 -> 128 so MXU operands are lane-dense.
    idx = jnp.arange(T1)[:, None] * stride + jnp.arange(kernel_size)[None, :]
    patches = x[:, 0, :][:, idx]                                      # (B, T1, K)
    patches = patches.reshape(B, T1 // 4, 4, kernel_size)
    patches = jnp.transpose(patches, (2, 0, 1, 3)).reshape(4, B * (T1 // 4), kernel_size)
    p1 = jnp.pad(patches, ((0, 0), (0, 0), (0, CPAD - kernel_size))).astype(jnp.bfloat16)

    packed, cins = _pack_params(params)
    n_out = packed[-2].shape[1]
    args = (p1,) + packed

    # VMEM budget: ~0.5 MiB per batch element (phase-major p1 tile, pool scratch,
    # live f32 activations) + ~2 MiB fixed (packed weights, double buffers).
    # Clamped to 64 MiB (v7x physical VMEM): batch ceiling ~60 on v7x, ~120 on
    # v5e/v6e (raise the clamp on those generations if needed).
    vmem_limit = int(min(64 * 1024 * 1024,
                         max(32 * 1024 * 1024,
                             2 * 1024 * 1024 + B * T1 * CPAD * 10)))

    kernel = functools.partial(_m5_kernel, batch=B, t1=T1, cins=cins)
    out = pl.pallas_call(
        kernel,
        out_shape=jax.ShapeDtypeStruct((B, n_out), jnp.float32),
        grid=(1,),
        in_specs=[_full_spec(a.shape) for a in args],
        out_specs=_full_spec((B, n_out)),
        scratch_shapes=[pltpu.VMEM((B * T1 // 4, CPAD), jnp.float32)],
        compiler_params=pltpu.CompilerParams(
            dimension_semantics=("arbitrary",),
            vmem_limit_bytes=vmem_limit),
    )(*args)
    return out.reshape(B, 1, n_out)   # matches PyTorch output shape (B, 1, n_output)


if __name__ == "__main__":
    key = jax.random.PRNGKey(0)
    kx, kp = jax.random.split(key)

    # Smallest length whose conv1 output (256) survives four MaxPool1d(4):
    # L = 80 + 16*255 = 4160  ->  conv1: 256 -> pools: 64, 16, 4, 1
    B, L = 2, 4160
    x = jax.random.normal(kx, (B, 1, L), dtype=jnp.float32)
    params = init_params(kp)

    y = jax.jit(m5_forward)(x, params)
    y = jax.block_until_ready(y)

    assert y.shape == (B, 1, 35), y.shape
    # log-softmax rows must (approximately) sum to 1 in prob space
    assert jnp.allclose(jnp.sum(jnp.exp(y), axis=-1), 1.0, atol=1e-4)
    print("KERNEL_OK")
</pallas_src>

<mosaic_0001>
module attributes {stable_mosaic.version = 11 : i64} {
  func.func @_m5_kernel(%arg0: i32, %arg1: memref<4x128x128xbf16, #tpu.memory_space<vmem>>, %arg2: memref<128x128xbf16, #tpu.memory_space<vmem>>, %arg3: memref<1x128x128xbf16, #tpu.memory_space<vmem>>, %arg4: memref<1x128x128xbf16, #tpu.memory_space<vmem>>, %arg5: memref<2x128x128xbf16, #tpu.memory_space<vmem>>, %arg6: memref<4x128xf32, #tpu.memory_space<vmem>>, %arg7: memref<4x128xf32, #tpu.memory_space<vmem>>, %arg8: memref<128x35xbf16, #tpu.memory_space<vmem>>, %arg9: memref<1x35xf32, #tpu.memory_space<vmem>>, %arg10: memref<2x35xf32, #tpu.memory_space<vmem>>, %arg11: memref<128x128xf32, #tpu.memory_space<vmem>>) attributes {dimension_semantics = [#tpu.dimension_semantics<arbitrary>], iteration_bounds = array<i64: 1>, scalar_prefetch = 0 : i64, scratch_operands = 1 : i64, tpu.core_type = #tpu.core_type<tc>, window_params = [{pipeline_mode = #tpu.pipeline_mode<synchronous>, transform_indices = @transform_0, window_bounds = array<i64: 4, 128, 128>}, {pipeline_mode = #tpu.pipeline_mode<synchronous>, transform_indices = @transform_1, window_bounds = array<i64: 128, 128>}, {pipeline_mode = #tpu.pipeline_mode<synchronous>, transform_indices = @transform_2, window_bounds = array<i64: 1, 128, 128>}, {pipeline_mode = #tpu.pipeline_mode<synchronous>, transform_indices = @transform_3, window_bounds = array<i64: 1, 128, 128>}, {pipeline_mode = #tpu.pipeline_mode<synchronous>, transform_indices = @transform_4, window_bounds = array<i64: 2, 128, 128>}, {pipeline_mode = #tpu.pipeline_mode<synchronous>, transform_indices = @transform_5, window_bounds = array<i64: 4, 128>}, {pipeline_mode = #tpu.pipeline_mode<synchronous>, transform_indices = @transform_6, window_bounds = array<i64: 4, 128>}, {pipeline_mode = #tpu.pipeline_mode<synchronous>, transform_indices = @transform_7, window_bounds = array<i64: 128, 35>}, {pipeline_mode = #tpu.pipeline_mode<synchronous>, transform_indices = @transform_8, window_bounds = array<i64: 1, 35>}, {pipeline_mode = #tpu.pipeline_mode<synchronous>, transform_indices = @transform_9, window_bounds = array<i64: 2, 35>}]} {
    %c0 = arith.constant 0 : index
    %c0_0 = arith.constant 0 : index
    %c0_1 = arith.constant 0 : index
    %0 = vector.load %arg1[%c0, %c0_0, %c0_1] : memref<4x128x128xbf16, #tpu.memory_space<vmem>>, vector<1x128x128xbf16>
    %1 = vector.shape_cast %0 : vector<1x128x128xbf16> to vector<128x128xbf16>
    %c0_2 = arith.constant 0 : index
    %c0_3 = arith.constant 0 : index
    %2 = vector.load %arg2[%c0_2, %c0_3] : memref<128x128xbf16, #tpu.memory_space<vmem>>, vector<128x128xbf16>
    %cst = arith.constant dense<0.000000e+00> : vector<128x128xf32>
    %3 = tpu.matmul %1, %2, %cst {dimension_numbers = #tpu.dot_dimension_numbers<[1], [0], [0], [1], [0, 0, 1, 1], [], []>} : vector<128x128xbf16>, vector<128x128xbf16>, vector<128x128xf32> -> vector<128x128xf32>
    %c1 = arith.constant 1 : index
    %c0_4 = arith.constant 0 : index
    %c0_5 = arith.constant 0 : index
    %4 = vector.load %arg1[%c1, %c0_4, %c0_5] : memref<4x128x128xbf16, #tpu.memory_space<vmem>>, vector<1x128x128xbf16>
    %5 = vector.shape_cast %4 : vector<1x128x128xbf16> to vector<128x128xbf16>
    %c0_6 = arith.constant 0 : index
    %c0_7 = arith.constant 0 : index
    %6 = vector.load %arg2[%c0_6, %c0_7] : memref<128x128xbf16, #tpu.memory_space<vmem>>, vector<128x128xbf16>
    %cst_8 = arith.constant dense<0.000000e+00> : vector<128x128xf32>
    %7 = tpu.matmul %5, %6, %cst_8 {dimension_numbers = #tpu.dot_dimension_numbers<[1], [0], [0], [1], [0, 0, 1, 1], [], []>} : vector<128x128xbf16>, vector<128x128xbf16>, vector<128x128xf32> -> vector<128x128xf32>
    %c2 = arith.constant 2 : index
    %c0_9 = arith.constant 0 : index
    %c0_10 = arith.constant 0 : index
    %8 = vector.load %arg1[%c2, %c0_9, %c0_10] : memref<4x128x128xbf16, #tpu.memory_space<vmem>>, vector<1x128x128xbf16>
    %9 = vector.shape_cast %8 : vector<1x128x128xbf16> to vector<128x128xbf16>
    %c0_11 = arith.constant 0 : index
    %c0_12 = arith.constant 0 : index
    %10 = vector.load %arg2[%c0_11, %c0_12] : memref<128x128xbf16, #tpu.memory_space<vmem>>, vector<128x128xbf16>
    %cst_13 = arith.constant dense<0.000000e+00> : vector<128x128xf32>
    %11 = tpu.matmul %9, %10, %cst_13 {dimension_numbers = #tpu.dot_dimension_numbers<[1], [0], [0], [1], [0, 0, 1, 1], [], []>} : vector<128x128xbf16>, vector<128x128xbf16>, vector<128x128xf32> -> vector<128x128xf32>
    %c3 = arith.constant 3 : index
    %c0_14 = arith.constant 0 : index
    %c0_15 = arith.constant 0 : index
    %12 = vector.load %arg1[%c3, %c0_14, %c0_15] : memref<4x128x128xbf16, #tpu.memory_space<vmem>>, vector<1x128x128xbf16>
    %13 = vector.shape_cast %12 : vector<1x128x128xbf16> to vector<128x128xbf16>
    %c0_16 = arith.constant 0 : index
    %c0_17 = arith.constant 0 : index
    %14 = vector.load %arg2[%c0_16, %c0_17] : memref<128x128xbf16, #tpu.memory_space<vmem>>, vector<128x128xbf16>
    %cst_18 = arith.constant dense<0.000000e+00> : vector<128x128xf32>
    %15 = tpu.matmul %13, %14, %cst_18 {dimension_numbers = #tpu.dot_dimension_numbers<[1], [0], [0], [1], [0, 0, 1, 1], [], []>} : vector<128x128xbf16>, vector<128x128xbf16>, vector<128x128xf32> -> vector<128x128xf32>
    %cst_19 = arith.constant dense<0.000000e+00> : vector<128xf32>
    %16 = vector.multi_reduction <add>, %3, %cst_19 [0] : vector<128x128xf32> to vector<128xf32>
    %17 = vector.shape_cast %16 : vector<128xf32> to vector<1x128xf32>
    %cst_20 = arith.constant dense<0.000000e+00> : vector<128xf32>
    %18 = vector.multi_reduction <add>, %7, %cst_20 [0] : vector<128x128xf32> to vector<128xf32>
    %19 = vector.shape_cast %18 : vector<128xf32> to vector<1x128xf32>
    %20 = arith.addf %17, %19 : vector<1x128xf32>
    %cst_21 = arith.constant dense<0.000000e+00> : vector<128xf32>
    %21 = vector.multi_reduction <add>, %11, %cst_21 [0] : vector<128x128xf32> to vector<128xf32>
    %22 = vector.shape_cast %21 : vector<128xf32> to vector<1x128xf32>
    %23 = arith.addf %20, %22 : vector<1x128xf32>
    %cst_22 = arith.constant dense<0.000000e+00> : vector<128xf32>
    %24 = vector.multi_reduction <add>, %15, %cst_22 [0] : vector<128x128xf32> to vector<128xf32>
    %25 = vector.shape_cast %24 : vector<128xf32> to vector<1x128xf32>
    %26 = arith.addf %23, %25 : vector<1x128xf32>
    %cst_23 = arith.constant 0.001953125 : f32
    %27 = vector.broadcast %cst_23 : f32 to vector<1x128xf32>
    %28 = arith.mulf %26, %27 : vector<1x128xf32>
    %29 = vector.broadcast %28 : vector<1x128xf32> to vector<128x128xf32>
    %30 = arith.subf %3, %29 : vector<128x128xf32>
    %31 = vector.broadcast %28 : vector<1x128xf32> to vector<128x128xf32>
    %32 = arith.subf %7, %31 : vector<128x128xf32>
    %33 = vector.broadcast %28 : vector<1x128xf32> to vector<128x128xf32>
    %34 = arith.subf %11, %33 : vector<128x128xf32>
    %35 = vector.broadcast %28 : vector<1x128xf32> to vector<128x128xf32>
    %36 = arith.subf %15, %35 : vector<128x128xf32>
    %37 = arith.mulf %30, %30 : vector<128x128xf32>
    %cst_24 = arith.constant dense<0.000000e+00> : vector<128xf32>
    %38 = vector.multi_reduction <add>, %37, %cst_24 [0] : vector<128x128xf32> to vector<128xf32>
    %39 = vector.shape_cast %38 : vector<128xf32> to vector<1x128xf32>
    %40 = arith.mulf %32, %32 : vector<128x128xf32>
    %cst_25 = arith.constant dense<0.000000e+00> : vector<128xf32>
    %41 = vector.multi_reduction <add>, %40, %cst_25 [0] : vector<128x128xf32> to vector<128xf32>
    %42 = vector.shape_cast %41 : vector<128xf32> to vector<1x128xf32>
    %43 = arith.addf %39, %42 : vector<1x128xf32>
    %44 = arith.mulf %34, %34 : vector<128x128xf32>
    %cst_26 = arith.constant dense<0.000000e+00> : vector<128xf32>
    %45 = vector.multi_reduction <add>, %44, %cst_26 [0] : vector<128x128xf32> to vector<128xf32>
    %46 = vector.shape_cast %45 : vector<128xf32> to vector<1x128xf32>
    %47 = arith.addf %43, %46 : vector<1x128xf32>
    %48 = arith.mulf %36, %36 : vector<128x128xf32>
    %cst_27 = arith.constant dense<0.000000e+00> : vector<128xf32>
    %49 = vector.multi_reduction <add>, %48, %cst_27 [0] : vector<128x128xf32> to vector<128xf32>
    %50 = vector.shape_cast %49 : vector<128xf32> to vector<1x128xf32>
    %51 = arith.addf %47, %50 : vector<1x128xf32>
    %cst_28 = arith.constant 0.001953125 : f32
    %52 = vector.broadcast %cst_28 : f32 to vector<1x128xf32>
    %53 = arith.mulf %51, %52 : vector<1x128xf32>
    %cst_29 = arith.constant 9.99999974E-6 : f32
    %54 = vector.broadcast %cst_29 : f32 to vector<1x128xf32>
    %55 = arith.addf %53, %54 : vector<1x128xf32>
    %56 = math.rsqrt %55 : vector<1x128xf32>
    %c0_30 = arith.constant 0 : index
    %c0_31 = arith.constant 0 : index
    %57 = vector.load %arg6[%c0_30, %c0_31] : memref<4x128xf32, #tpu.memory_space<vmem>>, vector<1x128xf32>
    %58 = arith.mulf %56, %57 : vector<1x128xf32>
    %c0_32 = arith.constant 0 : index
    %c0_33 = arith.constant 0 : index
    %59 = vector.load %arg7[%c0_32, %c0_33] : memref<4x128xf32, #tpu.memory_space<vmem>>, vector<1x128xf32>
    %60 = vector.broadcast %58 : vector<1x128xf32> to vector<128x128xf32>
    %61 = arith.mulf %30, %60 : vector<128x128xf32>
    %62 = vector.broadcast %59 : vector<1x128xf32> to vector<128x128xf32>
    %63 = arith.addf %61, %62 : vector<128x128xf32>
    %cst_34 = arith.constant 0.000000e+00 : f32
    %64 = vector.broadcast %cst_34 : f32 to vector<128x128xf32>
    %65 = arith.maximumf %63, %64 : vector<128x128xf32>
    %66 = vector.broadcast %58 : vector<1x128xf32> to vector<128x128xf32>
    %67 = arith.mulf %32, %66 : vector<128x128xf32>
    %68 = vector.broadcast %59 : vector<1x128xf32> to vector<128x128xf32>
    %69 = arith.addf %67, %68 : vector<128x128xf32>
    %cst_35 = arith.constant 0.000000e+00 : f32
    %70 = vector.broadcast %cst_35 : f32 to vector<128x128xf32>
    %71 = arith.maximumf %69, %70 : vector<128x128xf32>
    %72 = vector.broadcast %58 : vector<1x128xf32> to vector<128x128xf32>
    %73 = arith.mulf %34, %72 : vector<128x128xf32>
    %74 = vector.broadcast %59 : vector<1x128xf32> to vector<128x128xf32>
    %75 = arith.addf %73, %74 : vector<128x128xf32>
    %cst_36 = arith.constant 0.000000e+00 : f32
    %76 = vector.broadcast %cst_36 : f32 to vector<128x128xf32>
    %77 = arith.maximumf %75, %76 : vector<128x128xf32>
    %78 = vector.broadcast %58 : vector<1x128xf32> to vector<128x128xf32>
    %79 = arith.mulf %36, %78 : vector<128x128xf32>
    %80 = vector.broadcast %59 : vector<1x128xf32> to vector<128x128xf32>
    %81 = arith.addf %79, %80 : vector<128x128xf32>
    %cst_37 = arith.constant 0.000000e+00 : f32
    %82 = vector.broadcast %cst_37 : f32 to vector<128x128xf32>
    %83 = arith.maximumf %81, %82 : vector<128x128xf32>
    %84 = arith.maximumf %65, %71 : vector<128x128xf32>
    %85 = arith.maximumf %77, %83 : vector<128x128xf32>
    %86 = arith.maximumf %84, %85 : vector<128x128xf32>
    %87 = tpu.iota {dimensions = array<i32: 0>} : vector<128x1xi32>
    %c64_i32 = arith.constant 64 : i32
    %c0_i32 = arith.constant 0 : i32
    %88 = arith.cmpi eq, %c64_i32, %c0_i32 : i32
    %c1_i32 = arith.constant 1 : i32
    %89 = arith.select %88, %c1_i32, %c64_i32 : i32
    %90 = vector.broadcast %89 : i32 to vector<128x1xi32>
    %91 = arith.remsi %87, %90 : vector<128x1xi32>
    %c0_i32_38 = arith.constant 0 : i32
    %92 = vector.broadcast %c0_i32_38 : i32 to vector<128x1xi32>
    %93 = arith.cmpi ne, %91, %92 : vector<128x1xi32>
    %c0_i32_39 = arith.constant 0 : i32
    %94 = vector.broadcast %c0_i32_39 : i32 to vector<128x1xi32>
    %95 = arith.cmpi slt, %91, %94 : vector<128x1xi32>
    %c0_i32_40 = arith.constant 0 : i32
    %96 = arith.cmpi slt, %89, %c0_i32_40 : i32
    %97 = vector.broadcast %96 : i1 to vector<128x1xi1>
    %98 = vector.broadcast %97 : vector<128x1xi1> to vector<128x1xi1>
    %99 = arith.xori %95, %98 : vector<128x1xi1>
    %100 = arith.andi %99, %93 : vector<128x1xi1>
    %101 = vector.broadcast %89 : i32 to vector<128x1xi32>
    %102 = arith.addi %91, %101 : vector<128x1xi32>
    %103 = arith.select %100, %102, %91 : vector<128x1xi1>, vector<128x1xi32>
    %c0_i32_41 = arith.constant 0 : i32
    %104 = vector.broadcast %c0_i32_41 : i32 to vector<128x1xi32>
    %105 = arith.cmpi ne, %103, %104 : vector<128x1xi32>
    %106 = arith.extui %105 : vector<128x1xi1> to vector<128x1xi32>
    %107 = arith.sitofp %106 : vector<128x1xi32> to vector<128x1xf32>
    %c63_i32 = arith.constant 63 : i32
    %108 = vector.broadcast %c63_i32 : i32 to vector<128x1xi32>
    %109 = arith.cmpi ne, %103, %108 : vector<128x1xi32>
    %110 = arith.extui %109 : vector<128x1xi1> to vector<128x1xi32>
    %111 = arith.sitofp %110 : vector<128x1xi32> to vector<128x1xf32>
    %c1_i32_42 = arith.constant 1 : i32
    %112 = tpu.dynamic_rotate %86 by %c1_i32_42 dim 0 : vector<128x128xf32>, i32 -> vector<128x128xf32>
    %113 = vector.broadcast %107 : vector<128x1xf32> to vector<128x128xf32>
    %114 = arith.mulf %113, %112 : vector<128x128xf32>
    %c127_i32 = arith.constant 127 : i32
    %115 = tpu.dynamic_rotate %86 by %c127_i32 dim 0 : vector<128x128xf32>, i32 -> vector<128x128xf32>
    %116 = vector.broadcast %111 : vector<128x1xf32> to vector<128x128xf32>
    %117 = arith.mulf %116, %115 : vector<128x128xf32>
    %c32_i32 = arith.constant 32 : i32
    %118 = tpu.dynamic_rotate %86 by %c32_i32 dim 1 : vector<128x128xf32>, i32 -> vector<128x128xf32>
    %119 = arith.addf %114, %118 : vector<128x128xf32>
    %c64_i32_43 = arith.constant 64 : i32
    %120 = tpu.dynamic_rotate %117 by %c64_i32_43 dim 1 : vector<128x128xf32>, i32 -> vector<128x128xf32>
    %121 = arith.addf %119, %120 : vector<128x128xf32>
    %122 = arith.truncf %121 : vector<128x128xf32> to vector<128x128xbf16>
    %c0_44 = arith.constant 0 : index
    %c0_45 = arith.constant 0 : index
    %c0_46 = arith.constant 0 : index
    %123 = vector.load %arg3[%c0_44, %c0_45, %c0_46] : memref<1x128x128xbf16, #tpu.memory_space<vmem>>, vector<1x128x128xbf16>
    %124 = vector.shape_cast %123 : vector<1x128x128xbf16> to vector<128x128xbf16>
    %cst_47 = arith.constant dense<0.000000e+00> : vector<128x128xf32>
    %125 = tpu.matmul %122, %124, %cst_47 {dimension_numbers = #tpu.dot_dimension_numbers<[1], [0], [0], [1], [0, 0, 1, 1], [], []>} : vector<128x128xbf16>, vector<128x128xbf16>, vector<128x128xf32> -> vector<128x128xf32>
    %cst_48 = arith.constant dense<0.000000e+00> : vector<128xf32>
    %126 = vector.multi_reduction <add>, %125, %cst_48 [0] : vector<128x128xf32> to vector<128xf32>
    %127 = vector.shape_cast %126 : vector<128xf32> to vector<1x128xf32>
    %cst_49 = arith.constant 7.812500e-03 : f32
    %128 = vector.broadcast %cst_49 : f32 to vector<1x128xf32>
    %129 = arith.mulf %127, %128 : vector<1x128xf32>
    %130 = vector.broadcast %129 : vector<1x128xf32> to vector<128x128xf32>
    %131 = arith.subf %125, %130 : vector<128x128xf32>
    %132 = arith.mulf %131, %131 : vector<128x128xf32>
    %cst_50 = arith.constant dense<0.000000e+00> : vector<128xf32>
    %133 = vector.multi_reduction <add>, %132, %cst_50 [0] : vector<128x128xf32> to vector<128xf32>
    %134 = vector.shape_cast %133 : vector<128xf32> to vector<1x128xf32>
    %cst_51 = arith.constant 7.812500e-03 : f32
    %135 = vector.broadcast %cst_51 : f32 to vector<1x128xf32>
    %136 = arith.mulf %134, %135 : vector<1x128xf32>
    %cst_52 = arith.constant 9.99999974E-6 : f32
    %137 = vector.broadcast %cst_52 : f32 to vector<1x128xf32>
    %138 = arith.addf %136, %137 : vector<1x128xf32>
    %139 = math.rsqrt %138 : vector<1x128xf32>
    %c1_53 = arith.constant 1 : index
    %c0_54 = arith.constant 0 : index
    %140 = vector.load %arg6[%c1_53, %c0_54] : memref<4x128xf32, #tpu.memory_space<vmem>>, vector<1x128xf32>
    %141 = arith.mulf %139, %140 : vector<1x128xf32>
    %142 = vector.broadcast %141 : vector<1x128xf32> to vector<128x128xf32>
    %143 = arith.mulf %131, %142 : vector<128x128xf32>
    %c1_55 = arith.constant 1 : index
    %c0_56 = arith.constant 0 : index
    %144 = vector.load %arg7[%c1_55, %c0_56] : memref<4x128xf32, #tpu.memory_space<vmem>>, vector<1x128xf32>
    %145 = vector.broadcast %144 : vector<1x128xf32> to vector<128x128xf32>
    %146 = arith.addf %143, %145 : vector<128x128xf32>
    %cst_57 = arith.constant 0.000000e+00 : f32
    %147 = vector.broadcast %cst_57 : f32 to vector<128x128xf32>
    %148 = arith.maximumf %146, %147 : vector<128x128xf32>
    %c0_58 = arith.constant 0 : index
    %c0_59 = arith.constant 0 : index
    %149 = vector.load %arg11[%c0_58, %c0_59] : memref<128x128xf32, #tpu.memory_space<vmem>>, vector<128x128xf32>
    tpu.vector_store %arg11[%c0_58, %c0_59], %148 {strides = array<i32>} : memref<128x128xf32, #tpu.memory_space<vmem>>, vector<128x128xf32>,
    %c0_60 = arith.constant 0 : index
    %c0_61 = arith.constant 0 : index
    %150 = tpu.strided_load %arg11[%c0_60, %c0_61] {strides = array<i32: 4, 1>} : memref<128x128xf32, #tpu.memory_space<vmem>>, vector<32x128xf32>
    %c1_62 = arith.constant 1 : index
    %c0_63 = arith.constant 0 : index
    %151 = tpu.strided_load %arg11[%c1_62, %c0_63] {strides = array<i32: 4, 1>} : memref<128x128xf32, #tpu.memory_space<vmem>>, vector<32x128xf32>
    %c2_64 = arith.constant 2 : index
    %c0_65 = arith.constant 0 : index
    %152 = tpu.strided_load %arg11[%c2_64, %c0_65] {strides = array<i32: 4, 1>} : memref<128x128xf32, #tpu.memory_space<vmem>>, vector<32x128xf32>
    %c3_66 = arith.constant 3 : index
    %c0_67 = arith.constant 0 : index
    %153 = tpu.strided_load %arg11[%c3_66, %c0_67] {strides = array<i32: 4, 1>} : memref<128x128xf32, #tpu.memory_space<vmem>>, vector<32x128xf32>
    %154 = arith.maximumf %150, %151 : vector<32x128xf32>
    %155 = arith.maximumf %152, %153 : vector<32x128xf32>
    %156 = arith.maximumf %154, %155 : vector<32x128xf32>
    %157 = tpu.iota {dimensions = array<i32: 0>} : vector<32x1xi32>
    %c16_i32 = arith.constant 16 : i32
    %c0_i32_68 = arith.constant 0 : i32
    %158 = arith.cmpi eq, %c16_i32, %c0_i32_68 : i32
    %c1_i32_69 = arith.constant 1 : i32
    %159 = arith.select %158, %c1_i32_69, %c16_i32 : i32
    %160 = vector.broadcast %159 : i32 to vector<32x1xi32>
    %161 = arith.remsi %157, %160 : vector<32x1xi32>
    %c0_i32_70 = arith.constant 0 : i32
    %162 = vector.broadcast %c0_i32_70 : i32 to vector<32x1xi32>
    %163 = arith.cmpi ne, %161, %162 : vector<32x1xi32>
    %c0_i32_71 = arith.constant 0 : i32
    %164 = vector.broadcast %c0_i32_71 : i32 to vector<32x1xi32>
    %165 = arith.cmpi slt, %161, %164 : vector<32x1xi32>
    %c0_i32_72 = arith.constant 0 : i32
    %166 = arith.cmpi slt, %159, %c0_i32_72 : i32
    %167 = vector.broadcast %166 : i1 to vector<32x1xi1>
    %168 = vector.broadcast %167 : vector<32x1xi1> to vector<32x1xi1>
    %169 = arith.xori %165, %168 : vector<32x1xi1>
    %170 = arith.andi %169, %163 : vector<32x1xi1>
    %171 = vector.broadcast %159 : i32 to vector<32x1xi32>
    %172 = arith.addi %161, %171 : vector<32x1xi32>
    %173 = arith.select %170, %172, %161 : vector<32x1xi1>, vector<32x1xi32>
    %c0_i32_73 = arith.constant 0 : i32
    %174 = vector.broadcast %c0_i32_73 : i32 to vector<32x1xi32>
    %175 = arith.cmpi ne, %173, %174 : vector<32x1xi32>
    %176 = arith.extui %175 : vector<32x1xi1> to vector<32x1xi32>
    %177 = arith.sitofp %176 : vector<32x1xi32> to vector<32x1xf32>
    %c15_i32 = arith.constant 15 : i32
    %178 = vector.broadcast %c15_i32 : i32 to vector<32x1xi32>
    %179 = arith.cmpi ne, %173, %178 : vector<32x1xi32>
    %180 = arith.extui %179 : vector<32x1xi1> to vector<32x1xi32>
    %181 = arith.sitofp %180 : vector<32x1xi32> to vector<32x1xf32>
    %c1_i32_74 = arith.constant 1 : i32
    %182 = tpu.dynamic_rotate %156 by %c1_i32_74 dim 0 : vector<32x128xf32>, i32 -> vector<32x128xf32>
    %183 = vector.broadcast %177 : vector<32x1xf32> to vector<32x128xf32>
    %184 = arith.mulf %183, %182 : vector<32x128xf32>
    %c31_i32 = arith.constant 31 : i32
    %185 = tpu.dynamic_rotate %156 by %c31_i32 dim 0 : vector<32x128xf32>, i32 -> vector<32x128xf32>
    %186 = vector.broadcast %181 : vector<32x1xf32> to vector<32x128xf32>
    %187 = arith.mulf %186, %185 : vector<32x128xf32>
    %c32_i32_75 = arith.constant 32 : i32
    %188 = tpu.dynamic_rotate %156 by %c32_i32_75 dim 1 : vector<32x128xf32>, i32 -> vector<32x128xf32>
    %189 = arith.addf %184, %188 : vector<32x128xf32>
    %c64_i32_76 = arith.constant 64 : i32
    %190 = tpu.dynamic_rotate %187 by %c64_i32_76 dim 1 : vector<32x128xf32>, i32 -> vector<32x128xf32>
    %191 = arith.addf %189, %190 : vector<32x128xf32>
    %192 = arith.truncf %191 : vector<32x128xf32> to vector<32x128xbf16>
    %c0_77 = arith.constant 0 : index
    %c0_78 = arith.constant 0 : index
    %c0_79 = arith.constant 0 : index
    %193 = vector.load %arg4[%c0_77, %c0_78, %c0_79] : memref<1x128x128xbf16, #tpu.memory_space<vmem>>, vector<1x128x128xbf16>
    %194 = vector.shape_cast %193 : vector<1x128x128xbf16> to vector<128x128xbf16>
    %cst_80 = arith.constant dense<0.000000e+00> : vector<32x128xf32>
    %195 = tpu.matmul %192, %194, %cst_80 {dimension_numbers = #tpu.dot_dimension_numbers<[1], [0], [0], [1], [0, 0, 1, 1], [], []>} : vector<32x128xbf16>, vector<128x128xbf16>, vector<32x128xf32> -> vector<32x128xf32>
    %cst_81 = arith.constant dense<0.000000e+00> : vector<128xf32>
    %196 = vector.multi_reduction <add>, %195, %cst_81 [0] : vector<32x128xf32> to vector<128xf32>
    %197 = vector.shape_cast %196 : vector<128xf32> to vector<1x128xf32>
    %cst_82 = arith.constant 3.125000e-02 : f32
    %198 = vector.broadcast %cst_82 : f32 to vector<1x128xf32>
    %199 = arith.mulf %197, %198 : vector<1x128xf32>
    %200 = vector.broadcast %199 : vector<1x128xf32> to vector<32x128xf32>
    %201 = arith.subf %195, %200 : vector<32x128xf32>
    %202 = arith.mulf %201, %201 : vector<32x128xf32>
    %cst_83 = arith.constant dense<0.000000e+00> : vector<128xf32>
    %203 = vector.multi_reduction <add>, %202, %cst_83 [0] : vector<32x128xf32> to vector<128xf32>
    %204 = vector.shape_cast %203 : vector<128xf32> to vector<1x128xf32>
    %cst_84 = arith.constant 3.125000e-02 : f32
    %205 = vector.broadcast %cst_84 : f32 to vector<1x128xf32>
    %206 = arith.mulf %204, %205 : vector<1x128xf32>
    %cst_85 = arith.constant 9.99999974E-6 : f32
    %207 = vector.broadcast %cst_85 : f32 to vector<1x128xf32>
    %208 = arith.addf %206, %207 : vector<1x128xf32>
    %209 = math.rsqrt %208 : vector<1x128xf32>
    %c2_86 = arith.constant 2 : index
    %c0_87 = arith.constant 0 : index
    %210 = vector.load %arg6[%c2_86, %c0_87] : memref<4x128xf32, #tpu.memory_space<vmem>>, vector<1x128xf32>
    %211 = arith.mulf %209, %210 : vector<1x128xf32>
    %212 = vector.broadcast %211 : vector<1x128xf32> to vector<32x128xf32>
    %213 = arith.mulf %201, %212 : vector<32x128xf32>
    %c2_88 = arith.constant 2 : index
    %c0_89 = arith.constant 0 : index
    %214 = vector.load %arg7[%c2_88, %c0_89] : memref<4x128xf32, #tpu.memory_space<vmem>>, vector<1x128xf32>
    %215 = vector.broadcast %214 : vector<1x128xf32> to vector<32x128xf32>
    %216 = arith.addf %213, %215 : vector<32x128xf32>
    %cst_90 = arith.constant 0.000000e+00 : f32
    %217 = vector.broadcast %cst_90 : f32 to vector<32x128xf32>
    %218 = arith.maximumf %216, %217 : vector<32x128xf32>
    %c0_91 = arith.constant 0 : index
    %c0_92 = arith.constant 0 : index
    %219 = vector.load %arg11[%c0_91, %c0_92] : memref<128x128xf32, #tpu.memory_space<vmem>>, vector<32x128xf32>
    tpu.vector_store %arg11[%c0_91, %c0_92], %218 {strides = array<i32>} : memref<128x128xf32, #tpu.memory_space<vmem>>, vector<32x128xf32>,
    %c0_93 = arith.constant 0 : index
    %c0_94 = arith.constant 0 : index
    %220 = tpu.strided_load %arg11[%c0_93, %c0_94] {strides = array<i32: 4, 1>} : memref<128x128xf32, #tpu.memory_space<vmem>>, vector<8x128xf32>
    %c1_95 = arith.constant 1 : index
    %c0_96 = arith.constant 0 : index
    %221 = tpu.strided_load %arg11[%c1_95, %c0_96] {strides = array<i32: 4, 1>} : memref<128x128xf32, #tpu.memory_space<vmem>>, vector<8x128xf32>
    %c2_97 = arith.constant 2 : index
    %c0_98 = arith.constant 0 : index
    %222 = tpu.strided_load %arg11[%c2_97, %c0_98] {strides = array<i32: 4, 1>} : memref<128x128xf32, #tpu.memory_space<vmem>>, vector<8x128xf32>
    %c3_99 = arith.constant 3 : index
    %c0_100 = arith.constant 0 : index
    %223 = tpu.strided_load %arg11[%c3_99, %c0_100] {strides = array<i32: 4, 1>} : memref<128x128xf32, #tpu.memory_space<vmem>>, vector<8x128xf32>
    %224 = arith.maximumf %220, %221 : vector<8x128xf32>
    %225 = arith.maximumf %222, %223 : vector<8x128xf32>
    %226 = arith.maximumf %224, %225 : vector<8x128xf32>
    %227 = tpu.iota {dimensions = array<i32: 0>} : vector<8x1xi32>
    %c4_i32 = arith.constant 4 : i32
    %c0_i32_101 = arith.constant 0 : i32
    %228 = arith.cmpi eq, %c4_i32, %c0_i32_101 : i32
    %c1_i32_102 = arith.constant 1 : i32
    %229 = arith.select %228, %c1_i32_102, %c4_i32 : i32
    %230 = vector.broadcast %229 : i32 to vector<8x1xi32>
    %231 = arith.remsi %227, %230 : vector<8x1xi32>
    %c0_i32_103 = arith.constant 0 : i32
    %232 = vector.broadcast %c0_i32_103 : i32 to vector<8x1xi32>
    %233 = arith.cmpi ne, %231, %232 : vector<8x1xi32>
    %c0_i32_104 = arith.constant 0 : i32
    %234 = vector.broadcast %c0_i32_104 : i32 to vector<8x1xi32>
    %235 = arith.cmpi slt, %231, %234 : vector<8x1xi32>
    %c0_i32_105 = arith.constant 0 : i32
    %236 = arith.cmpi slt, %229, %c0_i32_105 : i32
    %237 = vector.broadcast %236 : i1 to vector<8x1xi1>
    %238 = vector.broadcast %237 : vector<8x1xi1> to vector<8x1xi1>
    %239 = arith.xori %235, %238 : vector<8x1xi1>
    %240 = arith.andi %239, %233 : vector<8x1xi1>
    %241 = vector.broadcast %229 : i32 to vector<8x1xi32>
    %242 = arith.addi %231, %241 : vector<8x1xi32>
    %243 = arith.select %240, %242, %231 : vector<8x1xi1>, vector<8x1xi32>
    %c0_i32_106 = arith.constant 0 : i32
    %244 = vector.broadcast %c0_i32_106 : i32 to vector<8x1xi32>
    %245 = arith.cmpi ne, %243, %244 : vector<8x1xi32>
    %246 = arith.extui %245 : vector<8x1xi1> to vector<8x1xi32>
    %247 = arith.sitofp %246 : vector<8x1xi32> to vector<8x1xf32>
    %c3_i32 = arith.constant 3 : i32
    %248 = vector.broadcast %c3_i32 : i32 to vector<8x1xi32>
    %249 = arith.cmpi ne, %243, %248 : vector<8x1xi32>
    %250 = arith.extui %249 : vector<8x1xi1> to vector<8x1xi32>
    %251 = arith.sitofp %250 : vector<8x1xi32> to vector<8x1xf32>
    %c1_i32_107 = arith.constant 1 : i32
    %252 = tpu.dynamic_rotate %226 by %c1_i32_107 dim 0 : vector<8x128xf32>, i32 -> vector<8x128xf32>
    %253 = vector.broadcast %247 : vector<8x1xf32> to vector<8x128xf32>
    %254 = arith.mulf %253, %252 : vector<8x128xf32>
    %c7_i32 = arith.constant 7 : i32
    %255 = tpu.dynamic_rotate %226 by %c7_i32 dim 0 : vector<8x128xf32>, i32 -> vector<8x128xf32>
    %256 = vector.broadcast %251 : vector<8x1xf32> to vector<8x128xf32>
    %257 = arith.mulf %256, %255 : vector<8x128xf32>
    %c64_i32_108 = arith.constant 64 : i32
    %258 = tpu.dynamic_rotate %226 by %c64_i32_108 dim 1 : vector<8x128xf32>, i32 -> vector<8x128xf32>
    %259 = arith.addf %254, %258 : vector<8x128xf32>
    %260 = arith.truncf %259 : vector<8x128xf32> to vector<8x128xbf16>
    %c0_109 = arith.constant 0 : index
    %c0_110 = arith.constant 0 : index
    %c0_111 = arith.constant 0 : index
    %261 = vector.load %arg5[%c0_109, %c0_110, %c0_111] : memref<2x128x128xbf16, #tpu.memory_space<vmem>>, vector<1x128x128xbf16>
    %262 = vector.shape_cast %261 : vector<1x128x128xbf16> to vector<128x128xbf16>
    %cst_112 = arith.constant dense<0.000000e+00> : vector<8x128xf32>
    %263 = tpu.matmul %260, %262, %cst_112 {dimension_numbers = #tpu.dot_dimension_numbers<[1], [0], [0], [1], [0, 0, 1, 1], [], []>} : vector<8x128xbf16>, vector<128x128xbf16>, vector<8x128xf32> -> vector<8x128xf32>
    %264 = arith.truncf %257 : vector<8x128xf32> to vector<8x128xbf16>
    %c1_113 = arith.constant 1 : index
    %c0_114 = arith.constant 0 : index
    %c0_115 = arith.constant 0 : index
    %265 = vector.load %arg5[%c1_113, %c0_114, %c0_115] : memref<2x128x128xbf16, #tpu.memory_space<vmem>>, vector<1x128x128xbf16>
    %266 = vector.shape_cast %265 : vector<1x128x128xbf16> to vector<128x128xbf16>
    %cst_116 = arith.constant dense<0.000000e+00> : vector<8x128xf32>
    %267 = tpu.matmul %264, %266, %cst_116 {dimension_numbers = #tpu.dot_dimension_numbers<[1], [0], [0], [1], [0, 0, 1, 1], [], []>} : vector<8x128xbf16>, vector<128x128xbf16>, vector<8x128xf32> -> vector<8x128xf32>
    %268 = arith.addf %263, %267 : vector<8x128xf32>
    %cst_117 = arith.constant dense<0.000000e+00> : vector<128xf32>
    %269 = vector.multi_reduction <add>, %268, %cst_117 [0] : vector<8x128xf32> to vector<128xf32>
    %270 = vector.shape_cast %269 : vector<128xf32> to vector<1x128xf32>
    %cst_118 = arith.constant 1.250000e-01 : f32
    %271 = vector.broadcast %cst_118 : f32 to vector<1x128xf32>
    %272 = arith.mulf %270, %271 : vector<1x128xf32>
    %273 = vector.broadcast %272 : vector<1x128xf32> to vector<8x128xf32>
    %274 = arith.subf %268, %273 : vector<8x128xf32>
    %275 = arith.mulf %274, %274 : vector<8x128xf32>
    %cst_119 = arith.constant dense<0.000000e+00> : vector<128xf32>
    %276 = vector.multi_reduction <add>, %275, %cst_119 [0] : vector<8x128xf32> to vector<128xf32>
    %277 = vector.shape_cast %276 : vector<128xf32> to vector<1x128xf32>
    %cst_120 = arith.constant 1.250000e-01 : f32
    %278 = vector.broadcast %cst_120 : f32 to vector<1x128xf32>
    %279 = arith.mulf %277, %278 : vector<1x128xf32>
    %cst_121 = arith.constant 9.99999974E-6 : f32
    %280 = vector.broadcast %cst_121 : f32 to vector<1x128xf32>
    %281 = arith.addf %279, %280 : vector<1x128xf32>
    %282 = math.rsqrt %281 : vector<1x128xf32>
    %c3_122 = arith.constant 3 : index
    %c0_123 = arith.constant 0 : index
    %283 = vector.load %arg6[%c3_122, %c0_123] : memref<4x128xf32, #tpu.memory_space<vmem>>, vector<1x128xf32>
    %284 = arith.mulf %282, %283 : vector<1x128xf32>
    %285 = vector.broadcast %284 : vector<1x128xf32> to vector<8x128xf32>
    %286 = arith.mulf %274, %285 : vector<8x128xf32>
    %c3_124 = arith.constant 3 : index
    %c0_125 = arith.constant 0 : index
    %287 = vector.load %arg7[%c3_124, %c0_125] : memref<4x128xf32, #tpu.memory_space<vmem>>, vector<1x128xf32>
    %288 = vector.broadcast %287 : vector<1x128xf32> to vector<8x128xf32>
    %289 = arith.addf %286, %288 : vector<8x128xf32>
    %cst_126 = arith.constant 0.000000e+00 : f32
    %290 = vector.broadcast %cst_126 : f32 to vector<8x128xf32>
    %291 = arith.maximumf %289, %290 : vector<8x128xf32>
    %c0_127 = arith.constant 0 : index
    %c0_128 = arith.constant 0 : index
    %292 = vector.load %arg11[%c0_127, %c0_128] : memref<128x128xf32, #tpu.memory_space<vmem>>, vector<8x128xf32>
    tpu.vector_store %arg11[%c0_127, %c0_128], %291 {strides = array<i32>} : memref<128x128xf32, #tpu.memory_space<vmem>>, vector<8x128xf32>,
    %c0_129 = arith.constant 0 : index
    %c0_130 = arith.constant 0 : index
    %293 = tpu.strided_load %arg11[%c0_129, %c0_130] {strides = array<i32: 4, 1>} : memref<128x128xf32, #tpu.memory_space<vmem>>, vector<2x128xf32>
    %c1_131 = arith.constant 1 : index
    %c0_132 = arith.constant 0 : index
    %294 = tpu.strided_load %arg11[%c1_131, %c0_132] {strides = array<i32: 4, 1>} : memref<128x128xf32, #tpu.memory_space<vmem>>, vector<2x128xf32>
    %c2_133 = arith.constant 2 : index
    %c0_134 = arith.constant 0 : index
    %295 = tpu.strided_load %arg11[%c2_133, %c0_134] {strides = array<i32: 4, 1>} : memref<128x128xf32, #tpu.memory_space<vmem>>, vector<2x128xf32>
    %c3_135 = arith.constant 3 : index
    %c0_136 = arith.constant 0 : index
    %296 = tpu.strided_load %arg11[%c3_135, %c0_136] {strides = array<i32: 4, 1>} : memref<128x128xf32, #tpu.memory_space<vmem>>, vector<2x128xf32>
    %297 = arith.maximumf %293, %294 : vector<2x128xf32>
    %298 = arith.maximumf %295, %296 : vector<2x128xf32>
    %299 = arith.maximumf %297, %298 : vector<2x128xf32>
    %300 = arith.truncf %299 : vector<2x128xf32> to vector<2x128xbf16>
    %c0_137 = arith.constant 0 : index
    %c0_138 = arith.constant 0 : index
    %301 = vector.load %arg8[%c0_137, %c0_138] : memref<128x35xbf16, #tpu.memory_space<vmem>>, vector<128x35xbf16>
    %cst_139 = arith.constant dense<0.000000e+00> : vector<2x35xf32>
    %302 = tpu.matmul %300, %301, %cst_139 {dimension_numbers = #tpu.dot_dimension_numbers<[1], [0], [0], [1], [0, 0, 1, 1], [], []>} : vector<2x128xbf16>, vector<128x35xbf16>, vector<2x35xf32> -> vector<2x35xf32>
    %c0_140 = arith.constant 0 : index
    %c0_141 = arith.constant 0 : index
    %303 = vector.load %arg9[%c0_140, %c0_141] : memref<1x35xf32, #tpu.memory_space<vmem>>, vector<1x35xf32>
    %304 = vector.broadcast %303 : vector<1x35xf32> to vector<2x35xf32>
    %305 = arith.addf %302, %304 : vector<2x35xf32>
    %cst_142 = arith.constant dense<0xFF800000> : vector<2xf32>
    %306 = vector.multi_reduction <maximumf>, %305, %cst_142 [1] : vector<2x35xf32> to vector<2xf32>
    %307 = vector.shape_cast %306 : vector<2xf32> to vector<2x1xf32>
    %308 = vector.broadcast %307 : vector<2x1xf32> to vector<2x35xf32>
    %309 = arith.subf %305, %308 : vector<2x35xf32>
    %310 = math.exp %309 : vector<2x35xf32>
    %cst_143 = arith.constant dense<0.000000e+00> : vector<2xf32>
    %311 = vector.multi_reduction <add>, %310, %cst_143 [1] : vector<2x35xf32> to vector<2xf32>
    %312 = vector.shape_cast %311 : vector<2xf32> to vector<2x1xf32>
    %313 = math.log %312 : vector<2x1xf32>
    %314 = vector.broadcast %313 : vector<2x1xf32> to vector<2x35xf32>
    %315 = arith.subf %309, %314 : vector<2x35xf32>
    %c0_144 = arith.constant 0 : index
    %c0_145 = arith.constant 0 : index
    %316 = vector.load %arg10[%c0_144, %c0_145] : memref<2x35xf32, #tpu.memory_space<vmem>>, vector<2x35xf32>
    tpu.vector_store %arg10[%c0_144, %c0_145], %315 {strides = array<i32>} : memref<2x35xf32, #tpu.memory_space<vmem>>, vector<2x35xf32>,
    return
  }
  func.func @transform_0(%arg0: i32) -> (i32, i32, i32) {
    %c0_i32 = arith.constant 0 : i32
    %c0_i32_0 = arith.constant 0 : i32
    %c0_i32_1 = arith.constant 0 : i32
    %c0_i32_2 = arith.constant 0 : i32
    return %c0_i32, %c0_i32_0, %c0_i32_1 : i32, i32, i32
  }
  func.func @transform_1(%arg0: i32) -> (i32, i32) {
    %c0_i32 = arith.constant 0 : i32
    %c0_i32_0 = arith.constant 0 : i32
    %c0_i32_1 = arith.constant 0 : i32
    return %c0_i32, %c0_i32_0 : i32, i32
  }
  func.func @transform_2(%arg0: i32) -> (i32, i32, i32) {
    %c0_i32 = arith.constant 0 : i32
    %c0_i32_0 = arith.constant 0 : i32
    %c0_i32_1 = arith.constant 0 : i32
    %c0_i32_2 = arith.constant 0 : i32
    return %c0_i32, %c0_i32_0, %c0_i32_1 : i32, i32, i32
  }
  func.func @transform_3(%arg0: i32) -> (i32, i32, i32) {
    %c0_i32 = arith.constant 0 : i32
    %c0_i32_0 = arith.constant 0 : i32
    %c0_i32_1 = arith.constant 0 : i32
    %c0_i32_2 = arith.constant 0 : i32
    return %c0_i32, %c0_i32_0, %c0_i32_1 : i32, i32, i32
  }
  func.func @transform_4(%arg0: i32) -> (i32, i32, i32) {
    %c0_i32 = arith.constant 0 : i32
    %c0_i32_0 = arith.constant 0 : i32
    %c0_i32_1 = arith.constant 0 : i32
    %c0_i32_2 = arith.constant 0 : i32
    return %c0_i32, %c0_i32_0, %c0_i32_1 : i32, i32, i32
  }
  func.func @transform_5(%arg0: i32) -> (i32, i32) {
    %c0_i32 = arith.constant 0 : i32
    %c0_i32_0 = arith.constant 0 : i32
    %c0_i32_1 = arith.constant 0 : i32
    return %c0_i32, %c0_i32_0 : i32, i32
  }
  func.func @transform_6(%arg0: i32) -> (i32, i32) {
    %c0_i32 = arith.constant 0 : i32
    %c0_i32_0 = arith.constant 0 : i32
    %c0_i32_1 = arith.constant 0 : i32
    return %c0_i32, %c0_i32_0 : i32, i32
  }
  func.func @transform_7(%arg0: i32) -> (i32, i32) {
    %c0_i32 = arith.constant 0 : i32
    %c0_i32_0 = arith.constant 0 : i32
    %c0_i32_1 = arith.constant 0 : i32
    return %c0_i32, %c0_i32_0 : i32, i32
  }
  func.func @transform_8(%arg0: i32) -> (i32, i32) {
    %c0_i32 = arith.constant 0 : i32
    %c0_i32_0 = arith.constant 0 : i32
    %c0_i32_1 = arith.constant 0 : i32
    return %c0_i32, %c0_i32_0 : i32, i32
  }
  func.func @transform_9(%arg0: i32) -> (i32, i32) {
    %c0_i32 = arith.constant 0 : i32
    %c0_i32_0 = arith.constant 0 : i32
    %c0_i32_1 = arith.constant 0 : i32
    return %c0_i32, %c0_i32_0 : i32, i32
  }
}

</mosaic_0001>

<bundles_post_ra>
// kernel: m5_forward.1
= control target key start
LH: loop header
LB: loop body
LE: loop exit
PB: predicated region body
PF: predicated region fallthrough
CT: control target
= control target key end

     0   :  { %s4826_s0 = inlined_call_operand.vmem [shape: bf16[4,128,128], index: 0, kind: input, shape index: {}]   ;;  %s4827_s1 = inlined_call_operand.vmem [shape: bf16[128,128], index: 1, kind: input, shape index: {}]   ;;  %s4828_s2 = inlined_call_operand.vmem [shape: bf16[1,128,128], index: 2, kind: input, shape index: {}]   ;;  %s4829_s3 = inlined_call_operand.vmem [shape: bf16[1,128,128], index: 3, kind: input, shape index: {}]   ;;  %s4830_s4 = inlined_call_operand.vmem [shape: bf16[2,128,128], index: 4, kind: input, shape index: {}]   ;;  %s4831_s5 = inlined_call_operand.vmem [shape: f32[4,128], index: 5, kind: input, shape index: {}]   ;;  %s4832_s6 = inlined_call_operand.vmem [shape: f32[4,128], index: 6, kind: input, shape index: {}]   ;;  %s4833_s7 = inlined_call_operand.vmem [shape: bf16[128,35], index: 7, kind: input, shape index: {}]   ;;  %s4834_s8 = inlined_call_operand.vmem [shape: f32[1,35], index: 8, kind: input, shape index: {}]   ;;  %s4835_s9 = inlined_call_operand.hbm [shape: f32[2,35], index: 9, kind: output, shape index: {}]  }
   0x1   :  { %v2949_v0 = vld [vmem:[%s4827_s1 + $0x38] sm:$0xff]  ;;  %v2948_v1 = vld [vmem:[%s4827_s1 + $0x30] sm:$0xff] }
   0x2   :  { %161 = vmatpush.bf16.msra.mxu0 %v2949_v0  ;;  %3014 = vmatpush.bf16.msra.mxu2 %v2949_v0 }
   0x3   :  { %3015 = vmatpush.bf16.msra.mxu3 %v2949_v0  ;;  %275 = vmatpush.bf16.msra.mxu1 %v2949_v0 }
   0x4   :  { %14 = vsyncpa [#allocation4], 0  ;;  %v2947_v2 = vld [vmem:[%s4827_s1 + $0x28] sm:$0xff]  ;;  %v2946_v3 = vld [vmem:[%s4827_s1 + $0x20] sm:$0xff]  ;;  %s3077_s26 = smov 32   ;;  %s3078_s27 = smov 64  }
   0x5   :  { %v2945_v4 = vld [vmem:[%s4827_s1 + $0x18] sm:$0xff]  ;;  %v2944_v5 = vld [vmem:[%s4827_s1 + $0x10] sm:$0xff]  ;;  %v2943_v6 = vld [vmem:[%s4827_s1 + $0x8] sm:$0xff]  ;;  %s2531_s24 = sshll.u32 %s4835_s9, 4  ;;  %s2532_s24 = int_to_ptr.hbm [resolvable:$true] %s2531_s24 }
   0x6   :  { %162 = vmatpush.bf16.msra.mxu0 %v2948_v1  ;;  %3016 = vmatpush.bf16.msra.mxu2 %v2948_v1  ;;  %v2942_v7 = vld [vmem:[%s4827_s1] sm:$0xff]  ;;  %v2940_v10 = vld [vmem:[%s4826_s0 + $0x30] sm:$0xff]  ;;  %v2935_v12 = vld [vmem:[%s4826_s0 + $0x8] sm:$0xff] }
   0x7   :  { %3017 = vmatpush.bf16.msra.mxu3 %v2948_v1  ;;  %276 = vmatpush.bf16.msra.mxu1 %v2948_v1  ;;  %v2934_v8 = vld [vmem:[%s4826_s0] sm:$0xff]  ;;  %v2939_v13 = vld [vmem:[%s4826_s0 + $0x28] sm:$0xff]  ;;  %v2941_v14 = vld [vmem:[%s4826_s0 + $0x38] sm:$0xff] }
   0x8   :  { %v2938_v9 = vld [vmem:[%s4826_s0 + $0x20] sm:$0xff]  ;;  %v2951_v15 = vld [vmem:[%s4826_s0 + $0x48] sm:$0xff]  ;;  %v2936_v16 = vld [vmem:[%s4826_s0 + $0x10] sm:$0xff] }
   0x9   :  { %v2950_v11 = vld [vmem:[%s4826_s0 + $0x40] sm:$0xff]  ;;  %v2952_v18 = vld [vmem:[%s4826_s0 + $0x50] sm:$0xff]  ;;  %v2937_v20 = vld [vmem:[%s4826_s0 + $0x18] sm:$0xff] }
   0xa   :  { %163 = vmatpush.bf16.msra.mxu0 %v2947_v2  ;;  %3018 = vmatpush.bf16.msra.mxu2 %v2947_v2  ;;  %v2958_v17 = vld [vmem:[%s4826_s0 + $0x80] sm:$0xff]  ;;  %v2959_v21 = vld [vmem:[%s4826_s0 + $0x88] sm:$0xff]  ;;  %v2953_v22 = vld [vmem:[%s4826_s0 + $0x58] sm:$0xff] }
   0xb   :  { %3019 = vmatpush.bf16.msra.mxu3 %v2947_v2  ;;  %277 = vmatpush.bf16.msra.mxu1 %v2947_v2  ;;  %v2966_v19 = vld [vmem:[%s4826_s0 + $0xc0] sm:$0xff]  ;;  %v2967_v23 = vld [vmem:[%s4826_s0 + $0xc8] sm:$0xff]  ;;  %v2960_v24 = vld [vmem:[%s4826_s0 + $0x90] sm:$0xff] }
   0xc   :  { %v2954_v25 = vld [vmem:[%s4826_s0 + $0x60] sm:$0xff]  ;;  %v2968_v26 = vld [vmem:[%s4826_s0 + $0xd0] sm:$0xff]  ;;  %v2961_v27 = vld [vmem:[%s4826_s0 + $0x98] sm:$0xff] }
   0xd   :  { %v2955_v28 = vld [vmem:[%s4826_s0 + $0x68] sm:$0xff]  ;;  %v2969_v29 = vld [vmem:[%s4826_s0 + $0xd8] sm:$0xff]  ;;  %v2962_v30 = vld [vmem:[%s4826_s0 + $0xa0] sm:$0xff] }
   0xe   :  { %164 = vmatpush.bf16.msra.mxu0 %v2946_v3  ;;  %3020 = vmatpush.bf16.msra.mxu2 %v2946_v3  ;;  %v2956_v31 = vld [vmem:[%s4826_s0 + $0x70] sm:$0xff]  ;;  %v2970_v32 = vld [vmem:[%s4826_s0 + $0xe0] sm:$0xff]  ;;  %v2963_v33 = vld [vmem:[%s4826_s0 + $0xa8] sm:$0xff] }
   0xf   :  { %3021 = vmatpush.bf16.msra.mxu3 %v2946_v3  ;;  %278 = vmatpush.bf16.msra.mxu1 %v2946_v3  ;;  %v2957_v34 = vld [vmem:[%s4826_s0 + $0x78] sm:$0xff]  ;;  %v2971_v35 = vld [vmem:[%s4826_s0 + $0xe8] sm:$0xff]  ;;  %v2964_v36 = vld [vmem:[%s4826_s0 + $0xb0] sm:$0xff] }
  0x10   :  { %v2972_v37 = vld [vmem:[%s4826_s0 + $0xf0] sm:$0xff]  ;;  %v2965_v44 = vld [vmem:[%s4826_s0 + $0xb8] sm:$0xff] }
  0x11   :  { %v2973_v45 = vld [vmem:[%s4826_s0 + $0xf8] sm:$0xff] }
  0x12   :  { %165 = vmatpush.bf16.msra.mxu0 %v2945_v4  ;;  %3022 = vmatpush.bf16.msra.mxu2 %v2945_v4 }
  0x13   :  { %3023 = vmatpush.bf16.msra.mxu3 %v2945_v4  ;;  %279 = vmatpush.bf16.msra.mxu1 %v2945_v4 }
  0x16   :  { %166 = vmatpush.bf16.msra.mxu0 %v2944_v5  ;;  %3024 = vmatpush.bf16.msra.mxu2 %v2944_v5 }
  0x17   :  { %3025 = vmatpush.bf16.msra.mxu3 %v2944_v5  ;;  %280 = vmatpush.bf16.msra.mxu1 %v2944_v5 }
  0x1a   :  { %167 = vmatpush.bf16.msra.mxu0 %v2943_v6  ;;  %3026 = vmatpush.bf16.msra.mxu2 %v2943_v6 }
  0x1b   :  { %3027 = vmatpush.bf16.msra.mxu3 %v2943_v6  ;;  %281 = vmatpush.bf16.msra.mxu1 %v2943_v6 }
  0x1e   :  { %168 = vmatpush.bf16.msra.mxu0 %v2942_v7  ;;  %3028 = vmatpush.bf16.msra.mxu2 %v2942_v7 }
  0x1f   :  { %3029 = vmatpush.bf16.msra.mxu3 %v2942_v7  ;;  %282 = vmatpush.bf16.msra.mxu1 %v2942_v7 }
  0x21   :  { %169 = vmatmul.bf16.vlgmr.msra.gmra.mxu0 %v2934_v8  ;;  %189 = vmatmul.bf16.vlgmr.msra.gmra.mxu2 %v2938_v9 }
  0x22   :  { %389 = vmatpush.bf16.msrb.mxu2 %v2949_v0  ;;  %199 = vmatmul.bf16.vlgmr.msra.gmra.mxu3 %v2940_v10 }
  0x23   :  { %503 = vmatpush.bf16.msrb.mxu3 %v2949_v0  ;;  %283 = vmatmul.bf16.vlgmr.msra.gmra.mxu1 %v2950_v11 }
  0x26   :  { %390 = vmatpush.bf16.msrb.mxu2 %v2948_v1 }
  0x27   :  { %504 = vmatpush.bf16.msrb.mxu3 %v2948_v1 }
  0x2a   :  { %391 = vmatpush.bf16.msrb.mxu2 %v2947_v2 }
  0x2b   :  { %505 = vmatpush.bf16.msrb.mxu3 %v2947_v2 }
  0x2e   :  { %392 = vmatpush.bf16.msrb.mxu2 %v2946_v3 }
  0x2f   :  { %506 = vmatpush.bf16.msrb.mxu3 %v2946_v3 }
  0x31   :  { %174 = vmatmul.bf16.gmra.mxu0 %v2935_v12  ;;  %194 = vmatmul.bf16.gmra.mxu2 %v2939_v13 }
  0x32   :  { %393 = vmatpush.bf16.msrb.mxu2 %v2945_v4  ;;  %204 = vmatmul.bf16.gmra.mxu3 %v2941_v14 }
  0x33   :  { %507 = vmatpush.bf16.msrb.mxu3 %v2945_v4  ;;  %288 = vmatmul.bf16.gmra.mxu1 %v2951_v15 }
  0x36   :  { %394 = vmatpush.bf16.msrb.mxu2 %v2944_v5 }
  0x37   :  { %508 = vmatpush.bf16.msrb.mxu3 %v2944_v5 }
  0x3a   :  { %395 = vmatpush.bf16.msrb.mxu2 %v2943_v6 }
  0x3b   :  { %509 = vmatpush.bf16.msrb.mxu3 %v2943_v6 }
  0x3e   :  { %396 = vmatpush.bf16.msrb.mxu2 %v2942_v7 }
  0x3f   :  { %510 = vmatpush.bf16.msrb.mxu3 %v2942_v7 }
  0x41   :  { %179 = vmatmul.bf16.gmra.mxu0 %v2936_v16  ;;  %397 = vmatmul.bf16.vlgmr.msrb.gmra.mxu2 %v2958_v17 }
  0x42   :  { %511 = vmatmul.bf16.vlgmr.msrb.gmra.mxu3 %v2966_v19 }
  0x43   :  { %293 = vmatmul.bf16.gmra.mxu1 %v2952_v18 }
  0x51   :  { %184 = vmatmul.bf16.gmra.mxu0 %v2937_v20  ;;  %402 = vmatmul.bf16.gmra.mxu2 %v2959_v21 }
  0x52   :  { %516 = vmatmul.bf16.gmra.mxu3 %v2967_v23 }
  0x53   :  { %298 = vmatmul.bf16.gmra.mxu1 %v2953_v22 }
  0x61   :  { %407 = vmatmul.bf16.gmra.mxu2 %v2960_v24 }
  0x62   :  { %521 = vmatmul.bf16.gmra.mxu3 %v2968_v26 }
  0x63   :  { %303 = vmatmul.bf16.gmra.mxu1 %v2954_v25 }
  0x71   :  { %412 = vmatmul.bf16.gmra.mxu2 %v2961_v27 }
  0x72   :  { %526 = vmatmul.bf16.gmra.mxu3 %v2969_v29 }
  0x73   :  { %308 = vmatmul.bf16.gmra.mxu1 %v2955_v28 }
  0x81   :  { %417 = vmatmul.bf16.gmra.mxu2 %v2962_v30 }
  0x82   :  { %531 = vmatmul.bf16.gmra.mxu3 %v2970_v32 }
  0x83   :  { %313 = vmatmul.bf16.gmra.mxu1 %v2956_v31 }
  0x91   :  { %422 = vmatmul.bf16.gmra.mxu2 %v2963_v33 }
  0x92   :  { %536 = vmatmul.bf16.gmra.mxu3 %v2971_v35 }
  0x93   :  { %318 = vmatmul.bf16.gmra.mxu1 %v2957_v34 }
  0x9e   :  { %v3281_v55 = vpop.f32.mrf.mxu0 }
  0xa0   :  { %v3245_v38 = vpop.f32.mrf.mxu1 }
  0xa1   :  { %427 = vmatmul.bf16.gmra.mxu2 %v2964_v36 }
  0xa2   :  { %541 = vmatmul.bf16.gmra.mxu3 %v2972_v37 }
  0xa4   :  { %v3247_v39 = vpop.f32.mrf.mxu2 }
  0xa5   :  { %v3249_v40 = vpop.f32.mrf.mxu3 }
  0xa6   :  { %v3289_v59 = vpop.f32.mrf.mxu0 }
  0xa7   :  { %v552_v13 = vadd.f32 %v3289_v59, %v3281_v55 }
  0xa8   :  { %v3251_v41 = vpop.f32.mrf.mxu1 }
  0xa9   :  { %v573_v28 = vadd.f32 %v3251_v41, %v3245_v38 }
  0xac   :  { %v3253_v42 = vpop.f32.mrf.mxu2 }
  0xad   :  { %v3255_v43 = vpop.f32.mrf.mxu3 }
  0xae   :  { %v3301_v1 = vpop.f32.mrf.mxu0 }
  0xaf   :  { %v553_v18 = vadd.f32 %v552_v13, %v3301_v1 }
  0xb0   :  { %v3263_v46 = vpop.f32.mrf.mxu1 }
  0xb1   :  { %432 = vmatmul.bf16.gmra.mxu2 %v2965_v44  ;;  %v574_v32 = vadd.f32 %v573_v28, %v3263_v46 }
  0xb2   :  { %546 = vmatmul.bf16.gmra.mxu3 %v2973_v45 }
  0xb4   :  { %v3265_v47 = vpop.f32.mrf.mxu2 }
  0xb5   :  { %v3267_v48 = vpop.f32.mrf.mxu3 }
  0xb6   :  { %v3309_v5 = vpop.f32.mrf.mxu0 }
  0xb7   :  { %v554_v19 = vadd.f32 %v553_v18, %v3309_v5 }
  0xb8   :  { %v3269_v49 = vpop.f32.mrf.mxu1 }
  0xb9   :  { %v575_v36 = vadd.f32 %v574_v32, %v3269_v49 }
  0xbc   :  { %v3271_v50 = vpop.f32.mrf.mxu2 }
  0xbd   :  { %v3273_v51 = vpop.f32.mrf.mxu3 }
  0xbe   :  { %v3317_v9 = vpop.f32.mrf.mxu0 }
  0xbf   :  { %v555_v24 = vadd.f32 %v554_v19, %v3317_v9 }
  0xc0   :  { %v3275_v52 = vpop.f32.mrf.mxu1 }
  0xc1   :  { %4897 = vst [vmem:[#allocation6_spill] sm:$0xff] %v3275_v52  ;;  %v576_v44 = vadd.f32 %v575_v36, %v3275_v52 }
  0xc4   :  { %v3277_v53 = vpop.f32.mrf.mxu2 }
  0xc5   :  { %v3279_v54 = vpop.f32.mrf.mxu3 }
  0xc6   :  { %4898 = vst [vmem:[#allocation7_spill] sm:$0xff] %v3279_v54  ;;  %v3327_v14 = vpop.f32.mrf.mxu0 }
  0xc7   :  { %v556_v25 = vadd.f32 %v555_v24, %v3327_v14 }
  0xc8   :  { %v3283_v56 = vpop.f32.mrf.mxu1 }
  0xc9   :  { %4899 = vst [vmem:[#allocation8_spill] sm:$0xff] %v3283_v56  ;;  %v577_v24 = vadd.f32 %v576_v44, %v3283_v56 }
  0xcc   :  { %v3285_v57 = vpop.f32.mrf.mxu2 }
  0xcd   :  { %4900 = vst [vmem:[#allocation9_spill] sm:$0xff] %v3285_v57  ;;  %v3287_v58 = vpop.f32.mrf.mxu3 }
  0xce   :  { %4901 = vst [vmem:[#allocation10_spill] sm:$0xff] %v3287_v58  ;;  %v3341_v22 = vpop.f32.mrf.mxu0  ;;  %v617_v32 = vadd.f32 %v3287_v58, %v3279_v54 }
  0xcf   :  { %v557_v29 = vadd.f32 %v556_v25, %v3341_v22 }
  0xd0   :  { %v3293_v61 = vpop.f32.mrf.mxu1 }
  0xd1   :  { %v578_v25 = vadd.f32 %v577_v24, %v3293_v61 }
  0xd4   :  { %v3291_v60 = vpop.f32.mrf.mxu2 }
  0xd5   :  { %v3295_v62 = vpop.f32.mrf.mxu3 }
  0xd6   :  { %4902 = vst [vmem:[#allocation11_spill] sm:$0xff] %v3295_v62  ;;  %v3354_v30 = vpop.f32.mrf.mxu0 }
  0xd7   :  { %v558_v33 = vadd.f32 %v557_v29, %v3354_v30  ;;  %v595_v29 = vadd.f32 %v3285_v57, %v3277_v53 }
  0xd8   :  { %v3303_v2 = vpop.f32.mrf.mxu1 }
  0xd9   :  { %v559_v37 = vadd.f32 %v558_v33, %v3247_v39  ;;  %v579_v33 = vadd.f32 %v578_v25, %v3303_v2  ;;  %v596_v36 = vadd.f32 %v595_v29, %v3291_v60 }
  0xdb   :  { %v560_v13 = vadd.f32 %v559_v37, %v3253_v42  ;;  %v618_v37 = vadd.f32 %v617_v32, %v3295_v62 }
  0xdc   :  { %v3297_v63 = vpop.f32.mrf.mxu2 }
  0xdd   :  { %4903 = vst [vmem:[#allocation12_spill] sm:$0xff] %v3297_v63  ;;  %v3299_v0 = vpop.f32.mrf.mxu3  ;;  %v561_v28 = vadd.f32 %v560_v13, %v3265_v47  ;;  %v597_v13 = vadd.f32 %v596_v36, %v3297_v63 }
  0xde   :  { %4904 = vst [vmem:[#allocation13_spill] sm:$0xff] %v3299_v0  ;;  %v619_v58 = vadd.f32 %v618_v37, %v3299_v0 }
  0xdf   :  { %v562_v52 = vadd.f32 %v561_v28, %v3271_v50 }
  0xe0   :  { %v3311_v6 = vpop.f32.mrf.mxu1 }
  0xe1   :  { %v580_v44 = vadd.f32 %v579_v33, %v3311_v6  ;;  %v563_v32 = vadd.f32 %v562_v52, %v3249_v40 }
  0xe3   :  { %v564_v37 = vadd.f32 %v563_v32, %v3255_v43 }
  0xe4   :  { %v3305_v3 = vpop.f32.mrf.mxu2 }
  0xe5   :  { %v3307_v4 = vpop.f32.mrf.mxu3  ;;  %v598_v29 = vadd.f32 %v597_v13, %v3305_v3 }
  0xe6   :  { %4905 = vst [vmem:[#allocation14_spill] sm:$0xff] %v3307_v4  ;;  %v620_v28 = vadd.f32 %v619_v58, %v3307_v4 }
  0xe8   :  { %v3319_v10 = vpop.f32.mrf.mxu1 }
  0xe9   :  { %v581_v25 = vadd.f32 %v580_v44, %v3319_v10 }
  0xec   :  { %v3313_v7 = vpop.f32.mrf.mxu2 }
  0xed   :  { %v3315_v8 = vpop.f32.mrf.mxu3  ;;  %v599_v62 = vadd.f32 %v598_v29, %v3313_v7 }
  0xee   :  { %4906 = vst [vmem:[#allocation15_spill] sm:$0xff] %v3315_v8  ;;  %v621_v36 = vadd.f32 %v620_v28, %v3315_v8 }
  0xf0   :  { %v3331_v16 = vpop.f32.mrf.mxu1 }
  0xf1   :  { %v582_v33 = vadd.f32 %v581_v25, %v3331_v16 }
  0xf4   :  { %v3321_v11 = vpop.f32.mrf.mxu2 }
  0xf5   :  { %v3323_v12 = vpop.f32.mrf.mxu3  ;;  %v600_v63 = vadd.f32 %v599_v62, %v3321_v11  ;;  %v565_v62 = vadd.f32 %v564_v37, %v3267_v48 }
  0xf6   :  { %4907 = vst [vmem:[#allocation16_spill] sm:$0xff] %v3323_v12  ;;  %v622_v44 = vadd.f32 %v621_v36, %v3323_v12 }
  0xf8   :  { %v3343_v23 = vpop.f32.mrf.mxu1 }
  0xf9   :  { %v583_v54 = vadd.f32 %v582_v33, %v3343_v23 }
  0xfc   :  { %v3329_v15 = vpop.f32.mrf.mxu2 }
  0xfd   :  { %v3333_v17 = vpop.f32.mrf.mxu3  ;;  %v601_v52 = vadd.f32 %v600_v63, %v3329_v15 }
  0xfe   :  { %4908 = vst [vmem:[#allocation17_spill] sm:$0xff] %v3333_v17  ;;  %v623_v25 = vadd.f32 %v622_v44, %v3333_v17 }
 0x100   :  { %v3356_v31 = vpop.f32.mrf.mxu1 }
 0x101   :  { %v584_v13 = vadd.f32 %v583_v54, %v3356_v31 }
 0x104   :  { %v3337_v20 = vpop.f32.mrf.mxu2 }
 0x105   :  { %4909 = vst [vmem:[#allocation18_spill] sm:$0xff] %v3337_v20  ;;  %v3339_v21 = vpop.f32.mrf.mxu3  ;;  %v602_v28 = vadd.f32 %v601_v52, %v3337_v20  ;;  %v566_v52 = vadd.f32 %v565_v62, %v3273_v51 }
 0x106   :  { %4910 = vst [vmem:[#allocation19_spill] sm:$0xff] %v3339_v21  ;;  %v624_v32 = vadd.f32 %v623_v25, %v3339_v21 }
 0x108   :  { %v3367_v45 = vpop.f32.mrf.mxu1 }
 0x109   :  { %v585_v29 = vadd.f32 %v584_v13, %v3367_v45 }
 0x10c   :  { %v3347_v26 = vpop.f32.mrf.mxu2 }
 0x10d   :  { %4911 = vst [vmem:[#allocation20_spill] sm:$0xff] %v3347_v26  ;;  %v3349_v27 = vpop.f32.mrf.mxu3  ;;  %v603_v36 = vadd.f32 %v602_v28, %v3347_v26 }
 0x10e   :  { %4912 = vst [vmem:[#allocation21_spill] sm:$0xff] %v3349_v27  ;;  %v625_v63 = vadd.f32 %v624_v32, %v3349_v27  ;;  %v567_v32 = vrot.slane %v566_v52, 4 }
 0x110   :  { %v3389_v24 = vpop.f32.mrf.mxu1 }
 0x111   :  { %v586_v54 = vadd.f32 %v585_v29, %v3389_v24 }
 0x114   :  { %v3360_v34 = vpop.f32.mrf.mxu2 }
 0x115   :  { %4913 = vst [vmem:[#allocation22_spill] sm:$0xff] %v3360_v34  ;;  %v3362_v35 = vpop.f32.mrf.mxu3  ;;  %v604_v44 = vadd.f32 %v603_v36, %v3360_v34 }
 0x116   :  { %4914 = vst [vmem:[#allocation23_spill] sm:$0xff] %v3362_v35  ;;  %v626_v13 = vadd.f32 %v625_v63, %v3362_v35  ;;  %v568_v35 = vadd.f32 %v567_v32, %v566_v52 }
 0x118   :  { %v3414_v33 = vpop.f32.mrf.mxu1 }
 0x119   :  { %v587_v12 = vadd.f32 %v586_v54, %v3414_v33 }
 0x11b   :  { %v588_v25 = vrot.slane %v587_v12, 4 }
 0x11c   :  { %v3370_v18 = vpop.f32.mrf.mxu2 }
 0x11d   :  { %4915 = vst [vmem:[#allocation24_spill] sm:$0xff] %v3370_v18  ;;  %v3372_v19 = vpop.f32.mrf.mxu3  ;;  %v605_v37 = vadd.f32 %v604_v44, %v3370_v18  ;;  %v589_v27 = vadd.f32 %v588_v25, %v587_v12 }
 0x11e   :  { %4916 = vst [vmem:[#allocation25_spill] sm:$0xff] %v3372_v19  ;;  %v627_v29 = vadd.f32 %v626_v13, %v3372_v19 }
 0x124   :  { %v3386_v56 = vpop.f32.mrf.mxu2 }
 0x125   :  { %4917 = vst [vmem:[#allocation26_spill] sm:$0xff] %v3386_v56  ;;  %v3391_v57 = vpop.f32.mrf.mxu3  ;;  %v606_v28 = vadd.f32 %v605_v37, %v3386_v56  ;;  %v590_v37 = vrot.slane %v589_v27, 2 }
 0x126   :  { %4918 = vst [vmem:[#allocation27_spill] sm:$0xff] %v3391_v57  ;;  %v628_v54 = vadd.f32 %v627_v29, %v3391_v57  ;;  %v569_v57 = vrot.slane %v568_v35, 2 }
 0x127   :  { %v591_v25 = vadd.f32 %v590_v37, %v589_v27 }
 0x129   :  { %v592_v32 = vrot.slane %v591_v25, 1 }
 0x12c   :  { %v3406_v0 = vpop.f32.mrf.mxu2 }
 0x12d   :  { %4919 = vst [vmem:[#allocation28_spill] sm:$0xff] %v3406_v0  ;;  %v3409_v58 = vpop.f32.mrf.mxu3  ;;  %v607_v36 = vadd.f32 %v606_v28, %v3406_v0  ;;  %v593_v0 = vadd.f32 %v592_v32, %v591_v25  ;;  %v4945_v32 = vld [vmem:[#allocation24_spill] sm:$0xff] }
 0x12e   :  { %4920 = vst [vmem:[#allocation29_spill] sm:$0xff] %v3409_v58  ;;  %v629_v63 = vadd.f32 %v628_v54, %v3409_v58 }
 0x134   :  { %v3425_v17 = vpop.f32.mrf.mxu2 }
 0x135   :  { %4921 = vst [vmem:[#allocation30_spill] sm:$0xff] %v3425_v17  ;;  %v3428_v8 = vpop.f32.mrf.mxu3  ;;  %v608_v62 = vadd.f32 %v607_v36, %v3425_v17  ;;  %v570_v36 = vadd.f32 %v569_v57, %v568_v35 }
 0x136   :  { %4922 = vst [vmem:[#allocation31_spill] sm:$0xff] %v3428_v8  ;;  %v630_v44 = vadd.f32 %v629_v63, %v3428_v8 }
 0x137   :  { %v571_v8 = vrot.slane %v570_v36, 1 }
 0x13c   :  { %v3437_v21 = vpop.f32.mrf.mxu2 }
 0x13d   :  { %4923 = vst [vmem:[#allocation32_spill] sm:$0xff] %v3437_v21  ;;  %v609_v4 = vadd.f32 %v608_v62, %v3437_v21  ;;  %v3440_v13 = vpop.f32.mrf.mxu3  ;;  %v572_v21 = vadd.f32 %v571_v8, %v570_v36  ;;  %v4943_v36 = vld [vmem:[#allocation20_spill] sm:$0xff] }
 0x13e   :  { %4924 = vst [vmem:[#allocation33_spill] sm:$0xff] %v3440_v13  ;;  %v631_v19 = vadd.f32 %v630_v44, %v3440_v13 }
 0x13f   :  { %v610_v29 = vrot.slane %v609_v4, 4  ;;  %v594_v18 = vadd.f32 %v593_v0, %v572_v21  ;;  %v4928_v21 = vld [vmem:[#allocation6_spill] sm:$0xff] }
 0x140   :  { %v632_v28 = vrot.slane %v631_v19, 4 }
 0x141   :  { %v611_v12 = vadd.f32 %v610_v29, %v609_v4 }
 0x142   :  { %v633_v54 = vadd.f32 %v632_v28, %v631_v19 }
 0x143   :  { %v612_v58 = vrot.slane %v611_v12, 2 }
 0x144   :  { %v634_v63 = vrot.slane %v633_v54, 2 }
 0x145   :  { %v613_v52 = vadd.f32 %v612_v58, %v611_v12 }
 0x146   :  { %v635_v62 = vadd.f32 %v634_v63, %v633_v54  ;;  %v4942_v54 = vld [vmem:[#allocation18_spill] sm:$0xff] }
 0x147   :  { %v614_v17 = vrot.slane %v613_v52, 1 }
 0x148   :  { %v636_v34 = vrot.slane %v635_v62, 1 }
 0x149   :  { %v615_v56 = vadd.f32 %v614_v17, %v613_v52  ;;  %v4944_v52 = vld [vmem:[#allocation22_spill] sm:$0xff] }
 0x14a   :  { %v637_v13 = vadd.f32 %v636_v34, %v635_v62 }
 0x14b   :  { %v616_v44 = vadd.f32 %v615_v56, %v594_v18  ;;  %v4935_v18 = vld [vmem:[#allocation9_spill] sm:$0xff] }
 0x14d   :  { %v638_v26 = vadd.f32 %v637_v13, %v616_v44 }
 0x14f   :  { %v3443_v20 = vmul.f32 0.001953125, %v638_v26 }
 0x151   :  { %v3447_v4 = vsub.f32 %v3281_v55, %v3443_v20  ;;  %v3451_v57 = vsub.f32 %v3289_v59, %v3443_v20  ;;  %v3455_v27 = vsub.f32 %v3301_v1, %v3443_v20  ;;  %v3459_v0 = vsub.f32 %v3309_v5, %v3443_v20 }
 0x152   :  { %v3463_v56 = vsub.f32 %v3317_v9, %v3443_v20  ;;  %v3467_v55 = vsub.f32 %v3327_v14, %v3443_v20  ;;  %v3471_v59 = vsub.f32 %v3341_v22, %v3443_v20  ;;  %v3475_v1 = vsub.f32 %v3354_v30, %v3443_v20  ;;  %v4930_v22 = vld [vmem:[#allocation8_spill] sm:$0xff] }
 0x153   :  { %v3479_v5 = vsub.f32 %v3247_v39, %v3443_v20  ;;  %v3483_v8 = vsub.f32 %v3253_v42, %v3443_v20  ;;  %v3487_v9 = vsub.f32 %v3265_v47, %v3443_v20  ;;  %v3491_v14 = vsub.f32 %v3271_v50, %v3443_v20 }
 0x154   :  { %v3495_v17 = vsub.f32 %v3249_v40, %v3443_v20  ;;  %v3499_v39 = vsub.f32 %v3255_v43, %v3443_v20  ;;  %v3503_v42 = vsub.f32 %v3267_v48, %v3443_v20  ;;  %v3507_v47 = vsub.f32 %v3273_v51, %v3443_v20 }
 0x155   :  { %v3511_v50 = vsub.f32 %v3245_v38, %v3443_v20  ;;  %v3515_v40 = vsub.f32 %v3251_v41, %v3443_v20  ;;  %v3519_v43 = vsub.f32 %v3263_v46, %v3443_v20  ;;  %v3523_v48 = vsub.f32 %v3269_v49, %v3443_v20 }
 0x156   :  { %v3527_v51 = vsub.f32 %v4928_v21, %v3443_v20  ;;  %v3531_v38 = vsub.f32 %v4930_v22, %v3443_v20  ;;  %v704_v41 = vmul.f32 %v3447_v4, %v3447_v4  ;;  %v705_v26 = vmul.f32 %v3451_v57, %v3451_v57  ;;  %v4946_v22 = vld [vmem:[#allocation26_spill] sm:$0xff] }
 0x157   :  { %4925 = vst [vmem:[#allocation34_spill] sm:$0xff] %v3515_v40  ;;  %v3539_v46 = vsub.f32 %v3293_v61, %v3443_v20  ;;  %v3543_v49 = vsub.f32 %v3303_v2, %v3443_v20  ;;  %v3547_v30 = vsub.f32 %v3311_v6, %v3443_v20  ;;  %v3551_v34 = vsub.f32 %v3319_v10, %v3443_v20 }
 0x158   :  { %4926 = vst [vmem:[#allocation35_spill] sm:$0xff] %v3519_v43  ;;  %v3555_v35 = vsub.f32 %v3331_v16, %v3443_v20  ;;  %v3559_v61 = vsub.f32 %v3343_v23, %v3443_v20  ;;  %v3563_v2 = vsub.f32 %v3356_v31, %v3443_v20  ;;  %v3567_v6 = vsub.f32 %v3367_v45, %v3443_v20 }
 0x159   :  { %4927 = vst [vmem:[#allocation36_spill] sm:$0xff] %v3523_v48  ;;  %v3571_v10 = vsub.f32 %v3389_v24, %v3443_v20  ;;  %v3575_v16 = vsub.f32 %v3414_v33, %v3443_v20  ;;  %v3579_v23 = vsub.f32 %v3277_v53, %v3443_v20  ;;  %v3583_v31 = vsub.f32 %v4935_v18, %v3443_v20  ;;  %v4938_v53 = vld [vmem:[#allocation12_spill] sm:$0xff] }
 0x15a   :  { %4929 = vst [vmem:[#allocation6_spill] sm:$0xff] %v3527_v51  ;;  %v706_v45 = vmul.f32 %v3455_v27, %v3455_v27  ;;  %v720_v19 = vadd.f32 %v705_v26, %v704_v41  ;;  %v741_v24 = vmul.f32 %v3511_v50, %v3511_v50  ;;  %v742_v58 = vmul.f32 %v3515_v40, %v3515_v40  ;;  %v4947_v26 = vld [vmem:[#allocation28_spill] sm:$0xff] }
 0x15b   :  { %4931 = vst [vmem:[#allocation8_spill] sm:$0xff] %v3531_v38  ;;  %v3593_v33 = vsub.f32 %v3291_v60, %v3443_v20  ;;  %v3597_v13 = vsub.f32 %v4938_v53, %v3443_v20  ;;  %v3601_v37 = vsub.f32 %v3305_v3, %v3443_v20  ;;  %v3605_v29 = vsub.f32 %v3313_v7, %v3443_v20 }
 0x15c   :  { %4932 = vst [vmem:[#allocation37_spill] sm:$0xff] %v3539_v46  ;;  %v3609_v28 = vsub.f32 %v3321_v11, %v3443_v20  ;;  %v3613_v60 = vsub.f32 %v3329_v15, %v3443_v20  ;;  %v707_v12 = vmul.f32 %v3459_v0, %v3459_v0  ;;  %v721_v25 = vadd.f32 %v720_v19, %v706_v45 }
 0x15d   :  { %4933 = vst [vmem:[#allocation38_spill] sm:$0xff] %v3551_v34  ;;  %v3619_v3 = vsub.f32 %v4942_v54, %v3443_v20  ;;  %v3623_v7 = vsub.f32 %v4943_v36, %v3443_v20  ;;  %v3627_v11 = vsub.f32 %v4944_v52, %v3443_v20  ;;  %v3631_v15 = vsub.f32 %v4945_v32, %v3443_v20  ;;  %v4949_v36 = vld [vmem:[#allocation7_spill] sm:$0xff]  ;;  %v4951_v32 = vld [vmem:[#allocation10_spill] sm:$0xff] }
 0x15e   :  { %4934 = vst [vmem:[#allocation39_spill] sm:$0xff] %v3579_v23  ;;  %v708_v63 = vmul.f32 %v3463_v56, %v3463_v56  ;;  %v722_v62 = vadd.f32 %v721_v25, %v707_v12  ;;  %v743_v44 = vmul.f32 %v3519_v43, %v3519_v43  ;;  %v757_v21 = vadd.f32 %v742_v58, %v741_v24  ;;  %v4948_v58 = vld [vmem:[#allocation30_spill] sm:$0xff] }
 0x15f   :  { %4936 = vst [vmem:[#allocation9_spill] sm:$0xff] %v3583_v31  ;;  %v3639_v41 = vsub.f32 %v4946_v22, %v3443_v20  ;;  %v3643_v18 = vsub.f32 %v4947_v26, %v3443_v20  ;;  %v709_v45 = vmul.f32 %v3467_v55, %v3467_v55  ;;  %v744_v19 = vmul.f32 %v3523_v48, %v3523_v48 }
 0x160   :  { %4937 = vst [vmem:[#allocation40_spill] sm:$0xff] %v3593_v33  ;;  %v723_v53 = vadd.f32 %v722_v62, %v708_v63  ;;  %v758_v12 = vadd.f32 %v757_v21, %v743_v44  ;;  %v779_v25 = vmul.f32 %v3579_v23, %v3579_v23  ;;  %v780_v24 = vmul.f32 %v3583_v31, %v3583_v31  ;;  %v4953_v63 = vld [vmem:[#allocation11_spill] sm:$0xff]  ;;  %v4954_v31 = vld [vmem:[#allocation13_spill] sm:$0xff]  ;;  %v4956_v23 = vld [vmem:[#allocation14_spill] sm:$0xff] }
 0x161   :  { %4939 = vst [vmem:[#allocation12_spill] sm:$0xff] %v3597_v13  ;;  %v3655_v54 = vsub.f32 %v4948_v58, %v3443_v20  ;;  %v3659_v52 = vsub.f32 %v4949_v36, %v3443_v20  ;;  %v3663_v22 = vsub.f32 %v4951_v32, %v3443_v20  ;;  %v3667_v62 = vsub.f32 %v4953_v63, %v3443_v20 }
 0x162   :  { %4940 = vst [vmem:[#allocation41_spill] sm:$0xff] %v3601_v37  ;;  %v710_v44 = vmul.f32 %v3471_v59, %v3471_v59  ;;  %v724_v21 = vadd.f32 %v723_v53, %v709_v45  ;;  %v745_v26 = vmul.f32 %v3527_v51, %v3527_v51  ;;  %v759_v58 = vadd.f32 %v758_v12, %v744_v19  ;;  %v4958_v12 = vld [vmem:[#allocation15_spill] sm:$0xff]  ;;  %v4960_v51 = vld [vmem:[#allocation16_spill] sm:$0xff] }
 0x163   :  { %4941 = vst [vmem:[#allocation42_spill] sm:$0xff] %v3605_v29  ;;  %v3675_v36 = vsub.f32 %v4954_v31, %v3443_v20  ;;  %v3679_v32 = vsub.f32 %v4956_v23, %v3443_v20  ;;  %v711_v63 = vmul.f32 %v3475_v1, %v3475_v1  ;;  %v746_v48 = vmul.f32 %v3531_v38, %v3531_v38 }
 0x164   :  { %4950 = vst [vmem:[#allocation18_spill] sm:$0xff] %v3659_v52  ;;  %v725_v43 = vadd.f32 %v724_v21, %v710_v44  ;;  %v760_v45 = vadd.f32 %v759_v58, %v745_v26  ;;  %v781_v53 = vmul.f32 %v3593_v33, %v3593_v33  ;;  %v795_v19 = vadd.f32 %v780_v24, %v779_v25 }
 0x165   :  { %4952 = vst [vmem:[#allocation20_spill] sm:$0xff] %v3663_v22  ;;  %v3689_v31 = vsub.f32 %v4958_v12, %v3443_v20  ;;  %v3693_v23 = vsub.f32 %v4960_v51, %v3443_v20  ;;  %v712_v40 = vmul.f32 %v3479_v5, %v3479_v5  ;;  %v747_v38 = vmul.f32 %v3539_v46, %v3539_v46 }
 0x166   :  { %4955 = vst [vmem:[#allocation22_spill] sm:$0xff] %v3675_v36  ;;  %v726_v44 = vadd.f32 %v725_v43, %v711_v63  ;;  %v761_v21 = vadd.f32 %v760_v45, %v746_v48  ;;  %v782_v26 = vmul.f32 %v3597_v13, %v3597_v13  ;;  %v796_v25 = vadd.f32 %v795_v19, %v781_v53  ;;  %v4962_v63 = vld [vmem:[#allocation17_spill] sm:$0xff]  ;;  %v4964_v53 = vld [vmem:[#allocation19_spill] sm:$0xff] }
 0x167   :  { %4957 = vst [vmem:[#allocation24_spill] sm:$0xff] %v3679_v32  ;;  %v713_v24 = vmul.f32 %v3483_v8, %v3483_v8  ;;  %v748_v58 = vmul.f32 %v3543_v49, %v3543_v49  ;;  %v817_v51 = vmul.f32 %v3659_v52, %v3659_v52  ;;  %v818_v12 = vmul.f32 %v3663_v22, %v3663_v22 }
 0x168   :  { %4959 = vst [vmem:[#allocation26_spill] sm:$0xff] %v3689_v31  ;;  %v727_v33 = vadd.f32 %v726_v44, %v712_v40  ;;  %v762_v46 = vadd.f32 %v761_v21, %v747_v38  ;;  %v783_v43 = vmul.f32 %v3601_v37, %v3601_v37  ;;  %v797_v48 = vadd.f32 %v796_v25, %v782_v26 }
 0x169   :  { %4961 = vst [vmem:[#allocation28_spill] sm:$0xff] %v3693_v23  ;;  %v3713_v45 = vsub.f32 %v4962_v63, %v3443_v20  ;;  %v3717_v19 = vsub.f32 %v4964_v53, %v3443_v20  ;;  %v714_v52 = vmul.f32 %v3487_v9, %v3487_v9  ;;  %v749_v22 = vmul.f32 %v3547_v30, %v3547_v30 }
 0x16a   :  { %v728_v40 = vadd.f32 %v727_v33, %v713_v24  ;;  %v763_v38 = vadd.f32 %v762_v46, %v748_v58  ;;  %v784_v44 = vmul.f32 %v3605_v29, %v3605_v29  ;;  %v798_v21 = vadd.f32 %v797_v48, %v783_v43 }
 0x16b   :  { %4963 = vst [vmem:[#allocation30_spill] sm:$0xff] %v3713_v45  ;;  %v715_v26 = vmul.f32 %v3491_v14, %v3491_v14  ;;  %v750_v25 = vmul.f32 %v3551_v34, %v3551_v34  ;;  %v819_v63 = vmul.f32 %v3667_v62, %v3667_v62  ;;  %v833_v53 = vadd.f32 %v818_v12, %v817_v51 }
 0x16c   :  { %4965 = vst [vmem:[#allocation7_spill] sm:$0xff] %v3717_v19  ;;  %v729_v37 = vadd.f32 %v728_v40, %v714_v52  ;;  %v764_v13 = vadd.f32 %v763_v38, %v749_v22  ;;  %v785_v33 = vmul.f32 %v3609_v28, %v3609_v28  ;;  %v799_v46 = vadd.f32 %v798_v21, %v784_v44 }
 0x16d   :  { %v716_v24 = vmul.f32 %v3495_v17, %v3495_v17  ;;  %v751_v58 = vmul.f32 %v3555_v35, %v3555_v35  ;;  %v820_v43 = vmul.f32 %v3675_v36, %v3675_v36  ;;  %v834_v48 = vadd.f32 %v833_v53, %v819_v63 }
 0x16e   :  { %v730_v29 = vadd.f32 %v729_v37, %v715_v26  ;;  %v765_v34 = vadd.f32 %v764_v13, %v750_v25  ;;  %v786_v52 = vmul.f32 %v3613_v60, %v3613_v60  ;;  %v800_v22 = vadd.f32 %v799_v46, %v785_v33 }
 0x16f   :  { %v717_v51 = vmul.f32 %v3499_v39, %v3499_v39  ;;  %v752_v12 = vmul.f32 %v3559_v61, %v3559_v61  ;;  %v821_v40 = vmul.f32 %v3679_v32, %v3679_v32  ;;  %v835_v38 = vadd.f32 %v834_v48, %v820_v43 }
 0x170   :  { %v731_v44 = vadd.f32 %v730_v29, %v716_v24  ;;  %v766_v21 = vadd.f32 %v765_v34, %v751_v58  ;;  %v787_v37 = vmul.f32 %v3619_v3, %v3619_v3  ;;  %v801_v13 = vadd.f32 %v800_v22, %v786_v52 }
 0x171   :  { %v718_v26 = vmul.f32 %v3503_v42, %v3503_v42  ;;  %v753_v25 = vmul.f32 %v3563_v2, %v3563_v2  ;;  %v822_v63 = vmul.f32 %v3689_v31, %v3689_v31  ;;  %v836_v53 = vadd.f32 %v835_v38, %v821_v40  ;;  %v4966_v40 = vld [vmem:[#allocation21_spill] sm:$0xff] }
 0x172   :  { %v732_v33 = vadd.f32 %v731_v44, %v717_v51  ;;  %v767_v46 = vadd.f32 %v766_v21, %v752_v12  ;;  %v788_v29 = vmul.f32 %v3623_v7, %v3623_v7  ;;  %v802_v34 = vadd.f32 %v801_v13, %v787_v37 }
 0x173   :  { %v719_v24 = vmul.f32 %v3507_v47, %v3507_v47  ;;  %v754_v58 = vmul.f32 %v3567_v6, %v3567_v6  ;;  %v823_v43 = vmul.f32 %v3693_v23, %v3693_v23  ;;  %v837_v48 = vadd.f32 %v836_v53, %v822_v63  ;;  %v4968_v63 = vld [vmem:[#allocation23_spill] sm:$0xff] }
 0x174   :  { %v733_v52 = vadd.f32 %v732_v33, %v718_v26  ;;  %v768_v22 = vadd.f32 %v767_v46, %v753_v25  ;;  %v789_v51 = vmul.f32 %v3627_v11, %v3627_v11  ;;  %v803_v12 = vadd.f32 %v802_v34, %v788_v29 }
 0x175   :  { %v3767_v38 = vsub.f32 %v4966_v40, %v3443_v20  ;;  %v755_v44 = vmul.f32 %v3571_v10, %v3571_v10  ;;  %v824_v21 = vmul.f32 %v3713_v45, %v3713_v45  ;;  %v838_v37 = vadd.f32 %v837_v48, %v823_v43  ;;  %v4970_v43 = vld [vmem:[#allocation32_spill] sm:$0xff] }
 0x176   :  { %v734_v13 = vadd.f32 %v733_v52, %v719_v24  ;;  %v769_v23 = vadd.f32 %v768_v22, %v754_v58  ;;  %v790_v26 = vmul.f32 %v3631_v15, %v3631_v15  ;;  %v804_v25 = vadd.f32 %v803_v12, %v789_v51  ;;  %v4971_v52 = vld [vmem:[#allocation25_spill] sm:$0xff] }
 0x177   :  { %4967 = vst [vmem:[#allocation10_spill] sm:$0xff] %v3767_v38  ;;  %v3777_v53 = vsub.f32 %v4968_v63, %v3443_v20  ;;  %v756_v33 = vmul.f32 %v3575_v16, %v3575_v16  ;;  %v825_v46 = vmul.f32 %v3717_v19, %v3717_v19  ;;  %v839_v29 = vadd.f32 %v838_v37, %v824_v21  ;;  %v4973_v37 = vld [vmem:[#allocation27_spill] sm:$0xff] }
 0x178   :  { %v735_v34 = vrot.slane %v734_v13, 4  ;;  %v770_v40 = vadd.f32 %v769_v23, %v755_v44  ;;  %v791_v24 = vmul.f32 %v3639_v41, %v3639_v41  ;;  %v805_v58 = vadd.f32 %v804_v25, %v790_v26 }
 0x179   :  { %4969 = vst [vmem:[#allocation11_spill] sm:$0xff] %v3777_v53  ;;  %v3787_v48 = vsub.f32 %v4970_v43, %v3443_v20  ;;  %v3791_v22 = vsub.f32 %v4971_v52, %v3443_v20  ;;  %v826_v51 = vmul.f32 %v3767_v38, %v3767_v38  ;;  %v840_v12 = vadd.f32 %v839_v29, %v825_v46 }
 0x17a   :  { %v736_v63 = vadd.f32 %v735_v34, %v734_v13  ;;  %v771_v21 = vadd.f32 %v770_v40, %v756_v33  ;;  %v792_v23 = vmul.f32 %v3643_v18, %v3643_v18  ;;  %v806_v44 = vadd.f32 %v805_v58, %v791_v24  ;;  %v4975_v13 = vld [vmem:[#allocation29_spill] sm:$0xff] }
 0x17b   :  { %4972 = vst [vmem:[#allocation13_spill] sm:$0xff] %v3791_v22  ;;  %v3799_v26 = vsub.f32 %v4973_v37, %v3443_v20  ;;  %v827_v25 = vmul.f32 %v3777_v53, %v3777_v53  ;;  %v841_v43 = vadd.f32 %v840_v12, %v826_v51  ;;  %v793_v19 = vmul.f32 %v3655_v54, %v3655_v54  ;;  %v4977_v51 = vld [vmem:[#allocation31_spill] sm:$0xff]  ;;  %v4979_v53 = vld [vmem:[#allocation33_spill] sm:$0xff] }
 0x17c   :  { %v772_v52 = vrot.slane %v771_v21, 4  ;;  %v807_v38 = vadd.f32 %v806_v44, %v792_v23  ;;  %v3807_v33 = vsub.f32 %v4975_v13, %v3443_v20  ;;  %v737_v46 = vrot.slane %v736_v63, 2 }
 0x17d   :  { %4974 = vst [vmem:[#allocation14_spill] sm:$0xff] %v3799_v26  ;;  %v828_v29 = vmul.f32 %v3791_v22, %v3791_v22  ;;  %v842_v34 = vadd.f32 %v841_v43, %v827_v25  ;;  %v794_v24 = vmul.f32 %v3787_v48, %v3787_v48  ;;  %v3815_v12 = vsub.f32 %v4977_v51, %v3443_v20 }
 0x17e   :  { %4976 = vst [vmem:[#allocation15_spill] sm:$0xff] %v3807_v33  ;;  %v773_v40 = vadd.f32 %v772_v52, %v771_v21  ;;  %v808_v58 = vadd.f32 %v807_v38, %v793_v19  ;;  %v829_v23 = vmul.f32 %v3799_v26, %v3799_v26  ;;  %v703_v45 = vsub.f32 %v4979_v53, %v3443_v20 }
 0x17f   :  { %4978 = vst [vmem:[#allocation16_spill] sm:$0xff] %v3815_v12  ;;  %v843_v44 = vadd.f32 %v842_v34, %v828_v29  ;;  %v738_v22 = vadd.f32 %v737_v46, %v736_v63  ;;  %v830_v21 = vmul.f32 %v3807_v33, %v3807_v33  ;;  %v831_v38 = vmul.f32 %v3815_v12, %v3815_v12 }
 0x180   :  { %v774_v37 = vrot.slane %v773_v40, 2  ;;  %v809_v13 = vadd.f32 %v808_v58, %v794_v24  ;;  %v832_v29 = vmul.f32 %v703_v45, %v703_v45 }
 0x181   :  { %v844_v25 = vadd.f32 %v843_v44, %v829_v23  ;;  %v739_v31 = vrot.slane %v738_v22, 1 }
 0x182   :  { %v775_v43 = vadd.f32 %v774_v37, %v773_v40  ;;  %v810_v19 = vrot.slane %v809_v13, 4 }
 0x183   :  { %v845_v52 = vadd.f32 %v844_v25, %v830_v21  ;;  %v740_v20 = vadd.f32 %v739_v31, %v738_v22 }
 0x184   :  { %v811_v51 = vadd.f32 %v810_v19, %v809_v13  ;;  %v776_v26 = vrot.slane %v775_v43, 1 }
 0x185   :  { %v846_v34 = vadd.f32 %v845_v52, %v831_v38 }
 0x186   :  { %v812_v24 = vrot.slane %v811_v51, 2  ;;  %v777_v53 = vadd.f32 %v776_v26, %v775_v43 }
 0x187   :  { %v847_v58 = vadd.f32 %v846_v34, %v832_v29 }
 0x188   :  { %v813_v32 = vadd.f32 %v812_v24, %v811_v51  ;;  %v778_v23 = vadd.f32 %v777_v53, %v740_v20 }
 0x189   :  { %v848_v63 = vrot.slane %v847_v58, 4 }
 0x18a   :  { %v814_v46 = vrot.slane %v813_v32, 1 }
 0x18b   :  { %v849_v33 = vadd.f32 %v848_v63, %v847_v58 }
 0x18c   :  { %v815_v44 = vadd.f32 %v814_v46, %v813_v32  ;;  %v867_v32 = vld [vmem:[%s4831_s5] sm:$0x1] }
 0x18d   :  { %v850_v40 = vrot.slane %v849_v33, 2 }
 0x18e   :  { %v816_v36 = vadd.f32 %v815_v44, %v778_v23  ;;  %v4981_v23 = vld [vmem:[#allocation34_spill] sm:$0xff]  ;;  %v4983_v44 = vld [vmem:[#allocation36_spill] sm:$0xff] }
 0x18f   :  { %v851_v37 = vadd.f32 %v850_v40, %v849_v33 }
 0x191   :  { %v852_v12 = vrot.slane %v851_v37, 1 }
 0x193   :  { %v853_v21 = vadd.f32 %v852_v12, %v851_v37  ;;  %v4984_v37 = vld [vmem:[#allocation6_spill] sm:$0xff] }
 0x195   :  { %v854_v13 = vadd.f32 %v853_v21, %v816_v36  ;;  %v3831_v36 = vld [vmem:[%s4832_s6] ss:$0 sm:$0xff] }
 0x197   :  { %v855_v25 = vmul.f32 0.001953125, %v854_v13 }
 0x199   :  { %v856_v19 = vadd.f32 1e-05, %v855_v25 }
 0x19b   :  { %3039 = vrsqrt.f32 %v856_v19  ;;  %vm863_vm1 = vweird.f32 %v856_v19 }
 0x1a1   :  { %v3040_v38 = vpop.eup %3039 }
 0x1a2   :  { %v858_v52 = vmul.f32 %v3040_v38, %v856_v19  ;;  %vm864_vm0 = vweird.f32 %v3040_v38 }
 0x1a3   :  { %vm865_vm2 = vmor %vm863_vm1, %vm864_vm0 }
 0x1a4   :  { %v859_v29 = vmul.f32 %v3040_v38, %v858_v52 }
 0x1a6   :  { %v860_v51 = vmul.f32 0.5, %v859_v29 }
 0x1a8   :  { %v861_v31 = vsub.f32 1.5, %v860_v51 }
 0x1aa   :  { %v862_v22 = vmul.f32 %v3040_v38, %v861_v31 }
 0x1ac   :  { %v866_v26 = vsel %vm865_vm2, %v3040_v38, %v862_v22  ;;  %v4987_v38 = vld [vmem:[#allocation38_spill] sm:$0xff] }
 0x1ad   :  { %v868_v33 = vmul.f32 %v867_v32, %v866_v26  ;;  %v4988_v32 = vld [vmem:[#allocation39_spill] sm:$0xff] }
 0x1af   :  { %v3833_v12 = vperm.slane %v868_v33, 0 }
 0x1b1   :  { %v1031_v43 = vmul.f32 %v3833_v12, %v703_v45  ;;  %v3841_v24 = vmul.f32 %v3833_v12, %v3447_v4  ;;  %v3845_v58 = vmul.f32 %v3833_v12, %v3451_v57  ;;  %v873_v20 = vmul.f32 %v3833_v12, %v3455_v27 }
 0x1b2   :  { %v3851_v53 = vmul.f32 %v3833_v12, %v3459_v0  ;;  %v3855_v45 = vmul.f32 %v3833_v12, %v3463_v56  ;;  %v3859_v63 = vmul.f32 %v3833_v12, %v3467_v55  ;;  %v3863_v4 = vmul.f32 %v3833_v12, %v3471_v59 }
 0x1b3   :  { %v3837_v34 = vadd.f32 %v3831_v36, %v1031_v43  ;;  %v3867_v57 = vmul.f32 %v3833_v12, %v3475_v1  ;;  %v3871_v27 = vmul.f32 %v3833_v12, %v3479_v5  ;;  %v880_v0 = vmul.f32 %v3833_v12, %v3483_v8  ;;  %v4991_v43 = vld [vmem:[#allocation12_spill] sm:$0xff] }
 0x1b4   :  { %v881_v56 = vmul.f32 %v3833_v12, %v3487_v9  ;;  %v882_v55 = vmul.f32 %v3833_v12, %v3491_v14  ;;  %v883_v59 = vmul.f32 %v3833_v12, %v3495_v17  ;;  %v884_v1 = vmul.f32 %v3833_v12, %v3499_v39  ;;  %v4982_v17 = vld [vmem:[#allocation35_spill] sm:$0xff] }
 0x1b5   :  { %4980 = vst [vmem:[#allocation17_spill] sm:$0xff] %v3837_v34  ;;  %v885_v5 = vmul.f32 %v3833_v12, %v3503_v42  ;;  %v886_v8 = vmul.f32 %v3833_v12, %v3507_v47  ;;  %v3890_v9 = vmul.f32 %v3833_v12, %v3511_v50  ;;  %v3894_v14 = vmul.f32 %v3833_v12, %v4981_v23  ;;  %v4985_v47 = vld [vmem:[#allocation8_spill] sm:$0xff]  ;;  %v4986_v50 = vld [vmem:[#allocation37_spill] sm:$0xff] }
 0x1b6   :  { %v922_v40 = vmul.f32 %v3833_v12, %v4982_v17  ;;  %v3900_v39 = vmul.f32 %v3833_v12, %v4983_v44  ;;  %v3904_v42 = vmul.f32 %v3833_v12, %v4984_v37  ;;  %v3908_v21 = vmul.f32 %v3833_v12, %v4985_v47  ;;  %v4992_v23 = vld [vmem:[#allocation41_spill] sm:$0xff] }
 0x1b7   :  { %v3912_v13 = vmul.f32 %v3833_v12, %v4986_v50  ;;  %v3916_v25 = vmul.f32 %v3833_v12, %v3543_v49  ;;  %v3920_v19 = vmul.f32 %v3833_v12, %v3547_v30  ;;  %v929_v52 = vmul.f32 %v3833_v12, %v4987_v38 }
 0x1b8   :  { %v930_v29 = vmul.f32 %v3833_v12, %v3555_v35  ;;  %v931_v51 = vmul.f32 %v3833_v12, %v3559_v61  ;;  %v932_v31 = vmul.f32 %v3833_v12, %v3563_v2  ;;  %v933_v49 = vmul.f32 %v3833_v12, %v3567_v6  ;;  %v4989_v35 = vld [vmem:[#allocation9_spill] sm:$0xff]  ;;  %v4990_v61 = vld [vmem:[#allocation40_spill] sm:$0xff] }
 0x1b9   :  { %v934_v22 = vmul.f32 %v3833_v12, %v3571_v10  ;;  %v935_v30 = vmul.f32 %v3833_v12, %v3575_v16  ;;  %v3938_v26 = vmul.f32 %v3833_v12, %v4988_v32  ;;  %v3942_v33 = vmul.f32 %v3833_v12, %v4989_v35  ;;  %v4993_v16 = vld [vmem:[#allocation42_spill] sm:$0xff] }
 0x1ba   :  { %v970_v2 = vmul.f32 %v3833_v12, %v4990_v61  ;;  %v3948_v6 = vmul.f32 %v3833_v12, %v4991_v43  ;;  %v3952_v10 = vmul.f32 %v3833_v12, %v4992_v23  ;;  %v3956_v17 = vmul.f32 %v3833_v12, %v4993_v16  ;;  %v4995_v61 = vld [vmem:[#allocation18_spill] sm:$0xff] }
 0x1bb   :  { %v3960_v44 = vmul.f32 %v3833_v12, %v3609_v28  ;;  %v1018_v37 = vmul.f32 %v3833_v12, %v3667_v62  ;;  %v3966_v47 = vmul.f32 %v3833_v12, %v3613_v60  ;;  %v3970_v50 = vmul.f32 %v3833_v12, %v3619_v3 }
 0x1bc   :  { %v977_v38 = vmul.f32 %v3833_v12, %v3623_v7  ;;  %v978_v32 = vmul.f32 %v3833_v12, %v3627_v11  ;;  %v979_v28 = vmul.f32 %v3833_v12, %v3631_v15  ;;  %v980_v62 = vmul.f32 %v3833_v12, %v3639_v41  ;;  %v4996_v15 = vld [vmem:[#allocation20_spill] sm:$0xff]  ;;  %v4998_v41 = vld [vmem:[#allocation22_spill] sm:$0xff] }
 0x1bd   :  { %4994 = vst [vmem:[#allocation19_spill] sm:$0xff] %v3970_v50  ;;  %v981_v60 = vmul.f32 %v3833_v12, %v3643_v18  ;;  %v982_v35 = vmul.f32 %v3833_v12, %v3655_v54  ;;  %v983_v3 = vmul.f32 %v3833_v12, %v3787_v48  ;;  %v1016_v7 = vmul.f32 %v3833_v12, %v4995_v61  ;;  %v5000_v48 = vld [vmem:[#allocation24_spill] sm:$0xff]  ;;  %v5002_v61 = vld [vmem:[#allocation26_spill] sm:$0xff]  ;;  %v5006_v50 = vld [vmem:[#allocation7_spill] sm:$0xff] }
 0x1be   :  { %v890_v11 = vadd.f32 %v3831_v36, %v873_v20  ;;  %v938_v43 = vadd.f32 %v3831_v36, %v922_v40  ;;  %v3992_v23 = vmul.f32 %v3833_v12, %v4996_v15  ;;  %v3996_v18 = vmul.f32 %v3833_v12, %v4998_v41  ;;  %v5004_v15 = vld [vmem:[#allocation28_spill] sm:$0xff]  ;;  %v5005_v41 = vld [vmem:[#allocation30_spill] sm:$0xff] }
 0x1bf   :  { %v986_v54 = vadd.f32 %v3831_v36, %v970_v2  ;;  %v1034_v16 = vadd.f32 %v3831_v36, %v1018_v37  ;;  %v4002_v46 = vmul.f32 %v3833_v12, %v5000_v48  ;;  %v4006_v20 = vmul.f32 %v3833_v12, %v5002_v61 }
 0x1c0   :  { %4997 = vst [vmem:[#allocation21_spill] sm:$0xff] %v3992_v23  ;;  %v906_v40 = vmax.f32 %v890_v11, 0.0  ;;  %v954_v34 = vmax.f32 %v938_v43, 0.0  ;;  %v4010_v23 = vmul.f32 %v3833_v12, %v5004_v15  ;;  %v4018_v48 = vmul.f32 %v3833_v12, %v5006_v50 }
 0x1c1   :  { %4999 = vst [vmem:[#allocation23_spill] sm:$0xff] %v3996_v18  ;;  %v4014_v18 = vmul.f32 %v3833_v12, %v5005_v41  ;;  %v1002_v2 = vmax.f32 %v986_v54, 0.0  ;;  %v1050_v37 = vmax.f32 %v1034_v16, 0.0  ;;  %v4023_v11 = vadd.f32 %v3831_v36, %v880_v0  ;;  %v5010_v16 = vld [vmem:[#allocation11_spill] sm:$0xff] }
 0x1c2   :  { %5001 = vst [vmem:[#allocation32_spill] sm:$0xff] %v4002_v46  ;;  %v5008_v46 = vld [vmem:[#allocation10_spill] sm:$0xff]  ;;  %v4026_v15 = vadd.f32 %v3831_v36, %v881_v56  ;;  %v4029_v41 = vadd.f32 %v3831_v36, %v882_v55  ;;  %v4032_v54 = vadd.f32 %v3831_v36, %v883_v59  ;;  %v1026_v50 = vmul.f32 %v3833_v12, %v5010_v16  ;;  %v5012_v56 = vld [vmem:[#allocation13_spill] sm:$0xff]  ;;  %v5014_v59 = vld [vmem:[#allocation15_spill] sm:$0xff] }
 0x1c3   :  { %5003 = vst [vmem:[#allocation25_spill] sm:$0xff] %v4006_v20  ;;  %v1025_v61 = vmul.f32 %v3833_v12, %v5008_v46  ;;  %v1066_v20 = vmax.f32 %v906_v40, %v954_v34  ;;  %v1082_v43 = vmax.f32 %v1002_v2, %v1050_v37  ;;  %v4040_v34 = vadd.f32 %v3831_v36, %v885_v5  ;;  %v5013_v55 = vld [vmem:[#allocation14_spill] sm:$0xff]  ;;  %v5016_v16 = vld [vmem:[#allocation16_spill] sm:$0xff] }
 0x1c4   :  { %5007 = vst [vmem:[#allocation27_spill] sm:$0xff] %v4018_v48  ;;  %v4037_v48 = vadd.f32 %v3831_v36, %v884_v1  ;;  %v4043_v0 = vadd.f32 %v3831_v36, %v886_v8  ;;  %v1027_v46 = vmul.f32 %v3833_v12, %v5012_v56  ;;  %v1028_v40 = vmul.f32 %v3833_v12, %v5013_v55 }
 0x1c5   :  { %5009 = vst [vmem:[#allocation29_spill] sm:$0xff] %v4026_v15  ;;  %v1029_v2 = vmul.f32 %v3833_v12, %v5014_v59  ;;  %v4051_v37 = vmax.f32 %v1066_v20, %v1082_v43  ;;  %v1030_v1 = vmul.f32 %v3833_v12, %v5016_v16  ;;  %v888_v5 = vadd.f32 %v3831_v36, %v3841_v24 }
 0x1c6   :  { %5011 = vst [vmem:[#allocation31_spill] sm:$0xff] %v4043_v0  ;;  %v4059_v8 = vadd.f32 %v3831_v36, %v3845_v58  ;;  %v4063_v56 = vadd.f32 %v3831_v36, %v3851_v53  ;;  %v4068_v20 = vadd.f32 %v3831_v36, %v929_v52  ;;  %v4071_v12 = vadd.f32 %v3831_v36, %v930_v29 }
 0x1c7   :  { %5015 = vst [vmem:[#allocation33_spill] sm:$0xff] %v4051_v37  ;;  %1519 = vrot.lane.b32.xlu2 %v4051_v37, %s3077_s26  ;;  %v4074_v24 = vadd.f32 %v3831_v36, %v931_v51  ;;  %v4077_v58 = vadd.f32 %v3831_v36, %v932_v31  ;;  %v4081_v53 = vadd.f32 %v3831_v36, %v3855_v45 }
 0x1c8   :  { %v4084_v43 = vadd.f32 %v3831_v36, %v933_v49  ;;  %v4087_v55 = vadd.f32 %v3831_v36, %v934_v22  ;;  %v4090_v52 = vadd.f32 %v3831_v36, %v935_v30  ;;  %v4094_v29 = vadd.f32 %v3831_v36, %v3859_v63 }
 0x1c9   :  { %v4098_v51 = vadd.f32 %v3831_v36, %v3863_v4  ;;  %v4102_v45 = vadd.f32 %v3831_v36, %v3867_v57  ;;  %v4106_v31 = vadd.f32 %v3831_v36, %v3871_v27  ;;  %v936_v49 = vadd.f32 %v3831_v36, %v3890_v9 }
 0x1ca   :  { %5017 = vst [vmem:[#allocation34_spill] sm:$0xff] %v4090_v52  ;;  %v4112_v22 = vadd.f32 %v3831_v36, %v3894_v14  ;;  %v4116_v63 = vadd.f32 %v3831_v36, %v3900_v39  ;;  %v4119_v4 = vadd.f32 %v3831_v36, %v977_v38  ;;  %v4122_v57 = vadd.f32 %v3831_v36, %v978_v32  ;;  %v5024_v37 = vld [vmem:[#allocation25_spill] sm:$0xff] }
 0x1cb   :  { %v4125_v27 = vadd.f32 %v3831_v36, %v979_v28  ;;  %v4128_v30 = vadd.f32 %v3831_v36, %v980_v62  ;;  %v4131_v9 = vadd.f32 %v3831_v36, %v981_v60  ;;  %v984_v14 = vadd.f32 %v3831_v36, %v3938_v26 }
 0x1cc   :  { %v4136_v39 = vadd.f32 %v3831_v36, %v982_v35  ;;  %v4139_v38 = vadd.f32 %v3831_v36, %v983_v3  ;;  %v1032_v32 = vadd.f32 %v3831_v36, %v1016_v7  ;;  %v4144_v28 = vadd.f32 %v3831_v36, %v3904_v42 }
 0x1cd   :  { %v4148_v62 = vadd.f32 %v3831_v36, %v3908_v21  ;;  %v4152_v60 = vadd.f32 %v3831_v36, %v3912_v13  ;;  %v4156_v26 = vadd.f32 %v3831_v36, %v3916_v25  ;;  %v4160_v35 = vadd.f32 %v3831_v36, %v3920_v19 }
 0x1ce   :  { %5018 = vst [vmem:[#allocation35_spill] sm:$0xff] %v4139_v38  ;;  %v4164_v42 = vadd.f32 %v3831_v36, %v3942_v33  ;;  %v4167_v3 = vadd.f32 %v3831_v36, %v1025_v61  ;;  %v4170_v21 = vadd.f32 %v3831_v36, %v1026_v50  ;;  %v4173_v13 = vadd.f32 %v3831_v36, %v1027_v46  ;;  %v5022_v38 = vld [vmem:[#allocation23_spill] sm:$0xff] }
 0x1cf   :  { %v4176_v25 = vadd.f32 %v3831_v36, %v1028_v40  ;;  %v4179_v7 = vadd.f32 %v3831_v36, %v1029_v2  ;;  %v4182_v19 = vadd.f32 %v3831_v36, %v1030_v1  ;;  %v904_v33 = vmax.f32 %v888_v5, 0.0  ;;  %v5020_v5 = vld [vmem:[#allocation19_spill] sm:$0xff] }
 0x1d0   :  { %5019 = vst [vmem:[#allocation36_spill] sm:$0xff] %v4170_v21  ;;  %v952_v59 = vmax.f32 %v936_v49, 0.0  ;;  %v1000_v16 = vmax.f32 %v984_v14, 0.0  ;;  %v1048_v61 = vmax.f32 %v1032_v32, 0.0  ;;  %v4186_v50 = vadd.f32 %v3831_v36, %v3948_v6  ;;  %v5023_v21 = vld [vmem:[#allocation32_spill] sm:$0xff] }
 0x1d1   :  { %v4190_v46 = vadd.f32 %v3831_v36, %v3952_v10  ;;  %v4194_v40 = vadd.f32 %v3831_v36, %v3956_v17  ;;  %v4198_v2 = vadd.f32 %v3831_v36, %v3960_v44  ;;  %v4202_v1 = vadd.f32 %v3831_v36, %v3966_v47  ;;  %v5021_v10 = vld [vmem:[#allocation21_spill] sm:$0xff] }
 0x1d2   :  { %v4206_v6 = vadd.f32 %v3831_v36, %v5020_v5  ;;  %v1064_v49 = vmax.f32 %v904_v33, %v952_v59  ;;  %v1080_v14 = vmax.f32 %v1000_v16, %v1048_v61  ;;  %v1033_v32 = vadd.f32 %v3831_v36, %v5021_v10  ;;  %v5025_v59 = vld [vmem:[#allocation27_spill] sm:$0xff] }
 0x1d3   :  { %v4212_v17 = vadd.f32 %v3831_v36, %v5022_v38  ;;  %v4216_v44 = vadd.f32 %v3831_v36, %v5023_v21  ;;  %v4220_v47 = vadd.f32 %v3831_v36, %v5024_v37  ;;  %v4224_v5 = vadd.f32 %v3831_v36, %v4010_v23 }
 0x1d4   :  { %v4228_v33 = vadd.f32 %v3831_v36, %v4014_v18  ;;  %v4232_v38 = vadd.f32 %v3831_v36, %v5025_v59  ;;  %v4234_v16 = vmax.f32 %v1064_v49, %v1080_v14  ;;  %v905_v21 = vmax.f32 %v4059_v8, 0.0 }
 0x1d5   :  { %v915_v8 = vmax.f32 %v4029_v41, 0.0  ;;  %v916_v59 = vmax.f32 %v4032_v54, 0.0  ;;  %v917_v37 = vmax.f32 %v4037_v48, 0.0  ;;  %v918_v10 = vmax.f32 %v4040_v34, 0.0 }
 0x1d6   :  { %1515 = vrot.lane.b32.xlu0 %v4234_v16, %s3077_s26  ;;  %v953_v23 = vmax.f32 %v4112_v22, 0.0  ;;  %v955_v18 = vmax.f32 %v4116_v63, 0.0  ;;  %v957_v49 = vmax.f32 %v4148_v62, 0.0  ;;  %v963_v61 = vmax.f32 %v4074_v24, 0.0 }
 0x1d7   :  { %v964_v22 = vmax.f32 %v4077_v58, 0.0  ;;  %v965_v63 = vmax.f32 %v4084_v43, 0.0  ;;  %v966_v36 = vmax.f32 %v4087_v55, 0.0  ;;  %v1001_v62 = vmax.f32 %v4164_v42, 0.0 }
 0x1d8   :  { %v1003_v41 = vmax.f32 %v4186_v50, 0.0  ;;  %v1004_v54 = vmax.f32 %v4190_v46, 0.0  ;;  %v1049_v0 = vmax.f32 %v1033_v32, 0.0  ;;  %v1005_v48 = vmax.f32 %v4194_v40, 0.0 }
 0x1d9   :  { %v1006_v34 = vmax.f32 %v4198_v2, 0.0  ;;  %v1007_v24 = vmax.f32 %v4202_v1, 0.0  ;;  %v1008_v58 = vmax.f32 %v4206_v6, 0.0  ;;  %v1009_v43 = vmax.f32 %v4119_v4, 0.0 }
 0x1da   :  { %v1011_v55 = vmax.f32 %v4125_v27, 0.0  ;;  %v1012_v42 = vmax.f32 %v4128_v30, 0.0  ;;  %v1013_v14 = vmax.f32 %v4131_v9, 0.0  ;;  %v1014_v50 = vmax.f32 %v4136_v39, 0.0 }
 0x1db   :  { %v1051_v46 = vmax.f32 %v4212_v17, 0.0  ;;  %v1065_v32 = vmax.f32 %v905_v21, %v953_v23  ;;  %v1081_v40 = vmax.f32 %v1001_v62, %v1049_v0  ;;  %v1059_v2 = vmax.f32 %v4173_v13, 0.0 }
 0x1dc   :  { %v1060_v1 = vmax.f32 %v4176_v25, 0.0  ;;  %v1061_v6 = vmax.f32 %v4179_v7, 0.0  ;;  %v1112_v52 = vlaneseq  ;;  %v1062_v4 = vmax.f32 %v4182_v19, 0.0 }
 0x1dd   :  { %v4283_v27 = vmax.f32 %v1065_v32, %v1081_v40  ;;  %v1466_v30 = vrot.slane %v4234_v16, 1  ;;  %v1075_v9 = vmax.f32 %v915_v8, %v963_v61  ;;  %v1076_v39 = vmax.f32 %v916_v59, %v964_v22 }
 0x1de   :  { %v4286_v15 = vshrl.u32 %v1112_v52, 7  ;;  %v1077_v17 = vmax.f32 %v917_v37, %v965_v63  ;;  %v1078_v21 = vmax.f32 %v918_v10, %v966_v36  ;;  %v1010_v0 = vmax.f32 %v4122_v57, 0.0 }
 0x1df   :  { %v1052_v13 = vmax.f32 %v4216_v44, 0.0  ;;  %v1053_v25 = vmax.f32 %v4220_v47, 0.0  ;;  %v1467_v7 = vrot.slane %v4283_v27, 1  ;;  %1517 = vrot.lane.b32.xlu0 %v4283_v27, %s3077_s26  ;;  %v1054_v19 = vmax.f32 %v4224_v5, 0.0 }
 0x1e0   :  { %vm1482_vm3 = vcmp.lt.s32.totalorder %v4286_v15, 7  ;;  %v1091_v52 = vmax.f32 %v1011_v55, %v1059_v2  ;;  %v1092_v61 = vmax.f32 %v1012_v42, %v1060_v1  ;;  %v1093_v37 = vmax.f32 %v1013_v14, %v1061_v6  ;;  %v5029_v55 = vld [vmem:[#allocation36_spill] sm:$0xff] }
 0x1e1   :  { %v1497_v57 = vsel %vm1482_vm3, %v1466_v30, %v1467_v7  ;;  %v1094_v44 = vmax.f32 %v1014_v50, %v1062_v4  ;;  %v5026_v47 = vmax.f32 %v4063_v56, 0.0  ;;  %v1055_v23 = vmax.f32 %v4228_v33, 0.0 }
 0x1e2   :  { %v1056_v36 = vmax.f32 %v4232_v38, 0.0  ;;  %v1057_v5 = vmax.f32 %v4167_v3, 0.0  ;;  %1563 = vrot.lane.b32.xlu1 %v1497_v57, %s3078_s27  ;;  %v1083_v8 = vmax.f32 %v1003_v41, %v1051_v46  ;;  %v5027_v59 = vmax.f32 %v4094_v29, 0.0  ;;  %v5028_v38 = vld [vmem:[#allocation33_spill] sm:$0xff] }
 0x1e3   :  { %v1067_v10 = vmax.f32 %v5026_v47, %v955_v18  ;;  %v4308_v63 = vmax.f32 %v1075_v9, %v1091_v52  ;;  %v4310_v14 = vmax.f32 %v1076_v39, %v1092_v61  ;;  %v4312_v62 = vmax.f32 %v1077_v17, %v1093_v37 }
 0x1e4   :  { %v1069_v22 = vmax.f32 %v5027_v59, %v957_v49  ;;  %v1085_v56 = vmax.f32 %v1005_v48, %v1053_v25  ;;  %v4316_v33 = vmax.f32 %v1078_v21, %v1094_v44  ;;  %v1468_v3 = vrot.slane %v5028_v38, 1 }
 0x1e5   :  { %v4314_v18 = vmax.f32 %v1067_v10, %v1083_v8  ;;  %v1058_v42 = vmax.f32 %v5029_v55, 0.0  ;;  %v5030_v41 = vmax.f32 %v4152_v60, 0.0  ;;  %v5031_v29 = vmax.f32 %v4098_v51, 0.0  ;;  %v5036_v51 = vld [vmem:[#allocation35_spill] sm:$0xff] }
 0x1e6   :  { %v5032_v50 = vmax.f32 %v4144_v28, 0.0  ;;  %v5033_v46 = vmax.f32 %v4081_v53, 0.0  ;;  %v1084_v40 = vmax.f32 %v1004_v54, %v1052_v13  ;;  %v1086_v48 = vmax.f32 %v1006_v34, %v1054_v19  ;;  %v5046_v8 = vld [vmem:[#allocation31_spill] sm:$0xff] }
 0x1e7   :  { %v1070_v49 = vmax.f32 %v5031_v29, %v5030_v41  ;;  %1521 = vrot.lane.b32.xlu2 %v4314_v18, %s3077_s26  ;;  %v1469_v2 = vrot.slane %v4314_v18, 1  ;;  %v5034_v1 = vmax.f32 %v4068_v20, 0.0  ;;  %v5035_v6 = vmax.f32 %v4023_v11, 0.0 }
 0x1e8   :  { %v1068_v32 = vmax.f32 %v5033_v46, %v5032_v50  ;;  %v1089_v4 = vmax.f32 %v1009_v43, %v1057_v5  ;;  %v1015_v9 = vmax.f32 %v5036_v51, 0.0  ;;  %v5037_v28 = vmax.f32 %v4156_v26, 0.0 }
 0x1e9   :  { %v1073_v60 = vmax.f32 %v5035_v6, %v5034_v1  ;;  %v5038_v53 = vmax.f32 %v4102_v45, 0.0  ;;  %v5039_v54 = vmax.f32 %v4160_v35, 0.0  ;;  %v5040_v34 = vmax.f32 %v4106_v31, 0.0  ;;  %v5042_v31 = vld [vmem:[#allocation29_spill] sm:$0xff] }
 0x1ea   :  { %v1087_v21 = vmax.f32 %v1007_v24, %v1055_v23  ;;  %v1088_v13 = vmax.f32 %v1008_v58, %v1056_v36  ;;  %v4344_v25 = vmax.f32 %v1069_v22, %v1085_v56  ;;  %v1495_v11 = vsel %vm1482_vm3, %v1468_v3, %v1469_v2  ;;  %v5044_v36 = vld [vmem:[#allocation34_spill] sm:$0xff]  ;;  %v5048_v56 = vld [vmem:[#allocation17_spill] sm:$0xff] }
 0x1eb   :  { %v1071_v39 = vmax.f32 %v5038_v53, %v5037_v28  ;;  %v1072_v17 = vmax.f32 %v5040_v34, %v5039_v54  ;;  %v4348_v20 = vmax.f32 %v1073_v60, %v1089_v4  ;;  %v1496_v26 = vsel %vm1482_vm3, %v1467_v7, %v1468_v3  ;;  %1567 = vrot.lane.b32.xlu0 %v1495_v11, %s3078_s27 }
 0x1ec   :  { %v4352_v43 = vmax.f32 %v1068_v32, %v1084_v40  ;;  %v5041_v45 = vmax.f32 %v4071_v12, 0.0  ;;  %v5043_v35 = vmax.f32 %v5042_v31, 0.0  ;;  %v1090_v58 = vmax.f32 %v1010_v0, %v1058_v42  ;;  %1565 = vrot.lane.b32.xlu1 %v1496_v26, %s3078_s27 }
 0x1ed   :  { %v4359_v19 = vmax.f32 %v1070_v49, %v1086_v48  ;;  %v1477_v52 = vrot.slane %v4308_v63, 1  ;;  %v1478_v61 = vrot.slane %v4310_v14, 1  ;;  %v4364_v57 = vmax.f32 %v1071_v39, %v1087_v21 }
 0x1ee   :  { %v1074_v24 = vmax.f32 %v5043_v35, %v5041_v45  ;;  %v1475_v37 = vrot.slane %v4348_v20, 1  ;;  %v4369_v44 = vmax.f32 %v1072_v17, %v1088_v13  ;;  %v1471_v12 = vrot.slane %v4344_v25, 1 }
 0x1ef   :  { %v4374_v0 = vsel %vm1482_vm3, %v1477_v52, %v1478_v61  ;;  %v1479_v47 = vrot.slane %v4312_v62, 1  ;;  %v1470_v10 = vrot.slane %v4352_v43, 1  ;;  %v5045_v5 = vmax.f32 %v5044_v36, 0.0  ;;  %1523 = vrot.lane.b32.xlu2 %v4352_v43, %s3077_s26 }
 0x1f0   :  { %v4366_v7 = vmax.f32 %v1074_v24, %v1090_v58  ;;  %v5047_v59 = vmax.f32 %v5046_v8, 0.0  ;;  %v5049_v3 = vmax.f32 %v5048_v56, 0.0  ;;  %v1472_v42 = vrot.slane %v4359_v19, 1 }
 0x1f1   :  { %v4390_v41 = vsel %vm1482_vm3, %v1478_v61, %v1479_v47  ;;  %v1480_v29 = vrot.slane %v4316_v33, 1  ;;  %vm1433_vm4 = vcmp.lt.s32.totalorder %v4286_v15, 1  ;;  %v1418_v32 = vrot.slane %v4283_v27, 7 }
 0x1f2   :  { %v1476_v23 = vrot.slane %v4366_v7, 1  ;;  %v1079_v22 = vmax.f32 %v5047_v59, %v5045_v5  ;;  %v1095_v55 = vmax.f32 %v1015_v9, %v5049_v3  ;;  %v1120_v40 = vadd.s32 56, %v4286_v15 }
 0x1f3   :  { %v4410_v48 = vsel %vm1482_vm3, %v1479_v47, %v1480_v29  ;;  %v1419_v1 = vrot.slane %v5028_v38, 7  ;;  %v1420_v6 = vrot.slane %v4314_v18, 7  ;;  %v1494_v60 = vsel %vm1482_vm3, %v1469_v2, %v1470_v10  ;;  %1525 = vrot.lane.b32.xlu0 %v4344_v25, %s3077_s26 }
 0x1f4   :  { %v4398_v49 = vsel %vm1482_vm3, %v1475_v37, %v1476_v23  ;;  %v4402_v50 = vsel %vm1482_vm3, %v1476_v23, %v1477_v52  ;;  %v4404_v46 = vmax.f32 %v1079_v22, %v1095_v55  ;;  %v1421_v27 = vrot.slane %v4352_v43, 7  ;;  %1569 = vrot.lane.b32.xlu1 %v1494_v60, %s3078_s27 }
 0x1f5   :  { %v4424_v9 = vsel %vm1433_vm4, %v1418_v32, %v1419_v1  ;;  %v4428_v18 = vsel %vm1433_vm4, %v1419_v1, %v1420_v6  ;;  %v1417_v38 = vrot.slane %v4234_v16, 7  ;;  %v1473_v2 = vrot.slane %v4364_v57, 1 }
 0x1f6   :  { %v1481_v4 = vrot.slane %v4404_v46, 1  ;;  %v1432_v51 = vrot.slane %v4404_v46, 7  ;;  %v4444_v39 = vsel %vm1433_vm4, %v1420_v6, %v1421_v27  ;;  %v1492_v54 = vsel %vm1482_vm3, %v1471_v12, %v1472_v42 }
 0x1f7   :  { %v4454_v17 = vsel %vm1433_vm4, %v1417_v38, %v1418_v32  ;;  %v1182_v16 = vand.u32 63, %v1120_v40  ;;  %v1425_v21 = vrot.slane %v4369_v44, 7  ;;  %v1427_v13 = vrot.slane %v4366_v7, 7  ;;  %1573 = vrot.lane.b32.xlu2 %v1492_v54, %s3078_s27 }
 0x1f8   :  { %v4434_v28 = vsel %vm1482_vm3, %v1480_v29, %v1481_v4  ;;  %v4440_v53 = vsel %vm1482_vm3, %v1481_v4, %v1466_v30  ;;  %v4450_v34 = vsel %vm1433_vm4, %v1432_v51, %v1417_v38  ;;  %v1426_v30 = vrot.slane %v4348_v20, 7  ;;  %v2981_v29 = vld [vmem:[%s4828_s2 + $0x38] sm:$0xff] }
 0x1f9   :  { %v1474_v11 = vrot.slane %v4369_v44, 1  ;;  %v1422_v26 = vrot.slane %v4344_v25, 7  ;;  %v1423_v43 = vrot.slane %v4359_v19, 7  ;;  %v1424_v45 = vrot.slane %v4364_v57, 7  ;;  %1683 = vmatpush.bf16.msrb.mxu0 %v2981_v29 }
 0x1fa   :  { %v1493_v31 = vsel %vm1482_vm3, %v1470_v10, %v1471_v12  ;;  %v4468_v35 = vsel %vm1433_vm4, %v1425_v21, %v1426_v30  ;;  %v4472_v24 = vsel %vm1433_vm4, %v1426_v30, %v1427_v13  ;;  %v1431_v58 = vrot.slane %v4316_v33, 7 }
 0x1fb   :  { %v4477_v25 = vsel %vm1433_vm4, %v1421_v27, %v1422_v26  ;;  %v4481_v52 = vsel %vm1433_vm4, %v1422_v26, %v1423_v43  ;;  %v4485_v61 = vsel %vm1433_vm4, %v1423_v43, %v1424_v45  ;;  %v4489_v12 = vsel %vm1433_vm4, %v1424_v45, %v1425_v21  ;;  %1527 = vrot.lane.b32.xlu0 %v4359_v19, %s3077_s26 }
 0x1fc   :  { %vm1376_vm5 = vcmp.ne.s32.totalorder %v1182_v16, 63  ;;  %v4495_v47 = vsel %vm1433_vm4, %v1431_v58, %v1432_v51  ;;  %v1428_v10 = vrot.slane %v4308_v63, 7  ;;  %v1429_v23 = vrot.slane %v4310_v14, 7  ;;  %1571 = vrot.lane.b32.xlu1 %v1493_v31, %s3078_s27 }
 0x1fd   :  { %v1430_v36 = vrot.slane %v4312_v62, 7  ;;  %v3079_v8 = vmov 0.0   ;;  %v1490_v22 = vsel %vm1482_vm3, %v1473_v2, %v1474_v11  ;;  %v1491_v55 = vsel %vm1482_vm3, %v1472_v42, %v1473_v2  ;;  %v2980_v42 = vld [vmem:[%s4828_s2 + $0x30] sm:$0xff] }
 0x1fe   :  { %v4503_v5 = vsel %vm1433_vm4, %v1427_v13, %v1428_v10  ;;  %v4507_v19 = vsel %vm1433_vm4, %v1428_v10, %v1429_v23  ;;  %v2750_v59 = vsel %vm1376_vm5, 1.0, %v3079_v8  ;;  %v1489_v40 = vsel %vm1482_vm3, %v1474_v11, %v1475_v37  ;;  %1684 = vmatpush.bf16.msrb.mxu0 %v2980_v42  ;;  %v2977_v37 = vld [vmem:[%s4828_s2 + $0x18] sm:$0xff] }
 0x1ff   :  { %v4514_v56 = vsel %vm1433_vm4, %v1429_v23, %v1430_v36  ;;  %v4518_v3 = vsel %vm1433_vm4, %v1430_v36, %v1431_v58  ;;  %1575 = vrot.lane.b32.xlu2 %v1491_v55, %s3078_s27  ;;  %v1506_v32 = vmul.f32 %v2750_v59, %v1490_v22 }
 0x203   :  { %1577 = vrot.lane.b32.xlu0 %v1506_v32, %s3078_s27 }
 0x204   :  { %1529 = vrot.lane.b32.xlu1 %v4364_v57, %s3077_s26  ;;  %v2979_v57 = vld [vmem:[%s4828_s2 + $0x28] sm:$0xff] }
 0x205   :  { %1685 = vmatpush.bf16.msrb.mxu0 %v2979_v57 }
 0x207   :  { %1533 = vrot.lane.b32.xlu2 %v4348_v20, %s3077_s26  ;;  %v2978_v20 = vld [vmem:[%s4828_s2 + $0x20] sm:$0xff] }
 0x209   :  { %1686 = vmatpush.bf16.msrb.mxu0 %v2978_v20 }
 0x20b   :  { %1579 = vrot.lane.b32.xlu0 %v1489_v40, %s3078_s27 }
 0x20c   :  { %1531 = vrot.lane.b32.xlu1 %v4369_v44, %s3077_s26  ;;  %v2975_v44 = vld [vmem:[%s4828_s2 + $0x8] sm:$0xff] }
 0x20d   :  { %1687 = vmatpush.bf16.msrb.mxu0 %v2977_v37 }
 0x20f   :  { %1535 = vrot.lane.b32.xlu2 %v4366_v7, %s3077_s26  ;;  %v1128_v7 = vadd.s32 120, %v4286_v15 }
 0x213   :  { %1537 = vrot.lane.b32.xlu0 %v4308_v63, %s3077_s26  ;;  %v2976_v63 = vld [vmem:[%s4828_s2 + $0x10] sm:$0xff] }
 0x214   :  { %1581 = vrot.lane.b32.xlu1 %v4398_v49, %s3078_s27  ;;  %1688 = vmatpush.bf16.msrb.mxu0 %v2976_v63 }
 0x217   :  { %1585 = vrot.lane.b32.xlu2 %v4374_v0, %s3078_s27 }
 0x218   :  { %1689 = vmatpush.bf16.msrb.mxu0 %v2975_v44 }
 0x21b   :  { %1539 = vrot.lane.b32.xlu0 %v4310_v14, %s3077_s26  ;;  %v1238_v14 = vand.u32 63, %v1128_v7 }
 0x21c   :  { %1583 = vrot.lane.b32.xlu1 %v4402_v50, %s3078_s27 }
 0x21d   :  { %vm1384_vm6 = vcmp.ne.s32.totalorder %v1238_v14, 63 }
 0x21f   :  { %1587 = vrot.lane.b32.xlu2 %v4390_v41, %s3078_s27  ;;  %v2974_v41 = vld [vmem:[%s4828_s2] sm:$0xff] }
 0x220   :  { %1690 = vmatpush.bf16.msrb.mxu0 %v2974_v41 }
 0x221   :  { %v1520_v49 = vpop.permute.xlu2 %1519 }
 0x222   :  { %v1549_v21 = vadd.f32 %v1520_v49, %v4424_v9 }
 0x223   :  { %1589 = vrot.lane.b32.xlu0 %v4410_v48, %s3078_s27 }
 0x224   :  { %1541 = vrot.lane.b32.xlu1 %v4312_v62, %s3077_s26  ;;  %v2751_v62 = vsel %vm1384_vm6, 1.0, %v3079_v8 }
 0x225   :  { %v1514_v0 = vmul.f32 %v2751_v62, %v4440_v53 }
 0x227   :  { %1545 = vrot.lane.b32.xlu2 %v4404_v46, %s3077_s26  ;;  %v1133_v46 = vand.u32 63, %v4286_v15 }
 0x229   :  { %vm1321_vm7 = vcmp.ne.s32.totalorder %v1133_v46, 0 }
 0x22a   :  { %v2748_v1 = vsel %vm1321_vm7, 1.0, %v3079_v8 }
 0x22b   :  { %1591 = vrot.lane.b32.xlu0 %v4434_v28, %s3078_s27  ;;  %v1450_v60 = vmul.f32 %v2748_v1, %v4450_v34 }
 0x22c   :  { %1543 = vrot.lane.b32.xlu1 %v4316_v33, %s3077_s26 }
 0x234   :  { %1593 = vrot.lane.b32.xlu1 %v1514_v0, %s3078_s27 }
 0x241   :  { %v1522_v48 = vpop.permute.xlu2 %1521 }
 0x242   :  { %v1550_v30 = vadd.f32 %v1522_v48, %v4428_v18  ;;  %v1121_v18 = vadd.s32 64, %v4286_v15 }
 0x244   :  { %v1189_v40 = vand.u32 63, %v1121_v18 }
 0x246   :  { %vm1329_vm8 = vcmp.ne.s32.totalorder %v1189_v40, 0 }
 0x247   :  { %v2749_v37 = vsel %vm1329_vm8, 1.0, %v3079_v8  ;;  %vm2510_vm8 = vcmask 279552  }
 0x248   :  { %v1516_v50 = vpop.permute.xlu0 %1515  ;;  %v1458_v7 = vmul.f32 %v2749_v37, %v4489_v12 }
 0x249   :  { %v1524_v4 = vpop.permute.xlu2 %1523  ;;  %v1547_v27 = vadd.f32 %v1516_v50, %v1450_v60 }
 0x251   :  { %v1518_v33 = vpop.permute.xlu0 %1517  ;;  %v1574_v16 = vpop.permute.xlu2 %1573 }
 0x252   :  { %v1548_v51 = vadd.f32 %v1518_v33, %v4454_v17  ;;  %v1551_v17 = vadd.f32 %v1524_v4, %v4444_v39 }
 0x254   :  { %v1564_v6 = vpop.permute.xlu1 %1563 }
 0x255   :  { %v1595_v28 = vadd.f32 %v1564_v6, %v1547_v27 }
 0x259   :  { %v1576_v10 = vpop.permute.xlu2 %1575 }
 0x25d   :  { %v1568_v38 = vpop.permute.xlu0 %1567 }
 0x25e   :  { %v1566_v2 = vpop.permute.xlu1 %1565  ;;  %v1597_v26 = vadd.f32 %v1568_v38, %v1549_v21 }
 0x25f   :  { %v1596_v53 = vadd.f32 %v1566_v2, %v1548_v51 }
 0x261   :  { %v1611_v54 = vpack.c.bf16 %v1596_v53, %v1595_v28  ;;  %v1534_v32 = vpop.permute.xlu2 %1533 }
 0x263   :  { %1691 = vmatmul.bf16.vlgmr.msrb.gmra.mxu0 %v1611_v54 }
 0x265   :  { %v1526_v13 = vpop.permute.xlu0 %1525 }
 0x266   :  { %v1570_v11 = vpop.permute.xlu1 %1569  ;;  %v1552_v34 = vadd.f32 %v1526_v13, %v4477_v25 }
 0x267   :  { %v1598_v43 = vadd.f32 %v1570_v11, %v1550_v30 }
 0x268   :  { %v1600_v31 = vadd.f32 %v1574_v16, %v1552_v34 }
 0x269   :  { %v1612_v45 = vpack.c.bf16 %v1598_v43, %v1597_v26  ;;  %v1536_v63 = vpop.permute.xlu2 %1535 }
 0x26a   :  { %v1557_v46 = vadd.f32 %v1536_v63, %v4472_v24 }
 0x26d   :  { %v1528_v58 = vpop.permute.xlu0 %1527 }
 0x26e   :  { %v1572_v23 = vpop.permute.xlu1 %1571  ;;  %v1553_v9 = vadd.f32 %v1528_v58, %v4481_v52  ;;  %v1556_v52 = vadd.f32 %v1534_v32, %v4468_v35 }
 0x26f   :  { %v1599_v36 = vadd.f32 %v1572_v23, %v1551_v17 }
 0x270   :  { %v1601_v25 = vadd.f32 %v1576_v10, %v1553_v9 }
 0x271   :  { %v1613_v59 = vpack.c.bf16 %v1600_v31, %v1599_v36  ;;  %v1586_v50 = vpop.permute.xlu2 %1585 }
 0x273   :  { %1696 = vmatmul.bf16.gmra.mxu0 %v1612_v45 }
 0x275   :  { %v1578_v22 = vpop.permute.xlu0 %1577 }
 0x276   :  { %v1530_v55 = vpop.permute.xlu1 %1529 }
 0x277   :  { %v1554_v29 = vadd.f32 %v1530_v55, %v4485_v61 }
 0x279   :  { %v1602_v42 = vadd.f32 %v1578_v22, %v1554_v29  ;;  %v1588_v51 = vpop.permute.xlu2 %1587 }
 0x27b   :  { %v1614_v39 = vpack.c.bf16 %v1602_v42, %v1601_v25 }
 0x27d   :  { %v1580_v57 = vpop.permute.xlu0 %1579 }
 0x27e   :  { %v1532_v20 = vpop.permute.xlu1 %1531 }
 0x27f   :  { %v1555_v14 = vadd.f32 %v1532_v20, %v1458_v7 }
 0x281   :  { %v1603_v61 = vadd.f32 %v1580_v57, %v1555_v14  ;;  %v1546_v53 = vpop.permute.xlu2 %1545 }
 0x282   :  { %v1562_v54 = vadd.f32 %v1546_v53, %v4495_v47 }
 0x283   :  { %1701 = vmatmul.bf16.gmra.mxu0 %v1613_v59 }
 0x285   :  { %v1538_v44 = vpop.permute.xlu0 %1537 }
 0x286   :  { %v1582_v62 = vpop.permute.xlu1 %1581  ;;  %v1558_v41 = vadd.f32 %v1538_v44, %v4503_v5 }
 0x287   :  { %v1604_v0 = vadd.f32 %v1582_v62, %v1556_v52 }
 0x288   :  { %v1606_v48 = vadd.f32 %v1586_v50, %v1558_v41 }
 0x289   :  { %v1615_v49 = vpack.c.bf16 %v1604_v0, %v1603_v61 }
 0x28d   :  { %v1540_v33 = vpop.permute.xlu0 %1539 }
 0x28e   :  { %v1584_v1 = vpop.permute.xlu1 %1583  ;;  %v1559_v12 = vadd.f32 %v1540_v33, %v4507_v19 }
 0x28f   :  { %v1605_v6 = vadd.f32 %v1584_v1, %v1557_v46 }
 0x290   :  { %v1607_v38 = vadd.f32 %v1588_v51, %v1559_v12 }
 0x291   :  { %v1616_v60 = vpack.c.bf16 %v1606_v48, %v1605_v6 }
 0x293   :  { %1706 = vmatmul.bf16.gmra.mxu0 %v1614_v39 }
 0x295   :  { %v1590_v4 = vpop.permute.xlu0 %1589 }
 0x296   :  { %v1542_v35 = vpop.permute.xlu1 %1541 }
 0x297   :  { %v1560_v27 = vadd.f32 %v1542_v35, %v4514_v56 }
 0x299   :  { %v1608_v2 = vadd.f32 %v1590_v4, %v1560_v27 }
 0x29b   :  { %v1617_v5 = vpack.c.bf16 %v1608_v2, %v1607_v38 }
 0x29d   :  { %v1592_v24 = vpop.permute.xlu0 %1591 }
 0x29e   :  { %v1544_v28 = vpop.permute.xlu1 %1543 }
 0x29f   :  { %v1561_v16 = vadd.f32 %v1544_v28, %v4518_v3 }
 0x2a1   :  { %v1609_v30 = vadd.f32 %v1592_v24, %v1561_v16 }
 0x2a3   :  { %1711 = vmatmul.bf16.gmra.mxu0 %v1615_v49 }
 0x2a6   :  { %v1594_v21 = vpop.permute.xlu1 %1593 }
 0x2a7   :  { %v1610_v13 = vadd.f32 %v1594_v21, %v1562_v54 }
 0x2a9   :  { %v1618_v19 = vpack.c.bf16 %v1610_v13, %v1609_v30 }
 0x2b3   :  { %1716 = vmatmul.bf16.gmra.mxu0 %v1616_v60 }
 0x2c3   :  { %1721 = vmatmul.bf16.gmra.mxu0 %v1617_v5 }
 0x2d3   :  { %1726 = vmatmul.bf16.gmra.mxu0 %v1618_v19 }
 0x2e0   :  { %v1692_v56 = vpop.f32.mrf.mxu0 }
 0x2e8   :  { %v1694_v11 = vpop.f32.mrf.mxu0 }
 0x2e9   :  { %v1732_v3 = vadd.f32 %v1694_v11, %v1692_v56 }
 0x2f0   :  { %v1697_v26 = vpop.f32.mrf.mxu0 }
 0x2f1   :  { %v1733_v36 = vadd.f32 %v1732_v3, %v1697_v26 }
 0x2f8   :  { %v1699_v43 = vpop.f32.mrf.mxu0 }
 0x2f9   :  { %v1734_v9 = vadd.f32 %v1733_v36, %v1699_v43 }
 0x300   :  { %v1702_v34 = vpop.f32.mrf.mxu0 }
 0x301   :  { %v1735_v22 = vadd.f32 %v1734_v9, %v1702_v34 }
 0x308   :  { %v1704_v45 = vpop.f32.mrf.mxu0 }
 0x309   :  { %v1736_v18 = vadd.f32 %v1735_v22, %v1704_v45 }
 0x310   :  { %v1707_v17 = vpop.f32.mrf.mxu0 }
 0x311   :  { %v1737_v55 = vadd.f32 %v1736_v18, %v1707_v17 }
 0x318   :  { %v1709_v31 = vpop.f32.mrf.mxu0 }
 0x319   :  { %v1738_v32 = vadd.f32 %v1737_v55, %v1709_v31 }
 0x320   :  { %v1712_v58 = vpop.f32.mrf.mxu0 }
 0x321   :  { %v1739_v25 = vadd.f32 %v1738_v32, %v1712_v58 }
 0x328   :  { %v1714_v10 = vpop.f32.mrf.mxu0 }
 0x329   :  { %v1740_v42 = vadd.f32 %v1739_v25, %v1714_v10 }
 0x330   :  { %v1717_v47 = vpop.f32.mrf.mxu0 }
 0x331   :  { %v1741_v40 = vadd.f32 %v1740_v42, %v1717_v47 }
 0x338   :  { %v1719_v23 = vpop.f32.mrf.mxu0 }
 0x339   :  { %v1742_v57 = vadd.f32 %v1741_v40, %v1719_v23 }
 0x340   :  { %v1722_v59 = vpop.f32.mrf.mxu0 }
 0x341   :  { %v1743_v20 = vadd.f32 %v1742_v57, %v1722_v59 }
 0x348   :  { %v1724_v29 = vpop.f32.mrf.mxu0 }
 0x349   :  { %v1744_v37 = vadd.f32 %v1743_v20, %v1724_v29 }
 0x350   :  { %v1727_v39 = vpop.f32.mrf.mxu0 }
 0x351   :  { %v1745_v63 = vadd.f32 %v1744_v37, %v1727_v39 }
 0x358   :  { %v1729_v7 = vpop.f32.mrf.mxu0 }
 0x359   :  { %v1746_v52 = vadd.f32 %v1745_v63, %v1729_v7 }
 0x35b   :  { %v1747_v14 = vrot.slane %v1746_v52, 4 }
 0x35d   :  { %v1748_v44 = vadd.f32 %v1747_v14, %v1746_v52 }
 0x35f   :  { %v1749_v62 = vrot.slane %v1748_v44, 2 }
 0x361   :  { %v1750_v61 = vadd.f32 %v1749_v62, %v1748_v44 }
 0x363   :  { %v1751_v0 = vrot.slane %v1750_v61, 1 }
 0x365   :  { %v1752_v41 = vadd.f32 %v1751_v0, %v1750_v61 }
 0x367   :  { %v1753_v49 = vmul.f32 0.0078125, %v1752_v41 }
 0x369   :  { %v4607_v50 = vsub.f32 %v1692_v56, %v1753_v49  ;;  %v4609_v46 = vsub.f32 %v1694_v11, %v1753_v49  ;;  %v4611_v48 = vsub.f32 %v1697_v26, %v1753_v49  ;;  %v4617_v6 = vsub.f32 %v1699_v43, %v1753_v49 }
 0x36a   :  { %v4619_v60 = vsub.f32 %v1702_v34, %v1753_v49  ;;  %v4623_v4 = vsub.f32 %v1704_v45, %v1753_v49  ;;  %v4627_v38 = vsub.f32 %v1707_v17, %v1753_v49  ;;  %v4631_v28 = vsub.f32 %v1709_v31, %v1753_v49 }
 0x36b   :  { %v1770_v33 = vmul.f32 %v4607_v50, %v4607_v50  ;;  %v1771_v1 = vmul.f32 %v4609_v46, %v4609_v46  ;;  %v1772_v12 = vmul.f32 %v4611_v48, %v4611_v48  ;;  %v1773_v27 = vmul.f32 %v4617_v6, %v4617_v6 }
 0x36c   :  { %v1774_v2 = vmul.f32 %v4619_v60, %v4619_v60  ;;  %v1775_v53 = vmul.f32 %v4623_v4, %v4623_v4  ;;  %v1762_v54 = vsub.f32 %v1712_v58, %v1753_v49  ;;  %v1776_v16 = vmul.f32 %v4627_v38, %v4627_v38 }
 0x36d   :  { %v1786_v35 = vadd.f32 %v1771_v1, %v1770_v33  ;;  %v1763_v30 = vsub.f32 %v1714_v10, %v1753_v49  ;;  %v1777_v13 = vmul.f32 %v4631_v28, %v4631_v28  ;;  %v1764_v56 = vsub.f32 %v1717_v47, %v1753_v49  ;;  %v2989_v33 = vld [vmem:[%s4829_s3 + $0x38] sm:$0xff] }
 0x36e   :  { %v1778_v11 = vmul.f32 %v1762_v54, %v1762_v54  ;;  %v1765_v43 = vsub.f32 %v1719_v23, %v1753_v49  ;;  %v4639_v17 = vsub.f32 %v1722_v59, %v1753_v49  ;;  %v4641_v58 = vsub.f32 %v1724_v29, %v1753_v49  ;;  %2117 = vmatpush.bf16.msrb.mxu1 %v2989_v33 }
 0x36f   :  { %v1787_v51 = vadd.f32 %v1786_v35, %v1772_v12  ;;  %v1779_v34 = vmul.f32 %v1763_v30, %v1763_v30  ;;  %v1780_v31 = vmul.f32 %v1764_v56, %v1764_v56  ;;  %v4643_v22 = vsub.f32 %v1727_v39, %v1753_v49 }
 0x370   :  { %v1781_v36 = vmul.f32 %v1765_v43, %v1765_v43  ;;  %v1782_v10 = vmul.f32 %v4639_v17, %v4639_v17  ;;  %v4647_v47 = vsub.f32 %v1729_v7, %v1753_v49  ;;  %v1783_v23 = vmul.f32 %v4641_v58, %v4641_v58  ;;  %v1819_v49 = vld [vmem:[%s4831_s5 + $0x1] sm:$0x1] }
 0x371   :  { %v1788_v5 = vadd.f32 %v1787_v51, %v1773_v27  ;;  %v1784_v59 = vmul.f32 %v4643_v22, %v4643_v22 }
 0x372   :  { %v1785_v29 = vmul.f32 %v4647_v47, %v4647_v47 }
 0x373   :  { %v1789_v24 = vadd.f32 %v1788_v5, %v1774_v2  ;;  %v3035_v5 = vld [vmem:[%s4832_s6 + $0x1] ss:$0 sm:$0xff] }
 0x375   :  { %v1790_v21 = vadd.f32 %v1789_v24, %v1775_v53 }
 0x377   :  { %v1791_v19 = vadd.f32 %v1790_v21, %v1776_v16 }
 0x379   :  { %v1792_v26 = vadd.f32 %v1791_v19, %v1777_v13 }
 0x37b   :  { %v1793_v45 = vadd.f32 %v1792_v26, %v1778_v11 }
 0x37d   :  { %v1794_v3 = vadd.f32 %v1793_v45, %v1779_v34 }
 0x37f   :  { %v1795_v9 = vadd.f32 %v1794_v3, %v1780_v31 }
 0x381   :  { %v1796_v18 = vadd.f32 %v1795_v9, %v1781_v36 }
 0x383   :  { %v1797_v55 = vadd.f32 %v1796_v18, %v1782_v10 }
 0x385   :  { %v1798_v32 = vadd.f32 %v1797_v55, %v1783_v23 }
 0x387   :  { %v1799_v25 = vadd.f32 %v1798_v32, %v1784_v59 }
 0x389   :  { %v1800_v42 = vadd.f32 %v1799_v25, %v1785_v29 }
 0x38b   :  { %v1801_v40 = vrot.slane %v1800_v42, 4 }
 0x38d   :  { %v1802_v39 = vadd.f32 %v1801_v40, %v1800_v42 }
 0x38f   :  { %v1803_v57 = vrot.slane %v1802_v39, 2 }
 0x391   :  { %v1804_v20 = vadd.f32 %v1803_v57, %v1802_v39 }
 0x393   :  { %v1805_v37 = vrot.slane %v1804_v20, 1 }
 0x395   :  { %v1806_v63 = vadd.f32 %v1805_v37, %v1804_v20  ;;  %v2986_v37 = vld [vmem:[%s4829_s3 + $0x20] sm:$0xff] }
 0x397   :  { %v1807_v7 = vmul.f32 0.0078125, %v1806_v63 }
 0x399   :  { %v1808_v52 = vadd.f32 1e-05, %v1807_v7 }
 0x39b   :  { %3041 = vrsqrt.f32 %v1808_v52  ;;  %vm1815_vm10 = vweird.f32 %v1808_v52 }
 0x3a1   :  { %v3042_v14 = vpop.eup %3041 }
 0x3a2   :  { %v1810_v44 = vmul.f32 %v3042_v14, %v1808_v52  ;;  %vm1816_vm9 = vweird.f32 %v3042_v14 }
 0x3a3   :  { %vm1817_vm11 = vmor %vm1815_vm10, %vm1816_vm9 }
 0x3a4   :  { %v1811_v62 = vmul.f32 %v3042_v14, %v1810_v44 }
 0x3a6   :  { %v1812_v61 = vmul.f32 0.5, %v1811_v62 }
 0x3a8   :  { %v1813_v0 = vsub.f32 1.5, %v1812_v61 }
 0x3aa   :  { %v1814_v41 = vmul.f32 %v3042_v14, %v1813_v0 }
 0x3ac   :  { %v1818_v1 = vsel %vm1817_vm11, %v3042_v14, %v1814_v41 }
 0x3ad   :  { %v1820_v12 = vmul.f32 %v1819_v49, %v1818_v1  ;;  %v2985_v49 = vld [vmem:[%s4829_s3 + $0x18] sm:$0xff]  ;;  %v1114_v1 = vadd.s32 8, %v4286_v15 }
 0x3af   :  { %v1821_v35 = vperm.slane %v1820_v12, 0 }
 0x3b1   :  { %v1822_v27 = vmul.f32 %v1821_v35, %v4607_v50  ;;  %v1823_v51 = vmul.f32 %v1821_v35, %v4609_v46  ;;  %v1824_v2 = vmul.f32 %v1821_v35, %v4611_v48  ;;  %v1825_v53 = vmul.f32 %v1821_v35, %v4617_v6  ;;  %v2988_v6 = vld [vmem:[%s4829_s3 + $0x30] sm:$0xff] }
 0x3b2   :  { %v1826_v24 = vmul.f32 %v1821_v35, %v4619_v60  ;;  %v1830_v16 = vmul.f32 %v1821_v35, %v1762_v54  ;;  %v1831_v21 = vmul.f32 %v1821_v35, %v1763_v30  ;;  %v1832_v13 = vmul.f32 %v1821_v35, %v1764_v56  ;;  %2118 = vmatpush.bf16.msrb.mxu1 %v2988_v6 }
 0x3b3   :  { %v1833_v19 = vmul.f32 %v1821_v35, %v1765_v43  ;;  %v1827_v11 = vmul.f32 %v1821_v35, %v4623_v4  ;;  %v1828_v50 = vmul.f32 %v1821_v35, %v4627_v38  ;;  %v1840_v26 = vadd.f32 %v3035_v5, %v1822_v27 }
 0x3b4   :  { %v1841_v46 = vadd.f32 %v3035_v5, %v1823_v51  ;;  %v1842_v34 = vadd.f32 %v3035_v5, %v1824_v2  ;;  %v1829_v48 = vmul.f32 %v1821_v35, %v4631_v28  ;;  %v1843_v45 = vadd.f32 %v3035_v5, %v1825_v53  ;;  %v2984_v53 = vld [vmem:[%s4829_s3 + $0x10] sm:$0xff] }
 0x3b5   :  { %v1844_v31 = vadd.f32 %v3035_v5, %v1826_v24  ;;  %v1845_v3 = vadd.f32 %v3035_v5, %v1827_v11  ;;  %v1846_v60 = vadd.f32 %v3035_v5, %v1828_v50  ;;  %v1856_v54 = vmax.f32 %v1840_v26, 0.0 }
 0x3b6   :  { %v1857_v30 = vmax.f32 %v1841_v46, 0.0  ;;  %v1858_v56 = vmax.f32 %v1842_v34, 0.0  ;;  %v1847_v43 = vadd.f32 %v3035_v5, %v1829_v48  ;;  %v1859_v4 = vmax.f32 %v1843_v45, 0.0  ;;  %v2983_v45 = vld [vmem:[%s4829_s3 + $0x8] sm:$0xff] }
 0x3b7   :  { %v1834_v38 = vmul.f32 %v1821_v35, %v4639_v17  ;;  %v1848_v36 = vadd.f32 %v3035_v5, %v1830_v16  ;;  %v1860_v9 = vmax.f32 %v1844_v31, 0.0  ;;  %1872 = vst [vmem:[#allocation2] sm:$0xff] %v1856_v54  ;;  %v1835_v28 = vmul.f32 %v1821_v35, %v4641_v58  ;;  %v2987_v58 = vld [vmem:[%s4829_s3 + $0x28] sm:$0xff] }
 0x3b8   :  { %v1836_v10 = vmul.f32 %v1821_v35, %v4643_v22  ;;  %v1849_v18 = vadd.f32 %v3035_v5, %v1831_v21  ;;  %v1861_v23 = vmax.f32 %v1845_v3, 0.0  ;;  %1873 = vst [vmem:[#allocation2 + $0x8] sm:$0xff] %v1857_v30  ;;  %v1837_v55 = vmul.f32 %v1821_v35, %v4647_v47  ;;  %2119 = vmatpush.bf16.msrb.mxu1 %v2987_v58 }
 0x3b9   :  { %v1850_v59 = vadd.f32 %v3035_v5, %v1832_v13  ;;  %v1862_v32 = vmax.f32 %v1846_v60, 0.0  ;;  %1874 = vst [vmem:[#allocation2 + $0x10] sm:$0xff] %v1858_v56  ;;  %v1851_v29 = vadd.f32 %v3035_v5, %v1833_v19  ;;  %v1863_v25 = vmax.f32 %v1847_v43, 0.0 }
 0x3ba   :  { %1875 = vst [vmem:[#allocation2 + $0x18] sm:$0xff] %v1859_v4  ;;  %v1852_v42 = vadd.f32 %v3035_v5, %v1834_v38  ;;  %v1864_v17 = vmax.f32 %v1848_v36, 0.0  ;;  %v1853_v40 = vadd.f32 %v3035_v5, %v1835_v28  ;;  %v1854_v39 = vadd.f32 %v3035_v5, %v1836_v10 }
 0x3bb   :  { %1876 = vst [vmem:[#allocation2 + $0x20] sm:$0xff] %v1860_v9  ;;  %v1865_v57 = vmax.f32 %v1849_v18, 0.0  ;;  %v1855_v22 = vadd.f32 %v3035_v5, %v1837_v55  ;;  %v1866_v20 = vmax.f32 %v1850_v59, 0.0  ;;  %v1867_v47 = vmax.f32 %v1851_v29, 0.0 }
 0x3bc   :  { %1877 = vst [vmem:[#allocation2 + $0x28] sm:$0xff] %v1861_v23  ;;  %v1868_v63 = vmax.f32 %v1852_v42, 0.0  ;;  %v1869_v7 = vmax.f32 %v1853_v40, 0.0  ;;  %v1870_v52 = vmax.f32 %v1854_v39, 0.0  ;;  %2120 = vmatpush.bf16.msrb.mxu1 %v2986_v37  ;;  %v1942_v21 = vand.u32 15, %v1114_v1 }
 0x3bd   :  { %1878 = vst [vmem:[#allocation2 + $0x30] sm:$0xff] %v1862_v32  ;;  %v1871_v14 = vmax.f32 %v1855_v22, 0.0  ;;  %v1116_v48 = vadd.s32 24, %v4286_v15 }
 0x3be   :  { %1879 = vst [vmem:[#allocation2 + $0x38] sm:$0xff] %v1863_v25  ;;  %vm1992_vm12 = vcmp.ne.s32.totalorder %v1942_v21, 15 }
 0x3bf   :  { %1880 = vst [vmem:[#allocation2 + $0x40] sm:$0xff] %v1864_v17  ;;  %v1956_v9 = vand.u32 15, %v1116_v48  ;;  %v2786_v10 = vsel %vm1992_vm12, 1.0, %v3079_v8 }
 0x3c0   :  { %1881 = vst [vmem:[#allocation2 + $0x48] sm:$0xff] %v1865_v57  ;;  %2121 = vmatpush.bf16.msrb.mxu1 %v2985_v49 }
 0x3c1   :  { %1882 = vst [vmem:[#allocation2 + $0x50] sm:$0xff] %v1866_v20  ;;  %v1888_v44 = vld [vmem:[#allocation2] ss:$4 sm:$0xff]  ;;  %v1896_v62 = vld [vmem:[#allocation2 + $0x1] ss:$4 sm:$0xff]  ;;  %vm1994_vm13 = vcmp.ne.s32.totalorder %v1956_v9, 15 }
 0x3c2   :  { %1883 = vst [vmem:[#allocation2 + $0x58] sm:$0xff] %v1867_v47  ;;  %v1904_v61 = vld [vmem:[#allocation2 + $0x2] ss:$4 sm:$0xff]  ;;  %v1912_v0 = vld [vmem:[#allocation2 + $0x3] ss:$4 sm:$0xff]  ;;  %v1919_v41 = vmax.f32 %v1888_v44, %v1896_v62  ;;  %v2787_v39 = vsel %vm1994_vm13, 1.0, %v3079_v8 }
 0x3c3   :  { %1884 = vst [vmem:[#allocation2 + $0x60] sm:$0xff] %v1868_v63  ;;  %v1923_v33 = vmax.f32 %v1904_v61, %v1912_v0  ;;  %v2982_v20 = vld [vmem:[%s4829_s3] sm:$0xff]  ;;  %v1935_v47 = vand.u32 15, %v4286_v15 }
 0x3c4   :  { %1885 = vst [vmem:[#allocation2 + $0x68] sm:$0xff] %v1869_v7  ;;  %2122 = vmatpush.bf16.msrb.mxu1 %v2984_v53  ;;  %v1115_v7 = vadd.s32 16, %v4286_v15 }
 0x3c5   :  { %1886 = vst [vmem:[#allocation2 + $0x70] sm:$0xff] %v1870_v52  ;;  %v1890_v12 = vld [vmem:[#allocation2 + $0x20] ss:$4 sm:$0xff]  ;;  %v1898_v35 = vld [vmem:[#allocation2 + $0x21] ss:$4 sm:$0xff]  ;;  %v1927_v27 = vmax.f32 %v1919_v41, %v1923_v33  ;;  %vm1979_vm14 = vcmp.ne.s32.totalorder %v1935_v47, 0 }
 0x3c6   :  { %1887 = vst [vmem:[#allocation2 + $0x78] sm:$0xff] %v1871_v14  ;;  %v1906_v51 = vld [vmem:[#allocation2 + $0x22] ss:$4 sm:$0xff]  ;;  %v1914_v2 = vld [vmem:[#allocation2 + $0x23] ss:$4 sm:$0xff]  ;;  %v1920_v5 = vmax.f32 %v1890_v12, %v1898_v35  ;;  %v2784_v63 = vsel %vm1979_vm14, 1.0, %v3079_v8 }
 0x3c7   :  { %v1924_v24 = vmax.f32 %v1906_v51, %v1914_v2  ;;  %2027 = vrot.lane.b32.xlu2 %v1927_v27, %s3077_s26  ;;  %v2015_v16 = vrot.slane %v1927_v27, 1  ;;  %v2003_v13 = vrot.slane %v1927_v27, 7  ;;  %v1949_v62 = vand.u32 15, %v1115_v7  ;;  %v3002_v47 = vld [vmem:[%s4830_s4 + $0x60] sm:$0xff] }
 0x3c8   :  { %2123 = vmatpush.bf16.msrb.mxu1 %v2983_v45 }
 0x3c9   :  { %v1928_v19 = vmax.f32 %v1920_v5, %v1924_v24  ;;  %v1892_v11 = vld [vmem:[#allocation2 + $0x40] ss:$4 sm:$0xff]  ;;  %v1900_v50 = vld [vmem:[#allocation2 + $0x41] ss:$4 sm:$0xff]  ;;  %v1908_v26 = vld [vmem:[#allocation2 + $0x42] ss:$4 sm:$0xff] }
 0x3ca   :  { %v1916_v46 = vld [vmem:[#allocation2 + $0x43] ss:$4 sm:$0xff]  ;;  %v1921_v34 = vmax.f32 %v1892_v11, %v1900_v50  ;;  %vm1981_vm15 = vcmp.ne.s32.totalorder %v1949_v62, 0 }
 0x3cb   :  { %2029 = vrot.lane.b32.xlu0 %v1928_v19, %s3077_s26  ;;  %v2016_v31 = vrot.slane %v1928_v19, 1  ;;  %v1925_v3 = vmax.f32 %v1908_v26, %v1916_v46  ;;  %v2004_v6 = vrot.slane %v1928_v19, 7  ;;  %v2785_v12 = vsel %vm1981_vm15, 1.0, %v3079_v8 }
 0x3cc   :  { %2124 = vmatpush.bf16.msrb.mxu1 %v2982_v20  ;;  %v2997_v20 = vld [vmem:[%s4830_s4 + $0x38] sm:$0xff] }
 0x3cd   :  { %v2021_v60 = vsel %vm1482_vm3, %v2015_v16, %v2016_v31  ;;  %v1929_v54 = vmax.f32 %v1921_v34, %v1925_v3  ;;  %v1894_v30 = vld [vmem:[#allocation2 + $0x60] ss:$4 sm:$0xff]  ;;  %v1902_v56 = vld [vmem:[#allocation2 + $0x61] ss:$4 sm:$0xff]  ;;  %v1910_v43 = vld [vmem:[#allocation2 + $0x62] ss:$4 sm:$0xff]  ;;  %v2009_v4 = vsel %vm1433_vm4, %v2003_v13, %v2004_v6  ;;  %2372 = vmatpush.bf16.msra.mxu3 %v2997_v20 }
 0x3ce   :  { %2039 = vrot.lane.b32.xlu1 %v2021_v60, %s3078_s27  ;;  %v1918_v38 = vld [vmem:[#allocation2 + $0x63] ss:$4 sm:$0xff]  ;;  %v1922_v36 = vmax.f32 %v1894_v30, %v1902_v56 }
 0x3cf   :  { %v2017_v28 = vrot.slane %v1929_v54, 1  ;;  %v1926_v18 = vmax.f32 %v1910_v43, %v1918_v38  ;;  %v2005_v23 = vrot.slane %v1929_v54, 7 }
 0x3d1   :  { %v2020_v55 = vsel %vm1482_vm3, %v2016_v31, %v2017_v28  ;;  %v1930_v59 = vmax.f32 %v1922_v36, %v1926_v18  ;;  %v2008_v32 = vsel %vm1433_vm4, %v2004_v6, %v2005_v23 }
 0x3d2   :  { %v2024_v29 = vmul.f32 %v2786_v10, %v2020_v55  ;;  %v2013_v27 = vmul.f32 %v2785_v12, %v2008_v32  ;;  %v2996_v12 = vld [vmem:[%s4830_s4 + $0x30] sm:$0xff] }
 0x3d3   :  { %2031 = vrot.lane.b32.xlu0 %v1929_v54, %s3077_s26  ;;  %v2018_v25 = vrot.slane %v1930_v59, 1  ;;  %v2006_v42 = vrot.slane %v1930_v59, 7  ;;  %2373 = vmatpush.bf16.msra.mxu3 %v2996_v12 }
 0x3d4   :  { %2041 = vrot.lane.b32.xlu2 %v2024_v29, %s3078_s27 }
 0x3d5   :  { %v2010_v17 = vsel %vm1433_vm4, %v2006_v42, %v2003_v13  ;;  %v2007_v40 = vsel %vm1433_vm4, %v2005_v23, %v2006_v42  ;;  %v2022_v57 = vsel %vm1482_vm3, %v2018_v25, %v2015_v16  ;;  %v2019_v22 = vsel %vm1482_vm3, %v2017_v28, %v2018_v25 }
 0x3d6   :  { %2033 = vrot.lane.b32.xlu1 %v1930_v59, %s3077_s26  ;;  %v2026_v58 = vmul.f32 %v2787_v39, %v2022_v57  ;;  %v2011_v52 = vmul.f32 %v2784_v63, %v2010_v17  ;;  %v3005_v17 = vld [vmem:[%s4830_s4 + $0x78] sm:$0xff]  ;;  %v3004_v57 = vld [vmem:[%s4830_s4 + $0x70] sm:$0xff] }
 0x3d7   :  { %2311 = vmatpush.bf16.msra.mxu2 %v3005_v17  ;;  %v3001_v63 = vld [vmem:[%s4830_s4 + $0x58] sm:$0xff] }
 0x3db   :  { %2045 = vrot.lane.b32.xlu0 %v2026_v58, %s3078_s27  ;;  %2312 = vmatpush.bf16.msra.mxu2 %v3004_v57 }
 0x3dc   :  { %2043 = vrot.lane.b32.xlu2 %v2019_v22, %s3078_s27  ;;  %v3003_v22 = vld [vmem:[%s4830_s4 + $0x68] sm:$0xff] }
 0x3df   :  { %2313 = vmatpush.bf16.msra.mxu2 %v3003_v22 }
 0x3e3   :  { %2314 = vmatpush.bf16.msra.mxu2 %v3002_v47 }
 0x3e7   :  { %2315 = vmatpush.bf16.msra.mxu2 %v3001_v63 }
 0x421   :  { %v2028_v37 = vpop.permute.xlu2 %2027 }
 0x422   :  { %v2035_v61 = vadd.f32 %v2028_v37, %v2011_v52 }
 0x42e   :  { %v2042_v0 = vpop.permute.xlu2 %2041 }
 0x436   :  { %v2044_v53 = vpop.permute.xlu2 %2043 }
 0x43d   :  { %v2030_v14 = vpop.permute.xlu0 %2029 }
 0x43e   :  { %v2036_v44 = vadd.f32 %v2030_v14, %v2009_v4  ;;  %v3000_v14 = vld [vmem:[%s4830_s4 + $0x50] sm:$0xff] }
 0x43f   :  { %2316 = vmatpush.bf16.msra.mxu2 %v3000_v14 }
 0x440   :  { %v2048_v41 = vadd.f32 %v2042_v0, %v2036_v44  ;;  %v2040_v49 = vpop.permute.xlu1 %2039 }
 0x441   :  { %v2047_v33 = vadd.f32 %v2040_v49, %v2035_v61  ;;  %v2999_v61 = vld [vmem:[%s4830_s4 + $0x48] sm:$0xff] }
 0x443   :  { %v2051_v1 = vpack.c.bf16 %v2048_v41, %v2047_v33  ;;  %v2175_v41 = vld [vmem:[%s4831_s5 + $0x2] sm:$0x1]  ;;  %2317 = vmatpush.bf16.msra.mxu2 %v2999_v61 }
 0x445   :  { %v2032_v35 = vpop.permute.xlu0 %2031  ;;  %2125 = vmatmul.bf16.vlgmr.msrb.gmra.mxu1 %v2051_v1  ;;  %v2998_v1 = vld [vmem:[%s4830_s4 + $0x40] sm:$0xff] }
 0x446   :  { %v2037_v2 = vadd.f32 %v2032_v35, %v2013_v27  ;;  %v3036_v27 = vld [vmem:[%s4832_s6 + $0x2] ss:$0 sm:$0xff] }
 0x447   :  { %2318 = vmatpush.bf16.msra.mxu2 %v2998_v1  ;;  %v3010_v1 = vld [vmem:[%s4833_s7 + $0x20] sm:$0xff] }
 0x448   :  { %v2034_v51 = vpop.permute.xlu1 %2033  ;;  %v2049_v16 = vadd.f32 %v2044_v53, %v2037_v2 }
 0x449   :  { %v2038_v5 = vadd.f32 %v2034_v51, %v2007_v40  ;;  %v2995_v51 = vld [vmem:[%s4830_s4 + $0x28] sm:$0xff] }
 0x44a   :  { %2374 = vmatpush.bf16.msra.mxu3 %v2995_v51 }
 0x44d   :  { %v2046_v24 = vpop.permute.xlu0 %2045 }
 0x44e   :  { %v2050_v21 = vadd.f32 %v2046_v24, %v2038_v5 }
 0x450   :  { %v2052_v13 = vpack.c.bf16 %v2050_v21, %v2049_v16 }
 0x455   :  { %2130 = vmatmul.bf16.gmra.mxu1 %v2052_v13 }
 0x4c2   :  { %v2126_v19 = vpop.f32.mrf.mxu1 }
 0x4ca   :  { %v2128_v11 = vpop.f32.mrf.mxu1 }
 0x4cb   :  { %v2136_v26 = vadd.f32 %v2128_v11, %v2126_v19 }
 0x4d2   :  { %v2131_v50 = vpop.f32.mrf.mxu1 }
 0x4d3   :  { %v2137_v46 = vadd.f32 %v2136_v26, %v2131_v50 }
 0x4da   :  { %v2133_v34 = vpop.f32.mrf.mxu1 }
 0x4db   :  { %v2138_v48 = vadd.f32 %v2137_v46, %v2133_v34 }
 0x4dd   :  { %v2139_v45 = vrot.slane %v2138_v48, 4 }
 0x4df   :  { %v2140_v31 = vadd.f32 %v2139_v45, %v2138_v48  ;;  %v2993_v48 = vld [vmem:[%s4830_s4 + $0x18] sm:$0xff]  ;;  %v2992_v45 = vld [vmem:[%s4830_s4 + $0x10] sm:$0xff] }
 0x4e1   :  { %v2141_v3 = vrot.slane %v2140_v31, 2 }
 0x4e3   :  { %v2142_v6 = vadd.f32 %v2141_v3, %v2140_v31  ;;  %v2207_v31 = vand.u32 3, %v4286_v15  ;;  %v2991_v3 = vld [vmem:[%s4830_s4 + $0x8] sm:$0xff] }
 0x4e5   :  { %v2143_v60 = vrot.slane %v2142_v6, 1  ;;  %vm2218_vm3 = vcmp.ne.s32.totalorder %v2207_v31, 3  ;;  %vm2215_vm4 = vcmp.ne.s32.totalorder %v2207_v31, 0 }
 0x4e6   :  { %v2821_v15 = vsel %vm2218_vm3, 1.0, %v3079_v8 }
 0x4e7   :  { %v2144_v54 = vadd.f32 %v2143_v60, %v2142_v6 }
 0x4e9   :  { %v2145_v30 = vmul.f32 0.03125, %v2144_v54 }
 0x4eb   :  { %v2146_v56 = vsub.f32 %v2126_v19, %v2145_v30  ;;  %v2147_v43 = vsub.f32 %v2128_v11, %v2145_v30  ;;  %v2148_v4 = vsub.f32 %v2131_v50, %v2145_v30  ;;  %v2149_v38 = vsub.f32 %v2133_v34, %v2145_v30  ;;  %v2994_v11 = vld [vmem:[%s4830_s4 + $0x20] sm:$0xff] }
 0x4ec   :  { %2375 = vmatpush.bf16.msra.mxu3 %v2994_v11 }
 0x4ed   :  { %v2150_v36 = vmul.f32 %v2146_v56, %v2146_v56  ;;  %v2151_v9 = vmul.f32 %v2147_v43, %v2147_v43  ;;  %v2152_v28 = vmul.f32 %v2148_v4, %v2148_v4  ;;  %v2153_v18 = vmul.f32 %v2149_v38, %v2149_v38 }
 0x4ef   :  { %v2154_v10 = vadd.f32 %v2151_v9, %v2150_v36  ;;  %v2820_v36 = vsel %vm2215_vm4, 1.0, %v3079_v8 }
 0x4f0   :  { %2376 = vmatpush.bf16.msra.mxu3 %v2993_v48 }
 0x4f1   :  { %v2155_v23 = vadd.f32 %v2154_v10, %v2152_v28 }
 0x4f3   :  { %v2156_v55 = vadd.f32 %v2155_v23, %v2153_v18 }
 0x4f4   :  { %2377 = vmatpush.bf16.msra.mxu3 %v2992_v45 }
 0x4f5   :  { %v2157_v59 = vrot.slane %v2156_v55, 4 }
 0x4f7   :  { %v2158_v32 = vadd.f32 %v2157_v59, %v2156_v55 }
 0x4f8   :  { %2378 = vmatpush.bf16.msra.mxu3 %v2991_v3 }
 0x4f9   :  { %v2159_v29 = vrot.slane %v2158_v32, 2 }
 0x4fb   :  { %v2160_v25 = vadd.f32 %v2159_v29, %v2158_v32 }
 0x4fd   :  { %v2161_v42 = vrot.slane %v2160_v25, 1 }
 0x4ff   :  { %v2162_v40 = vadd.f32 %v2161_v42, %v2160_v25 }
 0x501   :  { %v2163_v39 = vmul.f32 0.03125, %v2162_v40 }
 0x503   :  { %v2164_v58 = vadd.f32 1e-05, %v2163_v39 }
 0x505   :  { %3043 = vrsqrt.f32 %v2164_v58  ;;  %vm2171_vm1 = vweird.f32 %v2164_v58 }
 0x50b   :  { %v3044_v37 = vpop.eup %3043 }
 0x50c   :  { %v2166_v7 = vmul.f32 %v3044_v37, %v2164_v58  ;;  %vm2172_vm0 = vweird.f32 %v3044_v37 }
 0x50d   :  { %vm2173_vm2 = vmor %vm2171_vm1, %vm2172_vm0 }
 0x50e   :  { %v2167_v52 = vmul.f32 %v3044_v37, %v2166_v7 }
 0x510   :  { %v2168_v44 = vmul.f32 0.5, %v2167_v52  ;;  %v3013_v52 = vld [vmem:[%s4833_s7 + $0x38] sm:$0xff] }
 0x511   :  { %2497 = vmatpush.bf16.msra.mxu1 %v3013_v52 }
 0x512   :  { %v2169_v62 = vsub.f32 1.5, %v2168_v44 }
 0x514   :  { %v2170_v0 = vmul.f32 %v3044_v37, %v2169_v62  ;;  %v3012_v62 = vld [vmem:[%s4833_s7 + $0x30] sm:$0xff] }
 0x515   :  { %2498 = vmatpush.bf16.msra.mxu1 %v3012_v62 }
 0x516   :  { %v2174_v49 = vsel %vm2173_vm2, %v3044_v37, %v2170_v0 }
 0x517   :  { %v2176_v33 = vmul.f32 %v2175_v41, %v2174_v49  ;;  %v3011_v41 = vld [vmem:[%s4833_s7 + $0x28] sm:$0xff] }
 0x519   :  { %v2177_v35 = vperm.slane %v2176_v33, 0  ;;  %2499 = vmatpush.bf16.msra.mxu1 %v3011_v41 }
 0x51b   :  { %v2178_v2 = vmul.f32 %v2177_v35, %v2146_v56  ;;  %v2179_v5 = vmul.f32 %v2177_v35, %v2147_v43  ;;  %v2180_v53 = vmul.f32 %v2177_v35, %v2148_v4  ;;  %v2181_v24 = vmul.f32 %v2177_v35, %v2149_v38  ;;  %v2990_v4 = vld [vmem:[%s4830_s4] sm:$0xff]  ;;  %v3009_v35 = vld [vmem:[%s4833_s7 + $0x18] sm:$0xff] }
 0x51c   :  { %2379 = vmatpush.bf16.msra.mxu3 %v2990_v4  ;;  %v3038_v4 = vld [vmem:[%s4834_s8] ss:$0 sm:$0xff] }
 0x51d   :  { %v2184_v16 = vadd.f32 %v3036_v27, %v2178_v2  ;;  %v2185_v21 = vadd.f32 %v3036_v27, %v2179_v5  ;;  %v2186_v13 = vadd.f32 %v3036_v27, %v2180_v53  ;;  %v2187_v19 = vadd.f32 %v3036_v27, %v2181_v24  ;;  %2500 = vmatpush.bf16.msra.mxu1 %v3010_v1  ;;  %v3008_v27 = vld [vmem:[%s4833_s7 + $0x10] sm:$0xff]  ;;  %v3007_v2 = vld [vmem:[%s4833_s7 + $0x8] sm:$0xff]  ;;  %v3006_v24 = vld [vmem:[%s4833_s7] sm:$0xff] }
 0x51f   :  { %v2188_v50 = vmax.f32 %v2184_v16, 0.0  ;;  %v2189_v26 = vmax.f32 %v2185_v21, 0.0  ;;  %v2190_v46 = vmax.f32 %v2186_v13, 0.0  ;;  %v2191_v34 = vmax.f32 %v2187_v19, 0.0  ;;  %v2412_v19 = vld [vmem:[%s4831_s5 + $0x3] sm:$0x1] }
 0x521   :  { %2192 = vst [vmem:[#allocation2] sm:$0xff] %v2188_v50  ;;  %2501 = vmatpush.bf16.msra.mxu1 %v3009_v35 }
 0x522   :  { %2193 = vst [vmem:[#allocation2 + $0x8] sm:$0xff] %v2189_v26 }
 0x523   :  { %2194 = vst [vmem:[#allocation2 + $0x10] sm:$0xff] %v2190_v46  ;;  %v3037_v46 = vld [vmem:[%s4832_s6 + $0x3] ss:$0 sm:$0xff]  ;;  %s3080_s6 = smov [#allocation3]  }
 0x524   :  { %2195 = vst [vmem:[#allocation2 + $0x18] sm:$0xff] %v2191_v34  ;;  %s2529_s8 = sshll.u32 %s3080_s6, 4  ;;  %s2530_s8 = int_to_ptr.vmem [resolvable:$true] %s2529_s8 }
 0x525   :  { %2502 = vmatpush.bf16.msra.mxu1 %v3008_v27 }
 0x529   :  { %2503 = vmatpush.bf16.msra.mxu1 %v3007_v2 }
 0x52b   :  { %v2196_v6 = vld [vmem:[#allocation2] ss:$4 sm:$0xff]  ;;  %v2197_v60 = vld [vmem:[#allocation2 + $0x1] ss:$4 sm:$0xff]  ;;  %v2198_v54 = vld [vmem:[#allocation2 + $0x2] ss:$4 sm:$0xff] }
 0x52c   :  { %v2199_v30 = vld [vmem:[#allocation2 + $0x3] ss:$4 sm:$0xff]  ;;  %v2200_v56 = vmax.f32 %v2196_v6, %v2197_v60 }
 0x52d   :  { %v2201_v43 = vmax.f32 %v2198_v54, %v2199_v30  ;;  %2504 = vmatpush.bf16.msra.mxu1 %v3006_v24 }
 0x52f   :  { %v2202_v38 = vmax.f32 %v2200_v56, %v2201_v43 }
 0x531   :  { %2225 = vrot.lane.b32.xlu1 %v2202_v38, %s3078_s27  ;;  %v2223_v9 = vrot.slane %v2202_v38, 1  ;;  %v2221_v28 = vrot.slane %v2202_v38, 7 }
 0x533   :  { %v2224_v10 = vmul.f32 %v2821_v15, %v2223_v9  ;;  %v2222_v18 = vmul.f32 %v2820_v36, %v2221_v28 }
 0x535   :  { %v2245_v23 = vpack.c.bf16 %v2224_v10, %v2224_v10 }
 0x537   :  { %2319 = vmatmul.bf16.vlgmr.msra.gmra.mxu2 %v2245_v23 }
 0x5a3   :  { %v2226_v55 = vpop.permute.xlu1 %2225 }
 0x5a4   :  { %v2227_v59 = vadd.f32 %v2226_v55, %v2222_v18 }
 0x5a6   :  { %v2228_v32 = vpack.c.bf16 %v2227_v59, %v2227_v59 }
 0x5a8   :  { %2380 = vmatmul.bf16.vlgmr.msra.gmra.mxu3 %v2228_v32 }
 0x5ba   :  { %v2320_v29 = vpop.f32.mrf.mxu2 }
 0x5c2   :  { %v2322_v25 = vpop.f32.mrf.mxu2 }
 0x62b   :  { %v2381_v42 = vpop.f32.mrf.mxu3 }
 0x62c   :  { %v2382_v17 = vadd.f32 %v2381_v42, %v2320_v29 }
 0x62e   :  { %v2385_v40 = vrot.slane %v2382_v17, 4 }
 0x630   :  { %v2386_v39 = vadd.f32 %v2385_v40, %v2382_v17 }
 0x632   :  { %v2387_v8 = vrot.slane %v2386_v39, 2 }
 0x633   :  { %v2383_v57 = vpop.f32.mrf.mxu3 }
 0x634   :  { %v2388_v58 = vadd.f32 %v2387_v8, %v2386_v39 }
 0x636   :  { %v2389_v22 = vrot.slane %v2388_v58, 1 }
 0x638   :  { %v2390_v20 = vadd.f32 %v2389_v22, %v2388_v58 }
 0x63a   :  { %v2391_v47 = vmul.f32 0.125, %v2390_v20 }
 0x63c   :  { %v2392_v37 = vsub.f32 %v2382_v17, %v2391_v47 }
 0x63e   :  { %v2393_v63 = vmul.f32 %v2392_v37, %v2392_v37 }
 0x640   :  { %v2394_v7 = vrot.slane %v2393_v63, 4 }
 0x642   :  { %v2395_v14 = vadd.f32 %v2394_v7, %v2393_v63 }
 0x644   :  { %v2396_v44 = vrot.slane %v2395_v14, 2 }
 0x646   :  { %v2397_v61 = vadd.f32 %v2396_v44, %v2395_v14 }
 0x648   :  { %v2398_v0 = vrot.slane %v2397_v61, 1 }
 0x64a   :  { %v2399_v49 = vadd.f32 %v2398_v0, %v2397_v61 }
 0x64c   :  { %v2400_v33 = vmul.f32 0.125, %v2399_v49 }
 0x64e   :  { %v2401_v12 = vadd.f32 1e-05, %v2400_v33 }
 0x650   :  { %3045 = vrsqrt.f32 %v2401_v12  ;;  %vm2408_vm6 = vweird.f32 %v2401_v12 }
 0x656   :  { %v3046_v51 = vpop.eup %3045 }
 0x657   :  { %v2403_v5 = vmul.f32 %v3046_v51, %v2401_v12  ;;  %vm2409_vm5 = vweird.f32 %v3046_v51 }
 0x658   :  { %vm2410_vm7 = vmor %vm2408_vm6, %vm2409_vm5 }
 0x659   :  { %v2404_v53 = vmul.f32 %v3046_v51, %v2403_v5 }
 0x65b   :  { %v2405_v16 = vmul.f32 0.5, %v2404_v53 }
 0x65d   :  { %v2406_v21 = vsub.f32 1.5, %v2405_v16 }
 0x65f   :  { %v2407_v13 = vmul.f32 %v3046_v51, %v2406_v21 }
 0x661   :  { %v2411_v11 = vsel %vm2410_vm7, %v3046_v51, %v2407_v13 }
 0x662   :  { %v2413_v50 = vmul.f32 %v2412_v19, %v2411_v11 }
 0x664   :  { %v2414_v26 = vperm.slane %v2413_v50, 0 }
 0x666   :  { %v2415_v34 = vmul.f32 %v2414_v26, %v2392_v37 }
 0x668   :  { %v2418_v48 = vadd.f32 %v3037_v46, %v2415_v34 }
 0x66a   :  { %v2419_v45 = vmax.f32 %v2418_v48, 0.0 }
 0x66c   :  { %2420 = vst [vmem:[#allocation2] sm:$0xff] %v2419_v45 }
 0x673   :  { %v2421_v31 = vld [vmem:[#allocation2] ss:$4 sm:$0x3]  ;;  %v2422_v3 = vld [vmem:[#allocation2 + $0x1] ss:$4 sm:$0x3] }
 0x674   :  { %v2423_v6 = vld [vmem:[#allocation2 + $0x2] ss:$4 sm:$0x3]  ;;  %v2424_v60 = vld [vmem:[#allocation2 + $0x3] ss:$4 sm:$0x3]  ;;  %v2425_v54 = vmax.f32 %v2421_v31, %v2422_v3 }
 0x675   :  { %v2426_v30 = vmax.f32 %v2423_v6, %v2424_v60 }
 0x677   :  { %v2427_v56 = vmax.f32 %v2425_v54, %v2426_v30 }
 0x679   :  { %v2428_v43 = vpack.c.bf16 %v2427_v56, %v2427_v56 }
 0x67b   :  { %2505 = vmatmul.bf16.vlgmr.msra.gmra.mxu1 %v2428_v43 }
 0x6f8   :  { %v2506_v38 = vpop.f32.mrf.mxu1 }
 0x6f9   :  { %v2507_v15 = vadd.f32 %v3038_v4, %v2506_v38 }
 0x6fb   :  { %v2511_v36 = vsel %vm2510_vm8, %v2507_v15, -inf }
 0x6fc   :  { %2512 = vmax.xlane.f32.xlu2 %v2511_v36 }
 0x700   :  { %v2508_v9 = vpop.f32.mrf.mxu1 }
 0x76f   :  { %v2513_v28 = vpop.xlane.xlu2 %2512 }
 0x770   :  { %v2514_v10 = vsub.f32 %v2507_v15, %v2513_v28 }
 0x772   :  { %v2515_v18 = vmul.f32 1.442695, %v2514_v10 }
 0x774   :  { %3047 = vpow2.f32 %v2515_v18 }
 0x77a   :  { %v3048_v23 = vpop.eup %3047 }
 0x77b   :  { %v2517_v55 = vsel %vm2510_vm8, %v3048_v23, 0.0 }
 0x77c   :  { %2518 = vadd.xlane.f32.xlu0 %v2517_v55 }
 0x7ef   :  { %v2519_v59 = vpop.xlane.xlu0 %2518 }
 0x7f0   :  { %3049 = vlog2.f32 %v2519_v59 }
 0x7f6   :  { %v3050_v32 = vpop.eup %3049 }
 0x7f7   :  { %v2521_v29 = vmul.f32 0.6931472, %v3050_v32 }
 0x7f9   :  { %v2522_v25 = vsub.f32 %v2514_v10, %v2521_v29 }
 0x7fb   :  { %2523 = vst.msk [vmem:[#allocation3] sm:$0x3] %vm2510_vm8, %v2522_v25 }
 0x7fc   :  { %2534 = dma.vmem_to_hbm [thread:$0]  %s2530_s8, 32, %s2532_s24, [#allocation4]  }
 0x7fd   :  { %3075 = dma.done.wait [#allocation4], 32  }
 0x7fe   :  { %3076 = vsyncadd [#allocation4], 4294967264 }
 0x7ff   :  { %2539 = vsyncpa [#allocation4], 1 }

</bundles_post_ra>
